<compile_context>
chip_gen: v5e
topology: v5e:2x2
jax: 0.10.0
libtpu: 0.0.40
codegen_flags: <defaults>
</compile_context>

<pallas_src>
import jax
import jax.numpy as jnp
from jax import lax
from jax.experimental import pallas as pl
from jax.experimental.pallas import tpu as pltpu

_VMEM = pl.BlockSpec(memory_space=pltpu.MemorySpace.VMEM)

LANE = 128


def _round_up_lane(v):
    return max(LANE, ((v + LANE - 1) // LANE) * LANE)


# ----------------------------- kernel helpers -----------------------------

def _bn(h, gamma, beta, eps=1e-5):
    """torch.nn.BatchNorm1d forward, training mode (batch stats, biased var).

    Fused single statistics pass: var = E[h^2] - mean^2, then one per-lane
    scale/shift applied to h (instead of two centered passes over h)."""
    mean = jnp.mean(h, axis=0, keepdims=True)
    ex2 = jnp.mean(h * h, axis=0, keepdims=True)
    var = ex2 - mean * mean
    scale = gamma * lax.rsqrt(var + eps)
    shift = beta - mean * scale
    return h * scale + shift


def make_gps_forward_kernel(num_layers, heads, real_c, cpad, qkvp):
    """One fused kernel: pe_lin -> num_layers x GPSConv -> final MLP."""
    assert real_c % heads == 0
    d = real_c // heads
    scale = 1.0 / float(d) ** 0.5
    bf16 = jnp.bfloat16

    def mm(a, b):
        # MXU matmul: bf16 operands (weights already stored bf16), f32 accum.
        return jnp.dot(a.astype(bf16), b.astype(bf16),
                       preferred_element_type=jnp.float32)

    def kernel(pe_ref, bcol_ref, brow_ref, adj_ref,
               pe_w, pe_b,
               gw1, gb1, gw2, gb2, n1g, n1b,
               wqkv, bqkv, wo, bo, n2g, n2b,
               mw1, mb1, mw2, mb2, n3g, n3b,
               fw1, fb1, fw2, fb2, fw3, fb3,
               out_ref):
        # Per-graph attention bias built IN-KERNEL from the batch vector
        # (equivalent to to_dense_batch + key_padding_mask, no (N,N) HBM tensor).
        same = bcol_ref[...] == brow_ref[...]            # (N,1)==(1,N) -> (N,N)
        abias = jnp.where(same, 0.0, -1e30).astype(jnp.float32)
        adj = adj_ref[...]                               # (N,N) bf16, A[dst, src]

        # Per-head V lane masks inside the packed QKV slab (lanes
        # [2C + h*d, 2C + (h+1)*d)).  Constant; hoisted out of the layer loop.
        lane = lax.broadcasted_iota(jnp.int32, (1, qkvp), 1)
        vmasks = [
            ((lane >= 2 * real_c + hh * d) &
             (lane < 2 * real_c + (hh + 1) * d)).astype(jnp.float32)
            for hh in range(heads)
        ]

        # ---- pe_lin
        x = mm(pe_ref[...], pe_w[...]) + pe_b[...]

        # ---- GPSConv layers (statically unrolled; weights resident in VMEM)
        for l in range(num_layers):
            # local GINConv: h = nn((1+eps)*x + sum_{j in N(i)} x_j), eps = 0
            agg = mm(adj, x)
            m = x + agg
            h = jnp.maximum(mm(m, gw1[l]) + gb1[l], 0.0)
            h = mm(h, gw2[l]) + gb2[l]
            h_local = _bn(h + x, n1g[l], n1b[l])                 # residual + norm1

            # global multi-head self-attention, masked per graph.
            # Packed QKV projection: lanes [0:C)=Q, [C:2C)=K, [2C:3C)=V.
            qkv = mm(x, wqkv[l]) + bqkv[l]                       # (N, qkvp)

            p_list = []
            for hh in range(heads):
                qh = qkv[:, hh * d: hh * d + d]
                kh = qkv[:, real_c + hh * d: real_c + hh * d + d]
                s = lax.dot_general(qh.astype(bf16), kh.astype(bf16),
                                    (((1,), (1,)), ((), ())),
                                    preferred_element_type=jnp.float32)
                s = s * scale + abias
                s = s - jnp.max(s, axis=-1, keepdims=True)
                p = jnp.exp(s)
                p = p / jnp.sum(p, axis=-1, keepdims=True)       # exact softmax
                p_list.append(p)

            # Fold the heads*(p @ masked V) products into ONE MXU dot.
            # Head hh's output lands at lanes [2C + hh*d, 2C + (hh+1)*d) of
            # att_cat; wo[l] rows are placed at the same offsets.
            p_cat = jnp.concatenate(p_list, axis=1)              # (N, heads*N)
            v_stack = jnp.concatenate([qkv * vm for vm in vmasks], axis=0)
            att_cat = mm(p_cat, v_stack)                         # (N, qkvp)
            att = mm(att_cat, wo[l]) + bo[l]
            h_attn = _bn(att + x, n2g[l], n2b[l])                # residual + norm2

            # combine local + global, internal FFN, norm3
            out = h_local + h_attn
            ff = jnp.maximum(mm(out, mw1[l]) + mb1[l], 0.0)
            ff = mm(ff, mw2[l]) + mb2[l]
            x = _bn(out + ff, n3g[l], n3b[l])

        # ---- final GPS.mlp: Linear -> ReLU -> Linear -> ReLU -> Linear
        h = jnp.maximum(mm(x, fw1[...]) + fb1[...], 0.0)
        h = jnp.maximum(mm(h, fw2[...]) + fb2[...], 0.0)
        out_ref[...] = mm(h, fw3[...]) + fb3[...]

    return kernel


# ----------------------------- parameter init -----------------------------

def _dense(key, fan_in, fan_out):
    """torch.nn.Linear-style init; weight stored pre-transposed as (in, out)."""
    kw, kb = jax.random.split(key)
    bound = 1.0 / float(fan_in) ** 0.5
    w = jax.random.uniform(kw, (fan_in, fan_out), jnp.float32, -bound, bound)
    b = jax.random.uniform(kb, (1, fan_out), jnp.float32, -bound, bound)
    return w, b


def _pad2(a, rows, cols):
    """Zero-pad a 2-D array up to (rows, cols)."""
    return jnp.pad(a, ((0, rows - a.shape[0]), (0, cols - a.shape[1])))


def _init_layer(key, c, cp, hp, qkvp):
    ks = jax.random.split(key, 8)
    gw1, gb1 = _dense(ks[0], c, c)          # GIN nn Linear 1
    gw2, gb2 = _dense(ks[1], c, c)          # GIN nn Linear 2
    wq, bq = _dense(ks[2], c, c)            # MHA in-proj (q, k, v) + out-proj
    wk, bk = _dense(ks[3], c, c)
    wv, bv = _dense(ks[4], c, c)
    wo, bo = _dense(ks[5], c, c)
    mw1, mb1 = _dense(ks[6], c, 2 * c)      # GPSConv internal FFN
    mw2, mb2 = _dense(ks[7], 2 * c, c)
    gamma = jnp.ones((1, c), jnp.float32)   # fresh BatchNorm1d: gamma=1, beta=0
    beta = jnp.zeros((1, c), jnp.float32)

    # Packed QKV weight: real 3*C output columns share one lane slab of width
    # qkvp = round_up(3*C, 128): cols [0:C)=Wq, [C:2C)=Wk, [2C:3C)=Wv.
    wqkv = jnp.zeros((cp, qkvp), jnp.float32)
    wqkv = (wqkv.at[:c, 0 * c:1 * c].set(wq)
                 .at[:c, 1 * c:2 * c].set(wk)
                 .at[:c, 2 * c:3 * c].set(wv))
    bqkv = jnp.zeros((1, qkvp), jnp.float32)
    bqkv = (bqkv.at[:, 0 * c:1 * c].set(bq)
                 .at[:, 1 * c:2 * c].set(bk)
                 .at[:, 2 * c:3 * c].set(bv))

    # Out-projection rows re-indexed to the packed V lane positions (offset 2C)
    # so a single (qkvp, cp) matmul reproduces concat(heads) @ Wo.
    wo_p = jnp.zeros((qkvp, cp), jnp.float32).at[2 * c:3 * c, :c].set(wo)

    W = lambda a: a.astype(jnp.bfloat16)    # matmul weights stored bf16

    return dict(
        gw1=W(_pad2(gw1, cp, cp)), gb1=_pad2(gb1, 1, cp),
        gw2=W(_pad2(gw2, cp, cp)), gb2=_pad2(gb2, 1, cp),
        n1g=_pad2(gamma, 1, cp), n1b=_pad2(beta, 1, cp),
        wqkv=W(wqkv), bqkv=bqkv,
        wo=W(wo_p), bo=_pad2(bo, 1, cp),
        n2g=_pad2(gamma, 1, cp), n2b=_pad2(beta, 1, cp),
        mw1=W(_pad2(mw1, cp, hp)), mb1=_pad2(mb1, 1, hp),
        mw2=W(_pad2(mw2, hp, cp)), mb2=_pad2(mb2, 1, cp),
        n3g=_pad2(gamma, 1, cp), n3b=_pad2(beta, 1, cp),
    )


_LAYER_KEYS = ("gw1", "gb1", "gw2", "gb2", "n1g", "n1b",
               "wqkv", "bqkv", "wo", "bo", "n2g", "n2b",
               "mw1", "mb1", "mw2", "mb2", "n3g", "n3b")


def init_gps_params(key, pe_dim, channels, num_layers, heads):
    cp = _round_up_lane(channels)            # padded channel width (lane-dense)
    hp = _round_up_lane(2 * channels)        # padded hidden width (2C)
    pep = _round_up_lane(pe_dim)             # padded pe width
    qkvp = _round_up_lane(3 * channels)      # packed QKV slab width (128 @ C=32)

    keys = jax.random.split(key, num_layers + 4)
    pe_w, pe_b = _dense(keys[0], pe_dim, channels)
    layer_dicts = [_init_layer(keys[1 + i], channels, cp, hp, qkvp)
                   for i in range(num_layers)]
    # Stack each weight along a leading layer axis so the kernel loops in VMEM.
    stacked = {k: jnp.stack([ld[k] for ld in layer_dicts]) for k in _LAYER_KEYS}

    mw1, mb1 = _dense(keys[num_layers + 1], channels, channels)
    mw2, mb2 = _dense(keys[num_layers + 2], channels, 2 * channels)
    mw3, mb3 = _dense(keys[num_layers + 3], 2 * channels, channels)

    W = lambda a: a.astype(jnp.bfloat16)

    return dict(
        channels=channels, cpad=cp, hpad=hp, pepad=pep, qkvpad=qkvp,
        heads=heads, num_layers=num_layers,
        pe_lin_w=W(_pad2(pe_w, pep, cp)), pe_lin_b=_pad2(pe_b, 1, cp),
        stacked=stacked,
        mlp_w1=W(_pad2(mw1, cp, cp)), mlp_b1=_pad2(mb1, 1, cp),
        mlp_w2=W(_pad2(mw2, cp, hp)), mlp_b2=_pad2(mb2, 1, hp),
        mlp_w3=W(_pad2(mw3, hp, cp)), mlp_b3=_pad2(mb3, 1, cp),
    )


# ------------------------------ GPS forward -------------------------------

def gps_forward(params, pe, edge_index, batch):
    n = pe.shape[0]
    c = params["channels"]
    cp = params["cpad"]
    pep = params["pepad"]
    qkvp = params["qkvpad"]
    heads = params["heads"]

    # glue: dense adjacency A[dst, src] (GINConv add-aggregation, src->dst flow),
    # passed in bf16 (0/1 multiplicities are exact) to halve its VMEM/DMA.
    adj = (jnp.zeros((n, n), jnp.float32)
           .at[edge_index[1], edge_index[0]].add(1.0)).astype(jnp.bfloat16)
    # glue: batch ids as column / row vectors (mask is built inside the kernel)
    bcol = batch.astype(jnp.int32).reshape(n, 1)
    brow = batch.astype(jnp.int32).reshape(1, n)
    # glue: zero-pad pe to a lane-dense width
    pe_p = jnp.pad(pe.astype(jnp.float32), ((0, 0), (0, pep - pe.shape[1])))

    s = params["stacked"]
    args = (pe_p, bcol, brow, adj,
            params["pe_lin_w"], params["pe_lin_b"],
            s["gw1"], s["gb1"], s["gw2"], s["gb2"], s["n1g"], s["n1b"],
            s["wqkv"], s["bqkv"], s["wo"], s["bo"], s["n2g"], s["n2b"],
            s["mw1"], s["mb1"], s["mw2"], s["mb2"], s["n3g"], s["n3b"],
            params["mlp_w1"], params["mlp_b1"],
            params["mlp_w2"], params["mlp_b2"],
            params["mlp_w3"], params["mlp_b3"])

    # Scoped-VMEM budget sized from the actual resident footprint (args + out
    # + activation temporaries), floored at 32 MiB so we never go below the
    # compiler default; matters on v5e whose default is only ~16 MiB.
    arg_bytes = sum(int(a.size) * a.dtype.itemsize for a in args)
    out_bytes = n * cp * 4
    temp_bytes = (20 * n * cp + 4 * n * n + heads * n * n + heads * n * qkvp) * 4
    vmem_limit = int(min(100 << 20,
                         max(32 << 20, 2 * (arg_bytes + out_bytes + temp_bytes))))

    kernel = make_gps_forward_kernel(params["num_layers"], heads, c, cp, qkvp)
    out_p = pl.pallas_call(
        kernel,
        out_shape=jax.ShapeDtypeStruct((n, cp), jnp.float32),
        in_specs=[_VMEM] * len(args),
        out_specs=_VMEM,
        compiler_params=pltpu.CompilerParams(vmem_limit_bytes=vmem_limit),
    )(*args)
    return out_p[:, :c]


# --------------------------------- main ------------------------------------

if __name__ == "__main__":
    # Small demo shapes; for MXU saturation on real workloads batch enough
    # graphs per call that N is a multiple of 128 (v5e) / 256 (v6e, v7x).
    N, PE_DIM, CHANNELS, NUM_LAYERS, HEADS = 16, 8, 32, 2, 4

    key = jax.random.PRNGKey(0)
    k_pe, k_par = jax.random.split(key)
    pe = jax.random.normal(k_pe, (N, PE_DIM), jnp.float32)

    # two graphs of 8 nodes each, bidirectional ring within each graph
    src, dst = [], []
    for g in range(2):
        for i in range(8):
            a, b = g * 8 + i, g * 8 + (i + 1) % 8
            src += [a, b]
            dst += [b, a]
    edge_index = jnp.array([src, dst], dtype=jnp.int32)    # (2, 32)
    batch = jnp.array([0] * 8 + [1] * 8, dtype=jnp.int32)  # (16,)

    params = init_gps_params(k_par, PE_DIM, CHANNELS, NUM_LAYERS, HEADS)

    out = gps_forward(params, pe, edge_index, batch)
    out = jax.block_until_ready(out)

    assert out.shape == (N, CHANNELS), out.shape
    assert bool(jnp.all(jnp.isfinite(out)))
    print("KERNEL_OK")
</pallas_src>

<mosaic_0001>
module attributes {stable_mosaic.version = 11 : i64} {
  func.func @kernel(%arg0: memref<16x128xf32, #tpu.memory_space<vmem>>, %arg1: memref<16x1xi32, #tpu.memory_space<vmem>>, %arg2: memref<1x16xi32, #tpu.memory_space<vmem>>, %arg3: memref<16x16xbf16, #tpu.memory_space<vmem>>, %arg4: memref<128x128xbf16, #tpu.memory_space<vmem>>, %arg5: memref<1x128xf32, #tpu.memory_space<vmem>>, %arg6: memref<2x128x128xbf16, #tpu.memory_space<vmem>>, %arg7: memref<2x1x128xf32, #tpu.memory_space<vmem>>, %arg8: memref<2x128x128xbf16, #tpu.memory_space<vmem>>, %arg9: memref<2x1x128xf32, #tpu.memory_space<vmem>>, %arg10: memref<2x1x128xf32, #tpu.memory_space<vmem>>, %arg11: memref<2x1x128xf32, #tpu.memory_space<vmem>>, %arg12: memref<2x128x128xbf16, #tpu.memory_space<vmem>>, %arg13: memref<2x1x128xf32, #tpu.memory_space<vmem>>, %arg14: memref<2x128x128xbf16, #tpu.memory_space<vmem>>, %arg15: memref<2x1x128xf32, #tpu.memory_space<vmem>>, %arg16: memref<2x1x128xf32, #tpu.memory_space<vmem>>, %arg17: memref<2x1x128xf32, #tpu.memory_space<vmem>>, %arg18: memref<2x128x128xbf16, #tpu.memory_space<vmem>>, %arg19: memref<2x1x128xf32, #tpu.memory_space<vmem>>, %arg20: memref<2x128x128xbf16, #tpu.memory_space<vmem>>, %arg21: memref<2x1x128xf32, #tpu.memory_space<vmem>>, %arg22: memref<2x1x128xf32, #tpu.memory_space<vmem>>, %arg23: memref<2x1x128xf32, #tpu.memory_space<vmem>>, %arg24: memref<128x128xbf16, #tpu.memory_space<vmem>>, %arg25: memref<1x128xf32, #tpu.memory_space<vmem>>, %arg26: memref<128x128xbf16, #tpu.memory_space<vmem>>, %arg27: memref<1x128xf32, #tpu.memory_space<vmem>>, %arg28: memref<128x128xbf16, #tpu.memory_space<vmem>>, %arg29: memref<1x128xf32, #tpu.memory_space<vmem>>, %arg30: memref<16x128xf32, #tpu.memory_space<vmem>>) attributes {dimension_semantics = [], scalar_prefetch = 0 : i64, scratch_operands = 0 : i64, tpu.core_type = #tpu.core_type<tc>} {
    %c0 = arith.constant 0 : index
    %c0_0 = arith.constant 0 : index
    %0 = vector.load %arg1[%c0, %c0_0] : memref<16x1xi32, #tpu.memory_space<vmem>>, vector<16x1xi32>
    %c0_1 = arith.constant 0 : index
    %c0_2 = arith.constant 0 : index
    %1 = vector.load %arg2[%c0_1, %c0_2] : memref<1x16xi32, #tpu.memory_space<vmem>>, vector<1x16xi32>
    %2 = vector.broadcast %0 : vector<16x1xi32> to vector<16x16xi32>
    %3 = vector.broadcast %1 : vector<1x16xi32> to vector<16x16xi32>
    %4 = arith.cmpi eq, %2, %3 : vector<16x16xi32>
    %cst = arith.constant 0.000000e+00 : f32
    %cst_3 = arith.constant -1.000000e+30 : f32
    %5 = vector.broadcast %cst : f32 to vector<16x16xf32>
    %6 = vector.broadcast %cst_3 : f32 to vector<16x16xf32>
    %7 = arith.select %4, %5, %6 : vector<16x16xi1>, vector<16x16xf32>
    %c0_4 = arith.constant 0 : index
    %c0_5 = arith.constant 0 : index
    %8 = vector.load %arg3[%c0_4, %c0_5] : memref<16x16xbf16, #tpu.memory_space<vmem>>, vector<16x16xbf16>
    %9 = tpu.iota {dimensions = array<i32: 1>} : vector<1x128xi32>
    %c64_i32 = arith.constant 64 : i32
    %10 = vector.broadcast %c64_i32 : i32 to vector<1x128xi32>
    %11 = arith.cmpi sge, %9, %10 : vector<1x128xi32>
    %c72_i32 = arith.constant 72 : i32
    %12 = vector.broadcast %c72_i32 : i32 to vector<1x128xi32>
    %13 = arith.cmpi slt, %9, %12 : vector<1x128xi32>
    %14 = arith.andi %11, %13 : vector<1x128xi1>
    %15 = arith.extui %14 : vector<1x128xi1> to vector<1x128xi32>
    %16 = arith.sitofp %15 : vector<1x128xi32> to vector<1x128xf32>
    %c72_i32_6 = arith.constant 72 : i32
    %17 = vector.broadcast %c72_i32_6 : i32 to vector<1x128xi32>
    %18 = arith.cmpi sge, %9, %17 : vector<1x128xi32>
    %c80_i32 = arith.constant 80 : i32
    %19 = vector.broadcast %c80_i32 : i32 to vector<1x128xi32>
    %20 = arith.cmpi slt, %9, %19 : vector<1x128xi32>
    %21 = arith.andi %18, %20 : vector<1x128xi1>
    %22 = arith.extui %21 : vector<1x128xi1> to vector<1x128xi32>
    %23 = arith.sitofp %22 : vector<1x128xi32> to vector<1x128xf32>
    %c80_i32_7 = arith.constant 80 : i32
    %24 = vector.broadcast %c80_i32_7 : i32 to vector<1x128xi32>
    %25 = arith.cmpi sge, %9, %24 : vector<1x128xi32>
    %c88_i32 = arith.constant 88 : i32
    %26 = vector.broadcast %c88_i32 : i32 to vector<1x128xi32>
    %27 = arith.cmpi slt, %9, %26 : vector<1x128xi32>
    %28 = arith.andi %25, %27 : vector<1x128xi1>
    %29 = arith.extui %28 : vector<1x128xi1> to vector<1x128xi32>
    %30 = arith.sitofp %29 : vector<1x128xi32> to vector<1x128xf32>
    %c88_i32_8 = arith.constant 88 : i32
    %31 = vector.broadcast %c88_i32_8 : i32 to vector<1x128xi32>
    %32 = arith.cmpi sge, %9, %31 : vector<1x128xi32>
    %c96_i32 = arith.constant 96 : i32
    %33 = vector.broadcast %c96_i32 : i32 to vector<1x128xi32>
    %34 = arith.cmpi slt, %9, %33 : vector<1x128xi32>
    %35 = arith.andi %32, %34 : vector<1x128xi1>
    %36 = arith.extui %35 : vector<1x128xi1> to vector<1x128xi32>
    %37 = arith.sitofp %36 : vector<1x128xi32> to vector<1x128xf32>
    %c0_9 = arith.constant 0 : index
    %c0_10 = arith.constant 0 : index
    %38 = vector.load %arg0[%c0_9, %c0_10] : memref<16x128xf32, #tpu.memory_space<vmem>>, vector<16x128xf32>
    %c0_11 = arith.constant 0 : index
    %c0_12 = arith.constant 0 : index
    %39 = vector.load %arg4[%c0_11, %c0_12] : memref<128x128xbf16, #tpu.memory_space<vmem>>, vector<128x128xbf16>
    %40 = arith.truncf %38 : vector<16x128xf32> to vector<16x128xbf16>
    %cst_13 = arith.constant dense<0.000000e+00> : vector<16x128xf32>
    %41 = tpu.matmul %40, %39, %cst_13 {dimension_numbers = #tpu.dot_dimension_numbers<[1], [0], [0], [1], [0, 0, 1, 1], [], []>} : vector<16x128xbf16>, vector<128x128xbf16>, vector<16x128xf32> -> vector<16x128xf32>
    %c0_14 = arith.constant 0 : index
    %c0_15 = arith.constant 0 : index
    %42 = vector.load %arg5[%c0_14, %c0_15] : memref<1x128xf32, #tpu.memory_space<vmem>>, vector<1x128xf32>
    %43 = vector.broadcast %42 : vector<1x128xf32> to vector<16x128xf32>
    %44 = arith.addf %41, %43 : vector<16x128xf32>
    %45 = arith.truncf %44 : vector<16x128xf32> to vector<16x128xbf16>
    %cst_16 = arith.constant dense<0.000000e+00> : vector<16x128xf32>
    %46 = tpu.matmul %8, %45, %cst_16 {dimension_numbers = #tpu.dot_dimension_numbers<[1], [0], [0], [1], [0, 0, 1, 1], [], []>} : vector<16x16xbf16>, vector<16x128xbf16>, vector<16x128xf32> -> vector<16x128xf32>
    %47 = arith.addf %44, %46 : vector<16x128xf32>
    %c0_17 = arith.constant 0 : index
    %c0_18 = arith.constant 0 : index
    %c0_19 = arith.constant 0 : index
    %48 = vector.load %arg6[%c0_17, %c0_18, %c0_19] : memref<2x128x128xbf16, #tpu.memory_space<vmem>>, vector<1x128x128xbf16>
    %49 = vector.shape_cast %48 : vector<1x128x128xbf16> to vector<128x128xbf16>
    %50 = arith.truncf %47 : vector<16x128xf32> to vector<16x128xbf16>
    %cst_20 = arith.constant dense<0.000000e+00> : vector<16x128xf32>
    %51 = tpu.matmul %50, %49, %cst_20 {dimension_numbers = #tpu.dot_dimension_numbers<[1], [0], [0], [1], [0, 0, 1, 1], [], []>} : vector<16x128xbf16>, vector<128x128xbf16>, vector<16x128xf32> -> vector<16x128xf32>
    %c0_21 = arith.constant 0 : index
    %c0_22 = arith.constant 0 : index
    %c0_23 = arith.constant 0 : index
    %52 = vector.load %arg7[%c0_21, %c0_22, %c0_23] : memref<2x1x128xf32, #tpu.memory_space<vmem>>, vector<1x1x128xf32>
    %53 = vector.shape_cast %52 : vector<1x1x128xf32> to vector<1x128xf32>
    %54 = vector.broadcast %53 : vector<1x128xf32> to vector<16x128xf32>
    %55 = arith.addf %51, %54 : vector<16x128xf32>
    %cst_24 = arith.constant 0.000000e+00 : f32
    %56 = vector.broadcast %cst_24 : f32 to vector<16x128xf32>
    %57 = arith.maximumf %55, %56 : vector<16x128xf32>
    %c0_25 = arith.constant 0 : index
    %c0_26 = arith.constant 0 : index
    %c0_27 = arith.constant 0 : index
    %58 = vector.load %arg8[%c0_25, %c0_26, %c0_27] : memref<2x128x128xbf16, #tpu.memory_space<vmem>>, vector<1x128x128xbf16>
    %59 = vector.shape_cast %58 : vector<1x128x128xbf16> to vector<128x128xbf16>
    %60 = arith.truncf %57 : vector<16x128xf32> to vector<16x128xbf16>
    %cst_28 = arith.constant dense<0.000000e+00> : vector<16x128xf32>
    %61 = tpu.matmul %60, %59, %cst_28 {dimension_numbers = #tpu.dot_dimension_numbers<[1], [0], [0], [1], [0, 0, 1, 1], [], []>} : vector<16x128xbf16>, vector<128x128xbf16>, vector<16x128xf32> -> vector<16x128xf32>
    %c0_29 = arith.constant 0 : index
    %c0_30 = arith.constant 0 : index
    %c0_31 = arith.constant 0 : index
    %62 = vector.load %arg9[%c0_29, %c0_30, %c0_31] : memref<2x1x128xf32, #tpu.memory_space<vmem>>, vector<1x1x128xf32>
    %63 = vector.shape_cast %62 : vector<1x1x128xf32> to vector<1x128xf32>
    %64 = vector.broadcast %63 : vector<1x128xf32> to vector<16x128xf32>
    %65 = arith.addf %61, %64 : vector<16x128xf32>
    %66 = arith.addf %65, %44 : vector<16x128xf32>
    %c0_32 = arith.constant 0 : index
    %c0_33 = arith.constant 0 : index
    %c0_34 = arith.constant 0 : index
    %67 = vector.load %arg10[%c0_32, %c0_33, %c0_34] : memref<2x1x128xf32, #tpu.memory_space<vmem>>, vector<1x1x128xf32>
    %68 = vector.shape_cast %67 : vector<1x1x128xf32> to vector<1x128xf32>
    %c0_35 = arith.constant 0 : index
    %c0_36 = arith.constant 0 : index
    %c0_37 = arith.constant 0 : index
    %69 = vector.load %arg11[%c0_35, %c0_36, %c0_37] : memref<2x1x128xf32, #tpu.memory_space<vmem>>, vector<1x1x128xf32>
    %70 = vector.shape_cast %69 : vector<1x1x128xf32> to vector<1x128xf32>
    %cst_38 = arith.constant dense<0.000000e+00> : vector<128xf32>
    %71 = vector.multi_reduction <add>, %66, %cst_38 [0] : vector<16x128xf32> to vector<128xf32>
    %72 = vector.shape_cast %71 : vector<128xf32> to vector<1x128xf32>
    %cst_39 = arith.constant 1.600000e+01 : f32
    %73 = vector.broadcast %cst_39 : f32 to vector<1x128xf32>
    %74 = arith.divf %72, %73 : vector<1x128xf32>
    %75 = arith.mulf %66, %66 : vector<16x128xf32>
    %cst_40 = arith.constant dense<0.000000e+00> : vector<128xf32>
    %76 = vector.multi_reduction <add>, %75, %cst_40 [0] : vector<16x128xf32> to vector<128xf32>
    %77 = vector.shape_cast %76 : vector<128xf32> to vector<1x128xf32>
    %cst_41 = arith.constant 1.600000e+01 : f32
    %78 = vector.broadcast %cst_41 : f32 to vector<1x128xf32>
    %79 = arith.divf %77, %78 : vector<1x128xf32>
    %80 = arith.mulf %74, %74 : vector<1x128xf32>
    %81 = arith.subf %79, %80 : vector<1x128xf32>
    %cst_42 = arith.constant 9.99999974E-6 : f32
    %82 = vector.broadcast %cst_42 : f32 to vector<1x128xf32>
    %83 = arith.addf %81, %82 : vector<1x128xf32>
    %84 = math.rsqrt %83 : vector<1x128xf32>
    %85 = arith.mulf %68, %84 : vector<1x128xf32>
    %86 = arith.mulf %74, %85 : vector<1x128xf32>
    %87 = arith.subf %70, %86 : vector<1x128xf32>
    %88 = vector.broadcast %85 : vector<1x128xf32> to vector<16x128xf32>
    %89 = arith.mulf %66, %88 : vector<16x128xf32>
    %90 = vector.broadcast %87 : vector<1x128xf32> to vector<16x128xf32>
    %91 = arith.addf %89, %90 : vector<16x128xf32>
    %c0_43 = arith.constant 0 : index
    %c0_44 = arith.constant 0 : index
    %c0_45 = arith.constant 0 : index
    %92 = vector.load %arg12[%c0_43, %c0_44, %c0_45] : memref<2x128x128xbf16, #tpu.memory_space<vmem>>, vector<1x128x128xbf16>
    %93 = vector.shape_cast %92 : vector<1x128x128xbf16> to vector<128x128xbf16>
    %94 = arith.truncf %44 : vector<16x128xf32> to vector<16x128xbf16>
    %cst_46 = arith.constant dense<0.000000e+00> : vector<16x128xf32>
    %95 = tpu.matmul %94, %93, %cst_46 {dimension_numbers = #tpu.dot_dimension_numbers<[1], [0], [0], [1], [0, 0, 1, 1], [], []>} : vector<16x128xbf16>, vector<128x128xbf16>, vector<16x128xf32> -> vector<16x128xf32>
    %c0_47 = arith.constant 0 : index
    %c0_48 = arith.constant 0 : index
    %c0_49 = arith.constant 0 : index
    %96 = vector.load %arg13[%c0_47, %c0_48, %c0_49] : memref<2x1x128xf32, #tpu.memory_space<vmem>>, vector<1x1x128xf32>
    %97 = vector.shape_cast %96 : vector<1x1x128xf32> to vector<1x128xf32>
    %98 = vector.broadcast %97 : vector<1x128xf32> to vector<16x128xf32>
    %99 = arith.addf %95, %98 : vector<16x128xf32>
    %100 = vector.extract_strided_slice %99 {offsets = [0, 0], sizes = [16, 8], strides = [1, 1]} : vector<16x128xf32> to vector<16x8xf32>
    %101 = vector.extract_strided_slice %99 {offsets = [0, 32], sizes = [16, 8], strides = [1, 1]} : vector<16x128xf32> to vector<16x8xf32>
    %102 = arith.truncf %100 : vector<16x8xf32> to vector<16x8xbf16>
    %103 = arith.truncf %101 : vector<16x8xf32> to vector<16x8xbf16>
    %cst_50 = arith.constant dense<0.000000e+00> : vector<16x16xf32>
    %104 = tpu.matmul %102, %103, %cst_50 {dimension_numbers = #tpu.dot_dimension_numbers<[1], [1], [0], [0], [0, 0, 1, 0], [], []>} : vector<16x8xbf16>, vector<16x8xbf16>, vector<16x16xf32> -> vector<16x16xf32>
    %cst_51 = arith.constant 0.353553385 : f32
    %105 = vector.broadcast %cst_51 : f32 to vector<16x16xf32>
    %106 = arith.mulf %104, %105 : vector<16x16xf32>
    %107 = arith.addf %106, %7 : vector<16x16xf32>
    %cst_52 = arith.constant dense<0xFF800000> : vector<16xf32>
    %108 = vector.multi_reduction <maximumf>, %107, %cst_52 [1] : vector<16x16xf32> to vector<16xf32>
    %109 = vector.shape_cast %108 : vector<16xf32> to vector<16x1xf32>
    %110 = vector.broadcast %109 : vector<16x1xf32> to vector<16x16xf32>
    %111 = arith.subf %107, %110 : vector<16x16xf32>
    %112 = math.exp %111 : vector<16x16xf32>
    %cst_53 = arith.constant dense<0.000000e+00> : vector<16xf32>
    %113 = vector.multi_reduction <add>, %112, %cst_53 [1] : vector<16x16xf32> to vector<16xf32>
    %114 = vector.shape_cast %113 : vector<16xf32> to vector<16x1xf32>
    %115 = vector.broadcast %114 : vector<16x1xf32> to vector<16x16xf32>
    %116 = arith.divf %112, %115 : vector<16x16xf32>
    %117 = vector.extract_strided_slice %99 {offsets = [0, 8], sizes = [16, 8], strides = [1, 1]} : vector<16x128xf32> to vector<16x8xf32>
    %118 = vector.extract_strided_slice %99 {offsets = [0, 40], sizes = [16, 8], strides = [1, 1]} : vector<16x128xf32> to vector<16x8xf32>
    %119 = arith.truncf %117 : vector<16x8xf32> to vector<16x8xbf16>
    %120 = arith.truncf %118 : vector<16x8xf32> to vector<16x8xbf16>
    %cst_54 = arith.constant dense<0.000000e+00> : vector<16x16xf32>
    %121 = tpu.matmul %119, %120, %cst_54 {dimension_numbers = #tpu.dot_dimension_numbers<[1], [1], [0], [0], [0, 0, 1, 0], [], []>} : vector<16x8xbf16>, vector<16x8xbf16>, vector<16x16xf32> -> vector<16x16xf32>
    %cst_55 = arith.constant 0.353553385 : f32
    %122 = vector.broadcast %cst_55 : f32 to vector<16x16xf32>
    %123 = arith.mulf %121, %122 : vector<16x16xf32>
    %124 = arith.addf %123, %7 : vector<16x16xf32>
    %cst_56 = arith.constant dense<0xFF800000> : vector<16xf32>
    %125 = vector.multi_reduction <maximumf>, %124, %cst_56 [1] : vector<16x16xf32> to vector<16xf32>
    %126 = vector.shape_cast %125 : vector<16xf32> to vector<16x1xf32>
    %127 = vector.broadcast %126 : vector<16x1xf32> to vector<16x16xf32>
    %128 = arith.subf %124, %127 : vector<16x16xf32>
    %129 = math.exp %128 : vector<16x16xf32>
    %cst_57 = arith.constant dense<0.000000e+00> : vector<16xf32>
    %130 = vector.multi_reduction <add>, %129, %cst_57 [1] : vector<16x16xf32> to vector<16xf32>
    %131 = vector.shape_cast %130 : vector<16xf32> to vector<16x1xf32>
    %132 = vector.broadcast %131 : vector<16x1xf32> to vector<16x16xf32>
    %133 = arith.divf %129, %132 : vector<16x16xf32>
    %134 = vector.extract_strided_slice %99 {offsets = [0, 16], sizes = [16, 8], strides = [1, 1]} : vector<16x128xf32> to vector<16x8xf32>
    %135 = vector.extract_strided_slice %99 {offsets = [0, 48], sizes = [16, 8], strides = [1, 1]} : vector<16x128xf32> to vector<16x8xf32>
    %136 = arith.truncf %134 : vector<16x8xf32> to vector<16x8xbf16>
    %137 = arith.truncf %135 : vector<16x8xf32> to vector<16x8xbf16>
    %cst_58 = arith.constant dense<0.000000e+00> : vector<16x16xf32>
    %138 = tpu.matmul %136, %137, %cst_58 {dimension_numbers = #tpu.dot_dimension_numbers<[1], [1], [0], [0], [0, 0, 1, 0], [], []>} : vector<16x8xbf16>, vector<16x8xbf16>, vector<16x16xf32> -> vector<16x16xf32>
    %cst_59 = arith.constant 0.353553385 : f32
    %139 = vector.broadcast %cst_59 : f32 to vector<16x16xf32>
    %140 = arith.mulf %138, %139 : vector<16x16xf32>
    %141 = arith.addf %140, %7 : vector<16x16xf32>
    %cst_60 = arith.constant dense<0xFF800000> : vector<16xf32>
    %142 = vector.multi_reduction <maximumf>, %141, %cst_60 [1] : vector<16x16xf32> to vector<16xf32>
    %143 = vector.shape_cast %142 : vector<16xf32> to vector<16x1xf32>
    %144 = vector.broadcast %143 : vector<16x1xf32> to vector<16x16xf32>
    %145 = arith.subf %141, %144 : vector<16x16xf32>
    %146 = math.exp %145 : vector<16x16xf32>
    %cst_61 = arith.constant dense<0.000000e+00> : vector<16xf32>
    %147 = vector.multi_reduction <add>, %146, %cst_61 [1] : vector<16x16xf32> to vector<16xf32>
    %148 = vector.shape_cast %147 : vector<16xf32> to vector<16x1xf32>
    %149 = vector.broadcast %148 : vector<16x1xf32> to vector<16x16xf32>
    %150 = arith.divf %146, %149 : vector<16x16xf32>
    %151 = vector.extract_strided_slice %99 {offsets = [0, 24], sizes = [16, 8], strides = [1, 1]} : vector<16x128xf32> to vector<16x8xf32>
    %152 = vector.extract_strided_slice %99 {offsets = [0, 56], sizes = [16, 8], strides = [1, 1]} : vector<16x128xf32> to vector<16x8xf32>
    %153 = arith.truncf %151 : vector<16x8xf32> to vector<16x8xbf16>
    %154 = arith.truncf %152 : vector<16x8xf32> to vector<16x8xbf16>
    %cst_62 = arith.constant dense<0.000000e+00> : vector<16x16xf32>
    %155 = tpu.matmul %153, %154, %cst_62 {dimension_numbers = #tpu.dot_dimension_numbers<[1], [1], [0], [0], [0, 0, 1, 0], [], []>} : vector<16x8xbf16>, vector<16x8xbf16>, vector<16x16xf32> -> vector<16x16xf32>
    %cst_63 = arith.constant 0.353553385 : f32
    %156 = vector.broadcast %cst_63 : f32 to vector<16x16xf32>
    %157 = arith.mulf %155, %156 : vector<16x16xf32>
    %158 = arith.addf %157, %7 : vector<16x16xf32>
    %cst_64 = arith.constant dense<0xFF800000> : vector<16xf32>
    %159 = vector.multi_reduction <maximumf>, %158, %cst_64 [1] : vector<16x16xf32> to vector<16xf32>
    %160 = vector.shape_cast %159 : vector<16xf32> to vector<16x1xf32>
    %161 = vector.broadcast %160 : vector<16x1xf32> to vector<16x16xf32>
    %162 = arith.subf %158, %161 : vector<16x16xf32>
    %163 = math.exp %162 : vector<16x16xf32>
    %cst_65 = arith.constant dense<0.000000e+00> : vector<16xf32>
    %164 = vector.multi_reduction <add>, %163, %cst_65 [1] : vector<16x16xf32> to vector<16xf32>
    %165 = vector.shape_cast %164 : vector<16xf32> to vector<16x1xf32>
    %166 = vector.broadcast %165 : vector<16x1xf32> to vector<16x16xf32>
    %167 = arith.divf %163, %166 : vector<16x16xf32>
    %168 = tpu.concatenate %116, %133, %150, %167 in 1 : vector<16x16xf32>, vector<16x16xf32>, vector<16x16xf32>, vector<16x16xf32> -> vector<16x64xf32>
    %169 = vector.broadcast %16 : vector<1x128xf32> to vector<16x128xf32>
    %170 = arith.mulf %99, %169 : vector<16x128xf32>
    %171 = vector.broadcast %23 : vector<1x128xf32> to vector<16x128xf32>
    %172 = arith.mulf %99, %171 : vector<16x128xf32>
    %173 = vector.broadcast %30 : vector<1x128xf32> to vector<16x128xf32>
    %174 = arith.mulf %99, %173 : vector<16x128xf32>
    %175 = vector.broadcast %37 : vector<1x128xf32> to vector<16x128xf32>
    %176 = arith.mulf %99, %175 : vector<16x128xf32>
    %177 = tpu.concatenate %170, %172, %174, %176 in 0 : vector<16x128xf32>, vector<16x128xf32>, vector<16x128xf32>, vector<16x128xf32> -> vector<64x128xf32>
    %178 = arith.truncf %168 : vector<16x64xf32> to vector<16x64xbf16>
    %179 = arith.truncf %177 : vector<64x128xf32> to vector<64x128xbf16>
    %cst_66 = arith.constant dense<0.000000e+00> : vector<16x128xf32>
    %180 = tpu.matmul %178, %179, %cst_66 {dimension_numbers = #tpu.dot_dimension_numbers<[1], [0], [0], [1], [0, 0, 1, 1], [], []>} : vector<16x64xbf16>, vector<64x128xbf16>, vector<16x128xf32> -> vector<16x128xf32>
    %c0_67 = arith.constant 0 : index
    %c0_68 = arith.constant 0 : index
    %c0_69 = arith.constant 0 : index
    %181 = vector.load %arg14[%c0_67, %c0_68, %c0_69] : memref<2x128x128xbf16, #tpu.memory_space<vmem>>, vector<1x128x128xbf16>
    %182 = vector.shape_cast %181 : vector<1x128x128xbf16> to vector<128x128xbf16>
    %183 = arith.truncf %180 : vector<16x128xf32> to vector<16x128xbf16>
    %cst_70 = arith.constant dense<0.000000e+00> : vector<16x128xf32>
    %184 = tpu.matmul %183, %182, %cst_70 {dimension_numbers = #tpu.dot_dimension_numbers<[1], [0], [0], [1], [0, 0, 1, 1], [], []>} : vector<16x128xbf16>, vector<128x128xbf16>, vector<16x128xf32> -> vector<16x128xf32>
    %c0_71 = arith.constant 0 : index
    %c0_72 = arith.constant 0 : index
    %c0_73 = arith.constant 0 : index
    %185 = vector.load %arg15[%c0_71, %c0_72, %c0_73] : memref<2x1x128xf32, #tpu.memory_space<vmem>>, vector<1x1x128xf32>
    %186 = vector.shape_cast %185 : vector<1x1x128xf32> to vector<1x128xf32>
    %187 = vector.broadcast %186 : vector<1x128xf32> to vector<16x128xf32>
    %188 = arith.addf %184, %187 : vector<16x128xf32>
    %189 = arith.addf %188, %44 : vector<16x128xf32>
    %c0_74 = arith.constant 0 : index
    %c0_75 = arith.constant 0 : index
    %c0_76 = arith.constant 0 : index
    %190 = vector.load %arg16[%c0_74, %c0_75, %c0_76] : memref<2x1x128xf32, #tpu.memory_space<vmem>>, vector<1x1x128xf32>
    %191 = vector.shape_cast %190 : vector<1x1x128xf32> to vector<1x128xf32>
    %c0_77 = arith.constant 0 : index
    %c0_78 = arith.constant 0 : index
    %c0_79 = arith.constant 0 : index
    %192 = vector.load %arg17[%c0_77, %c0_78, %c0_79] : memref<2x1x128xf32, #tpu.memory_space<vmem>>, vector<1x1x128xf32>
    %193 = vector.shape_cast %192 : vector<1x1x128xf32> to vector<1x128xf32>
    %cst_80 = arith.constant dense<0.000000e+00> : vector<128xf32>
    %194 = vector.multi_reduction <add>, %189, %cst_80 [0] : vector<16x128xf32> to vector<128xf32>
    %195 = vector.shape_cast %194 : vector<128xf32> to vector<1x128xf32>
    %cst_81 = arith.constant 1.600000e+01 : f32
    %196 = vector.broadcast %cst_81 : f32 to vector<1x128xf32>
    %197 = arith.divf %195, %196 : vector<1x128xf32>
    %198 = arith.mulf %189, %189 : vector<16x128xf32>
    %cst_82 = arith.constant dense<0.000000e+00> : vector<128xf32>
    %199 = vector.multi_reduction <add>, %198, %cst_82 [0] : vector<16x128xf32> to vector<128xf32>
    %200 = vector.shape_cast %199 : vector<128xf32> to vector<1x128xf32>
    %cst_83 = arith.constant 1.600000e+01 : f32
    %201 = vector.broadcast %cst_83 : f32 to vector<1x128xf32>
    %202 = arith.divf %200, %201 : vector<1x128xf32>
    %203 = arith.mulf %197, %197 : vector<1x128xf32>
    %204 = arith.subf %202, %203 : vector<1x128xf32>
    %cst_84 = arith.constant 9.99999974E-6 : f32
    %205 = vector.broadcast %cst_84 : f32 to vector<1x128xf32>
    %206 = arith.addf %204, %205 : vector<1x128xf32>
    %207 = math.rsqrt %206 : vector<1x128xf32>
    %208 = arith.mulf %191, %207 : vector<1x128xf32>
    %209 = arith.mulf %197, %208 : vector<1x128xf32>
    %210 = arith.subf %193, %209 : vector<1x128xf32>
    %211 = vector.broadcast %208 : vector<1x128xf32> to vector<16x128xf32>
    %212 = arith.mulf %189, %211 : vector<16x128xf32>
    %213 = vector.broadcast %210 : vector<1x128xf32> to vector<16x128xf32>
    %214 = arith.addf %212, %213 : vector<16x128xf32>
    %215 = arith.addf %91, %214 : vector<16x128xf32>
    %c0_85 = arith.constant 0 : index
    %c0_86 = arith.constant 0 : index
    %c0_87 = arith.constant 0 : index
    %216 = vector.load %arg18[%c0_85, %c0_86, %c0_87] : memref<2x128x128xbf16, #tpu.memory_space<vmem>>, vector<1x128x128xbf16>
    %217 = vector.shape_cast %216 : vector<1x128x128xbf16> to vector<128x128xbf16>
    %218 = arith.truncf %215 : vector<16x128xf32> to vector<16x128xbf16>
    %cst_88 = arith.constant dense<0.000000e+00> : vector<16x128xf32>
    %219 = tpu.matmul %218, %217, %cst_88 {dimension_numbers = #tpu.dot_dimension_numbers<[1], [0], [0], [1], [0, 0, 1, 1], [], []>} : vector<16x128xbf16>, vector<128x128xbf16>, vector<16x128xf32> -> vector<16x128xf32>
    %c0_89 = arith.constant 0 : index
    %c0_90 = arith.constant 0 : index
    %c0_91 = arith.constant 0 : index
    %220 = vector.load %arg19[%c0_89, %c0_90, %c0_91] : memref<2x1x128xf32, #tpu.memory_space<vmem>>, vector<1x1x128xf32>
    %221 = vector.shape_cast %220 : vector<1x1x128xf32> to vector<1x128xf32>
    %222 = vector.broadcast %221 : vector<1x128xf32> to vector<16x128xf32>
    %223 = arith.addf %219, %222 : vector<16x128xf32>
    %cst_92 = arith.constant 0.000000e+00 : f32
    %224 = vector.broadcast %cst_92 : f32 to vector<16x128xf32>
    %225 = arith.maximumf %223, %224 : vector<16x128xf32>
    %c0_93 = arith.constant 0 : index
    %c0_94 = arith.constant 0 : index
    %c0_95 = arith.constant 0 : index
    %226 = vector.load %arg20[%c0_93, %c0_94, %c0_95] : memref<2x128x128xbf16, #tpu.memory_space<vmem>>, vector<1x128x128xbf16>
    %227 = vector.shape_cast %226 : vector<1x128x128xbf16> to vector<128x128xbf16>
    %228 = arith.truncf %225 : vector<16x128xf32> to vector<16x128xbf16>
    %cst_96 = arith.constant dense<0.000000e+00> : vector<16x128xf32>
    %229 = tpu.matmul %228, %227, %cst_96 {dimension_numbers = #tpu.dot_dimension_numbers<[1], [0], [0], [1], [0, 0, 1, 1], [], []>} : vector<16x128xbf16>, vector<128x128xbf16>, vector<16x128xf32> -> vector<16x128xf32>
    %c0_97 = arith.constant 0 : index
    %c0_98 = arith.constant 0 : index
    %c0_99 = arith.constant 0 : index
    %230 = vector.load %arg21[%c0_97, %c0_98, %c0_99] : memref<2x1x128xf32, #tpu.memory_space<vmem>>, vector<1x1x128xf32>
    %231 = vector.shape_cast %230 : vector<1x1x128xf32> to vector<1x128xf32>
    %232 = vector.broadcast %231 : vector<1x128xf32> to vector<16x128xf32>
    %233 = arith.addf %229, %232 : vector<16x128xf32>
    %234 = arith.addf %215, %233 : vector<16x128xf32>
    %c0_100 = arith.constant 0 : index
    %c0_101 = arith.constant 0 : index
    %c0_102 = arith.constant 0 : index
    %235 = vector.load %arg22[%c0_100, %c0_101, %c0_102] : memref<2x1x128xf32, #tpu.memory_space<vmem>>, vector<1x1x128xf32>
    %236 = vector.shape_cast %235 : vector<1x1x128xf32> to vector<1x128xf32>
    %c0_103 = arith.constant 0 : index
    %c0_104 = arith.constant 0 : index
    %c0_105 = arith.constant 0 : index
    %237 = vector.load %arg23[%c0_103, %c0_104, %c0_105] : memref<2x1x128xf32, #tpu.memory_space<vmem>>, vector<1x1x128xf32>
    %238 = vector.shape_cast %237 : vector<1x1x128xf32> to vector<1x128xf32>
    %cst_106 = arith.constant dense<0.000000e+00> : vector<128xf32>
    %239 = vector.multi_reduction <add>, %234, %cst_106 [0] : vector<16x128xf32> to vector<128xf32>
    %240 = vector.shape_cast %239 : vector<128xf32> to vector<1x128xf32>
    %cst_107 = arith.constant 1.600000e+01 : f32
    %241 = vector.broadcast %cst_107 : f32 to vector<1x128xf32>
    %242 = arith.divf %240, %241 : vector<1x128xf32>
    %243 = arith.mulf %234, %234 : vector<16x128xf32>
    %cst_108 = arith.constant dense<0.000000e+00> : vector<128xf32>
    %244 = vector.multi_reduction <add>, %243, %cst_108 [0] : vector<16x128xf32> to vector<128xf32>
    %245 = vector.shape_cast %244 : vector<128xf32> to vector<1x128xf32>
    %cst_109 = arith.constant 1.600000e+01 : f32
    %246 = vector.broadcast %cst_109 : f32 to vector<1x128xf32>
    %247 = arith.divf %245, %246 : vector<1x128xf32>
    %248 = arith.mulf %242, %242 : vector<1x128xf32>
    %249 = arith.subf %247, %248 : vector<1x128xf32>
    %cst_110 = arith.constant 9.99999974E-6 : f32
    %250 = vector.broadcast %cst_110 : f32 to vector<1x128xf32>
    %251 = arith.addf %249, %250 : vector<1x128xf32>
    %252 = math.rsqrt %251 : vector<1x128xf32>
    %253 = arith.mulf %236, %252 : vector<1x128xf32>
    %254 = arith.mulf %242, %253 : vector<1x128xf32>
    %255 = arith.subf %238, %254 : vector<1x128xf32>
    %256 = vector.broadcast %253 : vector<1x128xf32> to vector<16x128xf32>
    %257 = arith.mulf %234, %256 : vector<16x128xf32>
    %258 = vector.broadcast %255 : vector<1x128xf32> to vector<16x128xf32>
    %259 = arith.addf %257, %258 : vector<16x128xf32>
    %260 = arith.truncf %259 : vector<16x128xf32> to vector<16x128xbf16>
    %cst_111 = arith.constant dense<0.000000e+00> : vector<16x128xf32>
    %261 = tpu.matmul %8, %260, %cst_111 {dimension_numbers = #tpu.dot_dimension_numbers<[1], [0], [0], [1], [0, 0, 1, 1], [], []>} : vector<16x16xbf16>, vector<16x128xbf16>, vector<16x128xf32> -> vector<16x128xf32>
    %262 = arith.addf %259, %261 : vector<16x128xf32>
    %c1 = arith.constant 1 : index
    %c0_112 = arith.constant 0 : index
    %c0_113 = arith.constant 0 : index
    %263 = vector.load %arg6[%c1, %c0_112, %c0_113] : memref<2x128x128xbf16, #tpu.memory_space<vmem>>, vector<1x128x128xbf16>
    %264 = vector.shape_cast %263 : vector<1x128x128xbf16> to vector<128x128xbf16>
    %265 = arith.truncf %262 : vector<16x128xf32> to vector<16x128xbf16>
    %cst_114 = arith.constant dense<0.000000e+00> : vector<16x128xf32>
    %266 = tpu.matmul %265, %264, %cst_114 {dimension_numbers = #tpu.dot_dimension_numbers<[1], [0], [0], [1], [0, 0, 1, 1], [], []>} : vector<16x128xbf16>, vector<128x128xbf16>, vector<16x128xf32> -> vector<16x128xf32>
    %c1_115 = arith.constant 1 : index
    %c0_116 = arith.constant 0 : index
    %c0_117 = arith.constant 0 : index
    %267 = vector.load %arg7[%c1_115, %c0_116, %c0_117] : memref<2x1x128xf32, #tpu.memory_space<vmem>>, vector<1x1x128xf32>
    %268 = vector.shape_cast %267 : vector<1x1x128xf32> to vector<1x128xf32>
    %269 = vector.broadcast %268 : vector<1x128xf32> to vector<16x128xf32>
    %270 = arith.addf %266, %269 : vector<16x128xf32>
    %cst_118 = arith.constant 0.000000e+00 : f32
    %271 = vector.broadcast %cst_118 : f32 to vector<16x128xf32>
    %272 = arith.maximumf %270, %271 : vector<16x128xf32>
    %c1_119 = arith.constant 1 : index
    %c0_120 = arith.constant 0 : index
    %c0_121 = arith.constant 0 : index
    %273 = vector.load %arg8[%c1_119, %c0_120, %c0_121] : memref<2x128x128xbf16, #tpu.memory_space<vmem>>, vector<1x128x128xbf16>
    %274 = vector.shape_cast %273 : vector<1x128x128xbf16> to vector<128x128xbf16>
    %275 = arith.truncf %272 : vector<16x128xf32> to vector<16x128xbf16>
    %cst_122 = arith.constant dense<0.000000e+00> : vector<16x128xf32>
    %276 = tpu.matmul %275, %274, %cst_122 {dimension_numbers = #tpu.dot_dimension_numbers<[1], [0], [0], [1], [0, 0, 1, 1], [], []>} : vector<16x128xbf16>, vector<128x128xbf16>, vector<16x128xf32> -> vector<16x128xf32>
    %c1_123 = arith.constant 1 : index
    %c0_124 = arith.constant 0 : index
    %c0_125 = arith.constant 0 : index
    %277 = vector.load %arg9[%c1_123, %c0_124, %c0_125] : memref<2x1x128xf32, #tpu.memory_space<vmem>>, vector<1x1x128xf32>
    %278 = vector.shape_cast %277 : vector<1x1x128xf32> to vector<1x128xf32>
    %279 = vector.broadcast %278 : vector<1x128xf32> to vector<16x128xf32>
    %280 = arith.addf %276, %279 : vector<16x128xf32>
    %281 = arith.addf %280, %259 : vector<16x128xf32>
    %c1_126 = arith.constant 1 : index
    %c0_127 = arith.constant 0 : index
    %c0_128 = arith.constant 0 : index
    %282 = vector.load %arg10[%c1_126, %c0_127, %c0_128] : memref<2x1x128xf32, #tpu.memory_space<vmem>>, vector<1x1x128xf32>
    %283 = vector.shape_cast %282 : vector<1x1x128xf32> to vector<1x128xf32>
    %c1_129 = arith.constant 1 : index
    %c0_130 = arith.constant 0 : index
    %c0_131 = arith.constant 0 : index
    %284 = vector.load %arg11[%c1_129, %c0_130, %c0_131] : memref<2x1x128xf32, #tpu.memory_space<vmem>>, vector<1x1x128xf32>
    %285 = vector.shape_cast %284 : vector<1x1x128xf32> to vector<1x128xf32>
    %cst_132 = arith.constant dense<0.000000e+00> : vector<128xf32>
    %286 = vector.multi_reduction <add>, %281, %cst_132 [0] : vector<16x128xf32> to vector<128xf32>
    %287 = vector.shape_cast %286 : vector<128xf32> to vector<1x128xf32>
    %cst_133 = arith.constant 1.600000e+01 : f32
    %288 = vector.broadcast %cst_133 : f32 to vector<1x128xf32>
    %289 = arith.divf %287, %288 : vector<1x128xf32>
    %290 = arith.mulf %281, %281 : vector<16x128xf32>
    %cst_134 = arith.constant dense<0.000000e+00> : vector<128xf32>
    %291 = vector.multi_reduction <add>, %290, %cst_134 [0] : vector<16x128xf32> to vector<128xf32>
    %292 = vector.shape_cast %291 : vector<128xf32> to vector<1x128xf32>
    %cst_135 = arith.constant 1.600000e+01 : f32
    %293 = vector.broadcast %cst_135 : f32 to vector<1x128xf32>
    %294 = arith.divf %292, %293 : vector<1x128xf32>
    %295 = arith.mulf %289, %289 : vector<1x128xf32>
    %296 = arith.subf %294, %295 : vector<1x128xf32>
    %cst_136 = arith.constant 9.99999974E-6 : f32
    %297 = vector.broadcast %cst_136 : f32 to vector<1x128xf32>
    %298 = arith.addf %296, %297 : vector<1x128xf32>
    %299 = math.rsqrt %298 : vector<1x128xf32>
    %300 = arith.mulf %283, %299 : vector<1x128xf32>
    %301 = arith.mulf %289, %300 : vector<1x128xf32>
    %302 = arith.subf %285, %301 : vector<1x128xf32>
    %303 = vector.broadcast %300 : vector<1x128xf32> to vector<16x128xf32>
    %304 = arith.mulf %281, %303 : vector<16x128xf32>
    %305 = vector.broadcast %302 : vector<1x128xf32> to vector<16x128xf32>
    %306 = arith.addf %304, %305 : vector<16x128xf32>
    %c1_137 = arith.constant 1 : index
    %c0_138 = arith.constant 0 : index
    %c0_139 = arith.constant 0 : index
    %307 = vector.load %arg12[%c1_137, %c0_138, %c0_139] : memref<2x128x128xbf16, #tpu.memory_space<vmem>>, vector<1x128x128xbf16>
    %308 = vector.shape_cast %307 : vector<1x128x128xbf16> to vector<128x128xbf16>
    %309 = arith.truncf %259 : vector<16x128xf32> to vector<16x128xbf16>
    %cst_140 = arith.constant dense<0.000000e+00> : vector<16x128xf32>
    %310 = tpu.matmul %309, %308, %cst_140 {dimension_numbers = #tpu.dot_dimension_numbers<[1], [0], [0], [1], [0, 0, 1, 1], [], []>} : vector<16x128xbf16>, vector<128x128xbf16>, vector<16x128xf32> -> vector<16x128xf32>
    %c1_141 = arith.constant 1 : index
    %c0_142 = arith.constant 0 : index
    %c0_143 = arith.constant 0 : index
    %311 = vector.load %arg13[%c1_141, %c0_142, %c0_143] : memref<2x1x128xf32, #tpu.memory_space<vmem>>, vector<1x1x128xf32>
    %312 = vector.shape_cast %311 : vector<1x1x128xf32> to vector<1x128xf32>
    %313 = vector.broadcast %312 : vector<1x128xf32> to vector<16x128xf32>
    %314 = arith.addf %310, %313 : vector<16x128xf32>
    %315 = vector.extract_strided_slice %314 {offsets = [0, 0], sizes = [16, 8], strides = [1, 1]} : vector<16x128xf32> to vector<16x8xf32>
    %316 = vector.extract_strided_slice %314 {offsets = [0, 32], sizes = [16, 8], strides = [1, 1]} : vector<16x128xf32> to vector<16x8xf32>
    %317 = arith.truncf %315 : vector<16x8xf32> to vector<16x8xbf16>
    %318 = arith.truncf %316 : vector<16x8xf32> to vector<16x8xbf16>
    %cst_144 = arith.constant dense<0.000000e+00> : vector<16x16xf32>
    %319 = tpu.matmul %317, %318, %cst_144 {dimension_numbers = #tpu.dot_dimension_numbers<[1], [1], [0], [0], [0, 0, 1, 0], [], []>} : vector<16x8xbf16>, vector<16x8xbf16>, vector<16x16xf32> -> vector<16x16xf32>
    %cst_145 = arith.constant 0.353553385 : f32
    %320 = vector.broadcast %cst_145 : f32 to vector<16x16xf32>
    %321 = arith.mulf %319, %320 : vector<16x16xf32>
    %322 = arith.addf %321, %7 : vector<16x16xf32>
    %cst_146 = arith.constant dense<0xFF800000> : vector<16xf32>
    %323 = vector.multi_reduction <maximumf>, %322, %cst_146 [1] : vector<16x16xf32> to vector<16xf32>
    %324 = vector.shape_cast %323 : vector<16xf32> to vector<16x1xf32>
    %325 = vector.broadcast %324 : vector<16x1xf32> to vector<16x16xf32>
    %326 = arith.subf %322, %325 : vector<16x16xf32>
    %327 = math.exp %326 : vector<16x16xf32>
    %cst_147 = arith.constant dense<0.000000e+00> : vector<16xf32>
    %328 = vector.multi_reduction <add>, %327, %cst_147 [1] : vector<16x16xf32> to vector<16xf32>
    %329 = vector.shape_cast %328 : vector<16xf32> to vector<16x1xf32>
    %330 = vector.broadcast %329 : vector<16x1xf32> to vector<16x16xf32>
    %331 = arith.divf %327, %330 : vector<16x16xf32>
    %332 = vector.extract_strided_slice %314 {offsets = [0, 8], sizes = [16, 8], strides = [1, 1]} : vector<16x128xf32> to vector<16x8xf32>
    %333 = vector.extract_strided_slice %314 {offsets = [0, 40], sizes = [16, 8], strides = [1, 1]} : vector<16x128xf32> to vector<16x8xf32>
    %334 = arith.truncf %332 : vector<16x8xf32> to vector<16x8xbf16>
    %335 = arith.truncf %333 : vector<16x8xf32> to vector<16x8xbf16>
    %cst_148 = arith.constant dense<0.000000e+00> : vector<16x16xf32>
    %336 = tpu.matmul %334, %335, %cst_148 {dimension_numbers = #tpu.dot_dimension_numbers<[1], [1], [0], [0], [0, 0, 1, 0], [], []>} : vector<16x8xbf16>, vector<16x8xbf16>, vector<16x16xf32> -> vector<16x16xf32>
    %cst_149 = arith.constant 0.353553385 : f32
    %337 = vector.broadcast %cst_149 : f32 to vector<16x16xf32>
    %338 = arith.mulf %336, %337 : vector<16x16xf32>
    %339 = arith.addf %338, %7 : vector<16x16xf32>
    %cst_150 = arith.constant dense<0xFF800000> : vector<16xf32>
    %340 = vector.multi_reduction <maximumf>, %339, %cst_150 [1] : vector<16x16xf32> to vector<16xf32>
    %341 = vector.shape_cast %340 : vector<16xf32> to vector<16x1xf32>
    %342 = vector.broadcast %341 : vector<16x1xf32> to vector<16x16xf32>
    %343 = arith.subf %339, %342 : vector<16x16xf32>
    %344 = math.exp %343 : vector<16x16xf32>
    %cst_151 = arith.constant dense<0.000000e+00> : vector<16xf32>
    %345 = vector.multi_reduction <add>, %344, %cst_151 [1] : vector<16x16xf32> to vector<16xf32>
    %346 = vector.shape_cast %345 : vector<16xf32> to vector<16x1xf32>
    %347 = vector.broadcast %346 : vector<16x1xf32> to vector<16x16xf32>
    %348 = arith.divf %344, %347 : vector<16x16xf32>
    %349 = vector.extract_strided_slice %314 {offsets = [0, 16], sizes = [16, 8], strides = [1, 1]} : vector<16x128xf32> to vector<16x8xf32>
    %350 = vector.extract_strided_slice %314 {offsets = [0, 48], sizes = [16, 8], strides = [1, 1]} : vector<16x128xf32> to vector<16x8xf32>
    %351 = arith.truncf %349 : vector<16x8xf32> to vector<16x8xbf16>
    %352 = arith.truncf %350 : vector<16x8xf32> to vector<16x8xbf16>
    %cst_152 = arith.constant dense<0.000000e+00> : vector<16x16xf32>
    %353 = tpu.matmul %351, %352, %cst_152 {dimension_numbers = #tpu.dot_dimension_numbers<[1], [1], [0], [0], [0, 0, 1, 0], [], []>} : vector<16x8xbf16>, vector<16x8xbf16>, vector<16x16xf32> -> vector<16x16xf32>
    %cst_153 = arith.constant 0.353553385 : f32
    %354 = vector.broadcast %cst_153 : f32 to vector<16x16xf32>
    %355 = arith.mulf %353, %354 : vector<16x16xf32>
    %356 = arith.addf %355, %7 : vector<16x16xf32>
    %cst_154 = arith.constant dense<0xFF800000> : vector<16xf32>
    %357 = vector.multi_reduction <maximumf>, %356, %cst_154 [1] : vector<16x16xf32> to vector<16xf32>
    %358 = vector.shape_cast %357 : vector<16xf32> to vector<16x1xf32>
    %359 = vector.broadcast %358 : vector<16x1xf32> to vector<16x16xf32>
    %360 = arith.subf %356, %359 : vector<16x16xf32>
    %361 = math.exp %360 : vector<16x16xf32>
    %cst_155 = arith.constant dense<0.000000e+00> : vector<16xf32>
    %362 = vector.multi_reduction <add>, %361, %cst_155 [1] : vector<16x16xf32> to vector<16xf32>
    %363 = vector.shape_cast %362 : vector<16xf32> to vector<16x1xf32>
    %364 = vector.broadcast %363 : vector<16x1xf32> to vector<16x16xf32>
    %365 = arith.divf %361, %364 : vector<16x16xf32>
    %366 = vector.extract_strided_slice %314 {offsets = [0, 24], sizes = [16, 8], strides = [1, 1]} : vector<16x128xf32> to vector<16x8xf32>
    %367 = vector.extract_strided_slice %314 {offsets = [0, 56], sizes = [16, 8], strides = [1, 1]} : vector<16x128xf32> to vector<16x8xf32>
    %368 = arith.truncf %366 : vector<16x8xf32> to vector<16x8xbf16>
    %369 = arith.truncf %367 : vector<16x8xf32> to vector<16x8xbf16>
    %cst_156 = arith.constant dense<0.000000e+00> : vector<16x16xf32>
    %370 = tpu.matmul %368, %369, %cst_156 {dimension_numbers = #tpu.dot_dimension_numbers<[1], [1], [0], [0], [0, 0, 1, 0], [], []>} : vector<16x8xbf16>, vector<16x8xbf16>, vector<16x16xf32> -> vector<16x16xf32>
    %cst_157 = arith.constant 0.353553385 : f32
    %371 = vector.broadcast %cst_157 : f32 to vector<16x16xf32>
    %372 = arith.mulf %370, %371 : vector<16x16xf32>
    %373 = arith.addf %372, %7 : vector<16x16xf32>
    %cst_158 = arith.constant dense<0xFF800000> : vector<16xf32>
    %374 = vector.multi_reduction <maximumf>, %373, %cst_158 [1] : vector<16x16xf32> to vector<16xf32>
    %375 = vector.shape_cast %374 : vector<16xf32> to vector<16x1xf32>
    %376 = vector.broadcast %375 : vector<16x1xf32> to vector<16x16xf32>
    %377 = arith.subf %373, %376 : vector<16x16xf32>
    %378 = math.exp %377 : vector<16x16xf32>
    %cst_159 = arith.constant dense<0.000000e+00> : vector<16xf32>
    %379 = vector.multi_reduction <add>, %378, %cst_159 [1] : vector<16x16xf32> to vector<16xf32>
    %380 = vector.shape_cast %379 : vector<16xf32> to vector<16x1xf32>
    %381 = vector.broadcast %380 : vector<16x1xf32> to vector<16x16xf32>
    %382 = arith.divf %378, %381 : vector<16x16xf32>
    %383 = tpu.concatenate %331, %348, %365, %382 in 1 : vector<16x16xf32>, vector<16x16xf32>, vector<16x16xf32>, vector<16x16xf32> -> vector<16x64xf32>
    %384 = vector.broadcast %16 : vector<1x128xf32> to vector<16x128xf32>
    %385 = arith.mulf %314, %384 : vector<16x128xf32>
    %386 = vector.broadcast %23 : vector<1x128xf32> to vector<16x128xf32>
    %387 = arith.mulf %314, %386 : vector<16x128xf32>
    %388 = vector.broadcast %30 : vector<1x128xf32> to vector<16x128xf32>
    %389 = arith.mulf %314, %388 : vector<16x128xf32>
    %390 = vector.broadcast %37 : vector<1x128xf32> to vector<16x128xf32>
    %391 = arith.mulf %314, %390 : vector<16x128xf32>
    %392 = tpu.concatenate %385, %387, %389, %391 in 0 : vector<16x128xf32>, vector<16x128xf32>, vector<16x128xf32>, vector<16x128xf32> -> vector<64x128xf32>
    %393 = arith.truncf %383 : vector<16x64xf32> to vector<16x64xbf16>
    %394 = arith.truncf %392 : vector<64x128xf32> to vector<64x128xbf16>
    %cst_160 = arith.constant dense<0.000000e+00> : vector<16x128xf32>
    %395 = tpu.matmul %393, %394, %cst_160 {dimension_numbers = #tpu.dot_dimension_numbers<[1], [0], [0], [1], [0, 0, 1, 1], [], []>} : vector<16x64xbf16>, vector<64x128xbf16>, vector<16x128xf32> -> vector<16x128xf32>
    %c1_161 = arith.constant 1 : index
    %c0_162 = arith.constant 0 : index
    %c0_163 = arith.constant 0 : index
    %396 = vector.load %arg14[%c1_161, %c0_162, %c0_163] : memref<2x128x128xbf16, #tpu.memory_space<vmem>>, vector<1x128x128xbf16>
    %397 = vector.shape_cast %396 : vector<1x128x128xbf16> to vector<128x128xbf16>
    %398 = arith.truncf %395 : vector<16x128xf32> to vector<16x128xbf16>
    %cst_164 = arith.constant dense<0.000000e+00> : vector<16x128xf32>
    %399 = tpu.matmul %398, %397, %cst_164 {dimension_numbers = #tpu.dot_dimension_numbers<[1], [0], [0], [1], [0, 0, 1, 1], [], []>} : vector<16x128xbf16>, vector<128x128xbf16>, vector<16x128xf32> -> vector<16x128xf32>
    %c1_165 = arith.constant 1 : index
    %c0_166 = arith.constant 0 : index
    %c0_167 = arith.constant 0 : index
    %400 = vector.load %arg15[%c1_165, %c0_166, %c0_167] : memref<2x1x128xf32, #tpu.memory_space<vmem>>, vector<1x1x128xf32>
    %401 = vector.shape_cast %400 : vector<1x1x128xf32> to vector<1x128xf32>
    %402 = vector.broadcast %401 : vector<1x128xf32> to vector<16x128xf32>
    %403 = arith.addf %399, %402 : vector<16x128xf32>
    %404 = arith.addf %403, %259 : vector<16x128xf32>
    %c1_168 = arith.constant 1 : index
    %c0_169 = arith.constant 0 : index
    %c0_170 = arith.constant 0 : index
    %405 = vector.load %arg16[%c1_168, %c0_169, %c0_170] : memref<2x1x128xf32, #tpu.memory_space<vmem>>, vector<1x1x128xf32>
    %406 = vector.shape_cast %405 : vector<1x1x128xf32> to vector<1x128xf32>
    %c1_171 = arith.constant 1 : index
    %c0_172 = arith.constant 0 : index
    %c0_173 = arith.constant 0 : index
    %407 = vector.load %arg17[%c1_171, %c0_172, %c0_173] : memref<2x1x128xf32, #tpu.memory_space<vmem>>, vector<1x1x128xf32>
    %408 = vector.shape_cast %407 : vector<1x1x128xf32> to vector<1x128xf32>
    %cst_174 = arith.constant dense<0.000000e+00> : vector<128xf32>
    %409 = vector.multi_reduction <add>, %404, %cst_174 [0] : vector<16x128xf32> to vector<128xf32>
    %410 = vector.shape_cast %409 : vector<128xf32> to vector<1x128xf32>
    %cst_175 = arith.constant 1.600000e+01 : f32
    %411 = vector.broadcast %cst_175 : f32 to vector<1x128xf32>
    %412 = arith.divf %410, %411 : vector<1x128xf32>
    %413 = arith.mulf %404, %404 : vector<16x128xf32>
    %cst_176 = arith.constant dense<0.000000e+00> : vector<128xf32>
    %414 = vector.multi_reduction <add>, %413, %cst_176 [0] : vector<16x128xf32> to vector<128xf32>
    %415 = vector.shape_cast %414 : vector<128xf32> to vector<1x128xf32>
    %cst_177 = arith.constant 1.600000e+01 : f32
    %416 = vector.broadcast %cst_177 : f32 to vector<1x128xf32>
    %417 = arith.divf %415, %416 : vector<1x128xf32>
    %418 = arith.mulf %412, %412 : vector<1x128xf32>
    %419 = arith.subf %417, %418 : vector<1x128xf32>
    %cst_178 = arith.constant 9.99999974E-6 : f32
    %420 = vector.broadcast %cst_178 : f32 to vector<1x128xf32>
    %421 = arith.addf %419, %420 : vector<1x128xf32>
    %422 = math.rsqrt %421 : vector<1x128xf32>
    %423 = arith.mulf %406, %422 : vector<1x128xf32>
    %424 = arith.mulf %412, %423 : vector<1x128xf32>
    %425 = arith.subf %408, %424 : vector<1x128xf32>
    %426 = vector.broadcast %423 : vector<1x128xf32> to vector<16x128xf32>
    %427 = arith.mulf %404, %426 : vector<16x128xf32>
    %428 = vector.broadcast %425 : vector<1x128xf32> to vector<16x128xf32>
    %429 = arith.addf %427, %428 : vector<16x128xf32>
    %430 = arith.addf %306, %429 : vector<16x128xf32>
    %c1_179 = arith.constant 1 : index
    %c0_180 = arith.constant 0 : index
    %c0_181 = arith.constant 0 : index
    %431 = vector.load %arg18[%c1_179, %c0_180, %c0_181] : memref<2x128x128xbf16, #tpu.memory_space<vmem>>, vector<1x128x128xbf16>
    %432 = vector.shape_cast %431 : vector<1x128x128xbf16> to vector<128x128xbf16>
    %433 = arith.truncf %430 : vector<16x128xf32> to vector<16x128xbf16>
    %cst_182 = arith.constant dense<0.000000e+00> : vector<16x128xf32>
    %434 = tpu.matmul %433, %432, %cst_182 {dimension_numbers = #tpu.dot_dimension_numbers<[1], [0], [0], [1], [0, 0, 1, 1], [], []>} : vector<16x128xbf16>, vector<128x128xbf16>, vector<16x128xf32> -> vector<16x128xf32>
    %c1_183 = arith.constant 1 : index
    %c0_184 = arith.constant 0 : index
    %c0_185 = arith.constant 0 : index
    %435 = vector.load %arg19[%c1_183, %c0_184, %c0_185] : memref<2x1x128xf32, #tpu.memory_space<vmem>>, vector<1x1x128xf32>
    %436 = vector.shape_cast %435 : vector<1x1x128xf32> to vector<1x128xf32>
    %437 = vector.broadcast %436 : vector<1x128xf32> to vector<16x128xf32>
    %438 = arith.addf %434, %437 : vector<16x128xf32>
    %cst_186 = arith.constant 0.000000e+00 : f32
    %439 = vector.broadcast %cst_186 : f32 to vector<16x128xf32>
    %440 = arith.maximumf %438, %439 : vector<16x128xf32>
    %c1_187 = arith.constant 1 : index
    %c0_188 = arith.constant 0 : index
    %c0_189 = arith.constant 0 : index
    %441 = vector.load %arg20[%c1_187, %c0_188, %c0_189] : memref<2x128x128xbf16, #tpu.memory_space<vmem>>, vector<1x128x128xbf16>
    %442 = vector.shape_cast %441 : vector<1x128x128xbf16> to vector<128x128xbf16>
    %443 = arith.truncf %440 : vector<16x128xf32> to vector<16x128xbf16>
    %cst_190 = arith.constant dense<0.000000e+00> : vector<16x128xf32>
    %444 = tpu.matmul %443, %442, %cst_190 {dimension_numbers = #tpu.dot_dimension_numbers<[1], [0], [0], [1], [0, 0, 1, 1], [], []>} : vector<16x128xbf16>, vector<128x128xbf16>, vector<16x128xf32> -> vector<16x128xf32>
    %c1_191 = arith.constant 1 : index
    %c0_192 = arith.constant 0 : index
    %c0_193 = arith.constant 0 : index
    %445 = vector.load %arg21[%c1_191, %c0_192, %c0_193] : memref<2x1x128xf32, #tpu.memory_space<vmem>>, vector<1x1x128xf32>
    %446 = vector.shape_cast %445 : vector<1x1x128xf32> to vector<1x128xf32>
    %447 = vector.broadcast %446 : vector<1x128xf32> to vector<16x128xf32>
    %448 = arith.addf %444, %447 : vector<16x128xf32>
    %449 = arith.addf %430, %448 : vector<16x128xf32>
    %c1_194 = arith.constant 1 : index
    %c0_195 = arith.constant 0 : index
    %c0_196 = arith.constant 0 : index
    %450 = vector.load %arg22[%c1_194, %c0_195, %c0_196] : memref<2x1x128xf32, #tpu.memory_space<vmem>>, vector<1x1x128xf32>
    %451 = vector.shape_cast %450 : vector<1x1x128xf32> to vector<1x128xf32>
    %c1_197 = arith.constant 1 : index
    %c0_198 = arith.constant 0 : index
    %c0_199 = arith.constant 0 : index
    %452 = vector.load %arg23[%c1_197, %c0_198, %c0_199] : memref<2x1x128xf32, #tpu.memory_space<vmem>>, vector<1x1x128xf32>
    %453 = vector.shape_cast %452 : vector<1x1x128xf32> to vector<1x128xf32>
    %cst_200 = arith.constant dense<0.000000e+00> : vector<128xf32>
    %454 = vector.multi_reduction <add>, %449, %cst_200 [0] : vector<16x128xf32> to vector<128xf32>
    %455 = vector.shape_cast %454 : vector<128xf32> to vector<1x128xf32>
    %cst_201 = arith.constant 1.600000e+01 : f32
    %456 = vector.broadcast %cst_201 : f32 to vector<1x128xf32>
    %457 = arith.divf %455, %456 : vector<1x128xf32>
    %458 = arith.mulf %449, %449 : vector<16x128xf32>
    %cst_202 = arith.constant dense<0.000000e+00> : vector<128xf32>
    %459 = vector.multi_reduction <add>, %458, %cst_202 [0] : vector<16x128xf32> to vector<128xf32>
    %460 = vector.shape_cast %459 : vector<128xf32> to vector<1x128xf32>
    %cst_203 = arith.constant 1.600000e+01 : f32
    %461 = vector.broadcast %cst_203 : f32 to vector<1x128xf32>
    %462 = arith.divf %460, %461 : vector<1x128xf32>
    %463 = arith.mulf %457, %457 : vector<1x128xf32>
    %464 = arith.subf %462, %463 : vector<1x128xf32>
    %cst_204 = arith.constant 9.99999974E-6 : f32
    %465 = vector.broadcast %cst_204 : f32 to vector<1x128xf32>
    %466 = arith.addf %464, %465 : vector<1x128xf32>
    %467 = math.rsqrt %466 : vector<1x128xf32>
    %468 = arith.mulf %451, %467 : vector<1x128xf32>
    %469 = arith.mulf %457, %468 : vector<1x128xf32>
    %470 = arith.subf %453, %469 : vector<1x128xf32>
    %471 = vector.broadcast %468 : vector<1x128xf32> to vector<16x128xf32>
    %472 = arith.mulf %449, %471 : vector<16x128xf32>
    %473 = vector.broadcast %470 : vector<1x128xf32> to vector<16x128xf32>
    %474 = arith.addf %472, %473 : vector<16x128xf32>
    %c0_205 = arith.constant 0 : index
    %c0_206 = arith.constant 0 : index
    %475 = vector.load %arg24[%c0_205, %c0_206] : memref<128x128xbf16, #tpu.memory_space<vmem>>, vector<128x128xbf16>
    %476 = arith.truncf %474 : vector<16x128xf32> to vector<16x128xbf16>
    %cst_207 = arith.constant dense<0.000000e+00> : vector<16x128xf32>
    %477 = tpu.matmul %476, %475, %cst_207 {dimension_numbers = #tpu.dot_dimension_numbers<[1], [0], [0], [1], [0, 0, 1, 1], [], []>} : vector<16x128xbf16>, vector<128x128xbf16>, vector<16x128xf32> -> vector<16x128xf32>
    %c0_208 = arith.constant 0 : index
    %c0_209 = arith.constant 0 : index
    %478 = vector.load %arg25[%c0_208, %c0_209] : memref<1x128xf32, #tpu.memory_space<vmem>>, vector<1x128xf32>
    %479 = vector.broadcast %478 : vector<1x128xf32> to vector<16x128xf32>
    %480 = arith.addf %477, %479 : vector<16x128xf32>
    %cst_210 = arith.constant 0.000000e+00 : f32
    %481 = vector.broadcast %cst_210 : f32 to vector<16x128xf32>
    %482 = arith.maximumf %480, %481 : vector<16x128xf32>
    %c0_211 = arith.constant 0 : index
    %c0_212 = arith.constant 0 : index
    %483 = vector.load %arg26[%c0_211, %c0_212] : memref<128x128xbf16, #tpu.memory_space<vmem>>, vector<128x128xbf16>
    %484 = arith.truncf %482 : vector<16x128xf32> to vector<16x128xbf16>
    %cst_213 = arith.constant dense<0.000000e+00> : vector<16x128xf32>
    %485 = tpu.matmul %484, %483, %cst_213 {dimension_numbers = #tpu.dot_dimension_numbers<[1], [0], [0], [1], [0, 0, 1, 1], [], []>} : vector<16x128xbf16>, vector<128x128xbf16>, vector<16x128xf32> -> vector<16x128xf32>
    %c0_214 = arith.constant 0 : index
    %c0_215 = arith.constant 0 : index
    %486 = vector.load %arg27[%c0_214, %c0_215] : memref<1x128xf32, #tpu.memory_space<vmem>>, vector<1x128xf32>
    %487 = vector.broadcast %486 : vector<1x128xf32> to vector<16x128xf32>
    %488 = arith.addf %485, %487 : vector<16x128xf32>
    %cst_216 = arith.constant 0.000000e+00 : f32
    %489 = vector.broadcast %cst_216 : f32 to vector<16x128xf32>
    %490 = arith.maximumf %488, %489 : vector<16x128xf32>
    %c0_217 = arith.constant 0 : index
    %c0_218 = arith.constant 0 : index
    %491 = vector.load %arg28[%c0_217, %c0_218] : memref<128x128xbf16, #tpu.memory_space<vmem>>, vector<128x128xbf16>
    %492 = arith.truncf %490 : vector<16x128xf32> to vector<16x128xbf16>
    %cst_219 = arith.constant dense<0.000000e+00> : vector<16x128xf32>
    %493 = tpu.matmul %492, %491, %cst_219 {dimension_numbers = #tpu.dot_dimension_numbers<[1], [0], [0], [1], [0, 0, 1, 1], [], []>} : vector<16x128xbf16>, vector<128x128xbf16>, vector<16x128xf32> -> vector<16x128xf32>
    %c0_220 = arith.constant 0 : index
    %c0_221 = arith.constant 0 : index
    %494 = vector.load %arg29[%c0_220, %c0_221] : memref<1x128xf32, #tpu.memory_space<vmem>>, vector<1x128xf32>
    %495 = vector.broadcast %494 : vector<1x128xf32> to vector<16x128xf32>
    %496 = arith.addf %493, %495 : vector<16x128xf32>
    %c0_222 = arith.constant 0 : index
    %c0_223 = arith.constant 0 : index
    %497 = vector.load %arg30[%c0_222, %c0_223] : memref<16x128xf32, #tpu.memory_space<vmem>>, vector<16x128xf32>
    tpu.vector_store %arg30[%c0_222, %c0_223], %496 {strides = array<i32>} : memref<16x128xf32, #tpu.memory_space<vmem>>, vector<16x128xf32>,
    return
  }
}

</mosaic_0001>

<bundles_post_ra>
// kernel: tpu_custom_call.1
= control target key start
LH: loop header
LB: loop body
LE: loop exit
PB: predicated region body
PF: predicated region fallthrough
CT: control target
= control target key end

     0   :  { %s4113_s6 = smov 1   ;;  %s4114_s10 = smov 2   ;;  %s4868_s0 = inlined_call_operand.smem [shape: u32[31], index: -1, kind: input, shape index: {}] }
   0x1   :  { %s4185_s5 = sld [smem:[%s4868_s0]]   ;;  %s4115_s14 = smov 3  }
   0x2   :  { %s4190_s9 = sld [smem:[%s4868_s0 + %s4113_s6]]   ;;  %s4116_s18 = smov 4  }
   0x3   :  { %s4195_s13 = sld [smem:[%s4868_s0 + %s4114_s10]]   ;;  %s4117_s22 = smov 5  }
   0x4   :  { %s4200_s17 = sld [smem:[%s4868_s0 + %s4115_s14]]   ;;  %s4118_s26 = smov 6  }
   0x5   :  { %s4205_s21 = sld [smem:[%s4868_s0 + %s4116_s18]]   ;;  %s4119_s30 = smov 7  }
   0x6   :  { %s4210_s25 = sld [smem:[%s4868_s0 + %s4117_s22]]   ;;  %s4120_s4 = smov 8  }
   0x7   :  { %s4215_s29 = sld [smem:[%s4868_s0 + %s4118_s26]]   ;;  %s4121_s10 = smov 9  }
   0x8   :  { %4881 = sst [smem:[#allocation35_spill]] %s4190_s9  ;;  %s4122_s15 = smov 10  }
   0x9   :  { %s4220_s3 = sld [smem:[%s4868_s0 + %s4119_s30]]   ;;  %s4123_s20 = smov 11  }
   0xa   :  { %s4225_s8 = sld [smem:[%s4868_s0 + %s4120_s4]]   ;;  %s4124_s26 = smov 12  }
   0xb   :  { %s4230_s14 = sld [smem:[%s4868_s0 + %s4121_s10]]   ;;  %s4125_s1 = smov 13  }
   0xc   :  { %s4235_s19 = sld [smem:[%s4868_s0 + %s4122_s15]]   ;;  %s4126_s7 = smov 14  }
   0xd   :  { %s4240_s24 = sld [smem:[%s4868_s0 + %s4123_s20]]   ;;  %s4127_s15 = smov 15  }
   0xe   :  { %s4245_s30 = sld [smem:[%s4868_s0 + %s4124_s26]]   ;;  %s4128_s22 = smov 16  }
   0xf   :  { %4882 = sst [smem:[#allocation36_spill]] %s4220_s3  ;;  %s4129_s28 = smov 17  }
  0x10   :  { %s4250_s6 = sld [smem:[%s4868_s0 + %s4125_s1]]  }
  0x11   :  { %4883 = sst [smem:[#allocation37_spill]] %s4230_s14 }
  0x12   :  { %4884 = sst [smem:[#allocation38_spill]] %s4235_s19 }
  0x13   :  { %4885 = sst [smem:[#allocation39_spill]] %s4240_s24 }
  0x14   :  { %s4255_s12 = sld [smem:[%s4868_s0 + %s4126_s7]]   ;;  %s4130_s7 = smov 18  }
  0x15   :  { %s4260_s20 = sld [smem:[%s4868_s0 + %s4127_s15]]   ;;  %s4131_s15 = smov 19  }
  0x16   :  { %4886 = sst [smem:[#allocation40_spill]] %s4250_s6 }
  0x17   :  { %s4265_s27 = sld [smem:[%s4868_s0 + %s4128_s22]]   ;;  %s4132_s22 = smov 20  }
  0x18   :  { %s4270_s4 = sld [smem:[%s4868_s0 + %s4129_s28]]   ;;  %s4133_s28 = smov 21  }
  0x19   :  { %s4275_s24 = sld [smem:[%s4868_s0 + %s4130_s7]]   ;;  %s4134_s7 = smov 22  }
  0x1a   :  { %s4295_s19 = sld [smem:[%s4868_s0 + %s4134_s7]]   ;;  %s4138_s7 = smov 26  }
  0x1b   :  { %4887 = sst [smem:[#allocation41_spill]] %s4260_s20 }
  0x1c   :  { %s4280_s20 = sld [smem:[%s4868_s0 + %s4131_s15]]   ;;  %s4135_s15 = smov 23  }
  0x1d   :  { %4888 = sst [smem:[#allocation42_spill]] %s4265_s27 }
  0x1e   :  { %4889 = sst [smem:[#allocation43_spill]] %s4270_s4 }
  0x1f   :  { %s4285_s27 = sld [smem:[%s4868_s0 + %s4132_s22]]   ;;  %s4136_s22 = smov 24  }
  0x20   :  { %s4290_s4 = sld [smem:[%s4868_s0 + %s4133_s28]]   ;;  %s4137_s28 = smov 25  }
  0x21   :  { %4892 = sst [smem:[#allocation46_spill]] %s4295_s19 }
  0x22   :  { %4890 = sst [smem:[#allocation44_spill]] %s4280_s20 }
  0x23   :  { %s4300_s20 = sld [smem:[%s4868_s0 + %s4135_s15]]   ;;  %s4139_s15 = smov 27  }
  0x24   :  { %s4305_s14 = sld [smem:[%s4868_s0 + %s4136_s22]]   ;;  %s4140_s22 = smov 28  }
  0x25   :  { %s4315_s19 = sld [smem:[%s4868_s0 + %s4138_s7]]   ;;  %s4142_s7 = smov 30  }
  0x26   :  { %4891 = sst [smem:[#allocation45_spill]] %s4290_s4 }
  0x27   :  { %s4310_s4 = sld [smem:[%s4868_s0 + %s4137_s28]]   ;;  %s4141_s28 = smov 29  }
  0x28   :  { %s4320_s3 = sld [smem:[%s4868_s0 + %s4139_s15]]  }
  0x29   :  { %s4325_s9 = sld [smem:[%s4868_s0 + %s4140_s22]]  }
  0x2a   :  { %s4335_s6 = sld [smem:[%s4868_s0 + %s4142_s7]]  }
  0x2d   :  { %4893 = sst [smem:[#allocation47_spill]] %s4310_s4 }
  0x2e   :  { %s4330_s4 = sld [smem:[%s4868_s0 + %s4141_s28]]  }
  0x2f   :  { %66 = vsyncpa [#allocation3], 0 }
  0x30   :  { %67 = vsyncpa [#allocation6], 0 }
  0x31   :  { %68 = vsyncpa [#allocation9], 0 }
  0x32   :  { %69 = vsyncpa [#allocation12], 0 }
  0x33   :  { %70 = vsyncpa [#allocation15], 0 }
  0x34   :  { %71 = vsyncpa [#allocation18], 0 }
  0x35   :  { %72 = vsyncpa [#allocation21], 0 }
  0x36   :  { %73 = vsyncpa [#allocation24], 0  ;;  %s94_s15 = sshll.u32 %s4200_s17, 4  ;;  %s95_s15 = int_to_ptr.hbm [resolvable:$true] %s94_s15 }
  0x37   :  { %74 = vsyncpa [#allocation4], 0  ;;  %s4143_s16 = smov [#allocation5]   ;;  %s121_s0 = sshll.u32 %s4210_s25, 4  ;;  %s122_s0 = int_to_ptr.hbm [resolvable:$true] %s121_s0 }
  0x38   :  { %s96_s18 = sshll.u32 %s4143_s16, 4  ;;  %s3735_s22 = sshra.s32 %s95_s15, 4  ;;  %s97_s18 = int_to_ptr.vmem [resolvable:$true] %s96_s18  ;;  %s3736_s22 = int_to_ptr.hbm [resolvable:$true] %s3735_s22 }
  0x39   :  { %s3737_s23 = scalar_lea.hbm %s3736_s22, 8  ;;  %s3739_s26 = scalar_lea.hbm %s4200_s17, 8 }
  0x3a   :  { %p3738_p0 = scmp.ne.s32.totalorder %s3736_s22, %s3737_s23  ;;  %p3740_p1 = scmp.lt.s32.totalorder %s3736_s22, %s4200_s17 }
  0x3b   :  { %p3741_p2 = scmp.lt.s32.totalorder %s3739_s26, %s3737_s23 }
  0x3d   :  { %p3742_p3 = por %p3741_p2, %p3740_p1 }
  0x3f   :  { %p3743_p4 = pnand %p3742_p3, %p3738_p0 }
  0x41   :  { %3746 = shalt.err (!%p3743_p4)
}
  0x42   :  { %s4144_s28 = smov 64   ;;  %s4145_s1 = smov 4  }
  0x43   :  { %102 = dma.hbm_to_vmem [thread:$0]  %s95_s15, 128, %s97_s18, [#allocation6], %s4144_s28, %s4144_s28, %s4145_s1  }
  0x44   :  { %s4146_s2 = smov [#allocation8]   ;;  %s146_s10 = sshll.u32 %s4225_s8, 4  ;;  %s4345_s10 = int_to_ptr.hbm [resolvable:$true] %s146_s10 }
  0x45   :  { %s123_s7 = sshll.u32 %s4146_s2, 4  ;;  %s3759_s17 = sshra.s32 %s122_s0, 4  ;;  %s124_s7 = int_to_ptr.vmem [resolvable:$true] %s123_s7  ;;  %s3760_s17 = int_to_ptr.hbm [resolvable:$true] %s3759_s17 }
  0x46   :  { %s3761_s11 = scalar_lea.hbm %s3760_s17, 1  ;;  %s3763_s16 = scalar_lea.hbm %s4210_s25, 1 }
  0x47   :  { %p3762_p5 = scmp.ne.s32.totalorder %s3760_s17, %s3761_s11  ;;  %p3764_p6 = scmp.lt.s32.totalorder %s3760_s17, %s4210_s25 }
  0x48   :  { %p3765_p7 = scmp.lt.s32.totalorder %s3763_s16, %s3761_s11 }
  0x4a   :  { %p3766_p8 = por %p3765_p7, %p3764_p6 }
  0x4c   :  { %p3767_p9 = pnand %p3766_p8, %p3762_p5 }
  0x4e   :  { %3770 = shalt.err (!%p3767_p9)
}
  0x4f   :  { %126 = dma.hbm_to_vmem [thread:$0]  %s122_s0, 16, %s124_s7, [#allocation9]  }
  0x50   :  { %s180_s15 = sshll.u32 %s4255_s12, 4  ;;  %s4147_s18 = smov [#allocation11]   ;;  %s4350_s15 = int_to_ptr.hbm [resolvable:$true] %s180_s15 }
  0x51   :  { %s148_s22 = sshll.u32 %s4147_s18, 4  ;;  %s3783_s23 = sshra.s32 %s4345_s10, 4  ;;  %s149_s22 = int_to_ptr.vmem [resolvable:$true] %s148_s22  ;;  %s3784_s23 = int_to_ptr.hbm [resolvable:$true] %s3783_s23 }
  0x52   :  { %s3785_s26 = scalar_lea.hbm %s3784_s23, 128  ;;  %s3787_s25 = scalar_lea.hbm %s4225_s8, 128 }
  0x53   :  { %p3786_p10 = scmp.ne.s32.totalorder %s3784_s23, %s3785_s26  ;;  %p3788_p11 = scmp.lt.s32.totalorder %s3784_s23, %s4225_s8 }
  0x54   :  { %p3789_p12 = scmp.lt.s32.totalorder %s3787_s25, %s3785_s26 }
  0x56   :  { %p3790_p13 = por %p3789_p12, %p3788_p11 }
  0x58   :  { %p3791_p0 = pnand %p3790_p13, %p3786_p10 }
  0x5a   :  { %3794 = shalt.err (!%p3791_p0)
}
  0x5b   :  { %154 = dma.hbm_to_vmem [thread:$0]  %s4345_s10, 2048, %s149_s22, [#allocation12], %s4144_s28, %s4144_s28, %s4145_s1  }
  0x5c   :  { %s4148_s0 = smov [#allocation14]   ;;  %s214_s7 = sshll.u32 %s4285_s27, 4  ;;  %s4360_s7 = int_to_ptr.hbm [resolvable:$true] %s214_s7 }
  0x5d   :  { %s182_s2 = sshll.u32 %s4148_s0, 4  ;;  %s3807_s8 = sshra.s32 %s4350_s15, 4  ;;  %s183_s2 = int_to_ptr.vmem [resolvable:$true] %s182_s2  ;;  %s3808_s8 = int_to_ptr.hbm [resolvable:$true] %s3807_s8 }
  0x5e   :  { %s3809_s17 = scalar_lea.hbm %s3808_s8, 128  ;;  %s3811_s11 = scalar_lea.hbm %s4255_s12, 128 }
  0x5f   :  { %p3810_p1 = scmp.ne.s32.totalorder %s3808_s8, %s3809_s17  ;;  %p3812_p2 = scmp.lt.s32.totalorder %s3808_s8, %s4255_s12 }
  0x60   :  { %p3813_p3 = scmp.lt.s32.totalorder %s3811_s11, %s3809_s17 }
  0x62   :  { %p3814_p4 = por %p3813_p3, %p3812_p2 }
  0x64   :  { %p3815_p5 = pnand %p3814_p4, %p3810_p1 }
  0x66   :  { %3818 = shalt.err (!%p3815_p5)
}
  0x67   :  { %188 = dma.hbm_to_vmem [thread:$0]  %s4350_s15, 2048, %s183_s2, [#allocation15], %s4144_s28, %s4144_s28, %s4145_s1  }
  0x68   :  { %s244_s10 = sshll.u32 %s4305_s14, 4  ;;  %s4149_s16 = smov [#allocation17]   ;;  %s4370_s10 = int_to_ptr.hbm [resolvable:$true] %s244_s10 }
  0x69   :  { %s216_s18 = sshll.u32 %s4149_s16, 4  ;;  %s3831_s12 = sshra.s32 %s4360_s7, 4  ;;  %s217_s18 = int_to_ptr.vmem [resolvable:$true] %s216_s18  ;;  %s3832_s12 = int_to_ptr.hbm [resolvable:$true] %s3831_s12 }
  0x6a   :  { %s3833_s22 = scalar_lea.hbm %s3832_s12, 128  ;;  %s3835_s23 = scalar_lea.hbm %s4285_s27, 128 }
  0x6b   :  { %p3834_p6 = scmp.ne.s32.totalorder %s3832_s12, %s3833_s22  ;;  %p3836_p7 = scmp.lt.s32.totalorder %s3832_s12, %s4285_s27 }
  0x6c   :  { %p3837_p8 = scmp.lt.s32.totalorder %s3835_s23, %s3833_s22 }
  0x6e   :  { %p3838_p9 = por %p3837_p8, %p3836_p7 }
  0x70   :  { %p3839_p10 = pnand %p3838_p9, %p3834_p6 }
  0x72   :  { %3842 = shalt.err (!%p3839_p10)
}
  0x73   :  { %222 = dma.hbm_to_vmem [thread:$0]  %s4360_s7, 2048, %s217_s18, [#allocation18], %s4144_s28, %s4144_s28, %s4145_s1  }
  0x74   :  { %s4150_s15 = smov [#allocation20]   ;;  %s84_s25 = sshll.u32 %s4195_s13, 4  ;;  %s85_s25 = int_to_ptr.hbm [resolvable:$true] %s84_s25 }
  0x75   :  { %s246_s26 = sshll.u32 %s4150_s15, 4  ;;  %s3855_s0 = sshra.s32 %s4370_s10, 4  ;;  %s247_s26 = int_to_ptr.vmem [resolvable:$true] %s246_s26  ;;  %s3856_s0 = int_to_ptr.hbm [resolvable:$true] %s3855_s0 }
  0x76   :  { %s3857_s27 = scalar_lea.hbm %s3856_s0, 64  ;;  %s3859_s2 = scalar_lea.hbm %s4305_s14, 64 }
  0x77   :  { %p3858_p11 = scmp.ne.s32.totalorder %s3856_s0, %s3857_s27  ;;  %p3860_p12 = scmp.lt.s32.totalorder %s3856_s0, %s4305_s14 }
  0x78   :  { %p3861_p13 = scmp.lt.s32.totalorder %s3859_s2, %s3857_s27 }
  0x7a   :  { %p3862_p0 = por %p3861_p13, %p3860_p12 }
  0x7c   :  { %p3863_p1 = pnand %p3862_p0, %p3858_p11 }
  0x7e   :  { %3866 = shalt.err (!%p3863_p1)
}
  0x7f   :  { %252 = dma.hbm_to_vmem [thread:$0]  %s4370_s10, 1024, %s247_s26, [#allocation21], %s4144_s28, %s4144_s28, %s4145_s1  }
  0x80   :  { %s107_s7 = sshll.u32 %s4205_s21, 4  ;;  %s4151_s8 = smov [#allocation2]   ;;  %s4388_s7 = int_to_ptr.hbm [resolvable:$true] %s107_s7 }
  0x81   :  { %s86_s17 = sshll.u32 %s4151_s8, 4  ;;  %s3879_s11 = sshra.s32 %s85_s25, 4  ;;  %s87_s17 = int_to_ptr.vmem [resolvable:$true] %s86_s17  ;;  %s3880_s11 = int_to_ptr.hbm [resolvable:$true] %s3879_s11 }
  0x82   :  { %s3881_s14 = scalar_lea.hbm %s3880_s11, 1  ;;  %s3883_s16 = scalar_lea.hbm %s4195_s13, 1 }
  0x83   :  { %p3882_p2 = scmp.ne.s32.totalorder %s3880_s11, %s3881_s14  ;;  %p3884_p3 = scmp.lt.s32.totalorder %s3880_s11, %s4195_s13 }
  0x84   :  { %p3885_p4 = scmp.lt.s32.totalorder %s3883_s16, %s3881_s14 }
  0x86   :  { %p3886_p5 = por %p3885_p4, %p3884_p3 }
  0x88   :  { %p3887_p6 = pnand %p3886_p5, %p3882_p2 }
  0x8a   :  { %3890 = shalt.err (!%p3887_p6)
}
  0x8b   :  { %89 = dma.hbm_to_vmem [thread:$0]  %s85_s25, 16, %s87_s17, [#allocation3]  }
  0x8c   :  { %s4152_s10 = smov [#allocation7]   ;;  %s131_s12 = sshll.u32 %s4215_s29, 4  ;;  %s4393_s12 = int_to_ptr.hbm [resolvable:$true] %s131_s12 }
  0x8d   :  { %s109_s18 = sshll.u32 %s4152_s10, 4  ;;  %s3903_s22 = sshra.s32 %s4388_s7, 4  ;;  %s110_s18 = int_to_ptr.vmem [resolvable:$true] %s109_s18  ;;  %s3904_s22 = int_to_ptr.hbm [resolvable:$true] %s3903_s22 }
  0x8e   :  { %s3905_s23 = scalar_lea.hbm %s3904_s22, 64  ;;  %s3907_s13 = scalar_lea.hbm %s4205_s21, 64 }
  0x8f   :  { %p3906_p7 = scmp.ne.s32.totalorder %s3904_s22, %s3905_s23  ;;  %p3908_p8 = scmp.lt.s32.totalorder %s3904_s22, %s4205_s21 }
  0x90   :  { %p3909_p9 = scmp.lt.s32.totalorder %s3907_s13, %s3905_s23 }
  0x92   :  { %p3910_p10 = por %p3909_p9, %p3908_p8 }
  0x94   :  { %p3911_p11 = pnand %p3910_p10, %p3906_p7 }
  0x96   :  { %3914 = shalt.err (!%p3911_p11)
}
  0x97   :  { %115 = dma.hbm_to_vmem [thread:$0]  %s4388_s7, 1024, %s110_s18, [#allocation6], %s4144_s28, %s4144_s28, %s4145_s1  }
  0x98   :  { %s165_s15 = sshll.u32 %s4245_s30, 4  ;;  %s4153_s26 = smov [#allocation10]   ;;  %s4403_s15 = int_to_ptr.hbm [resolvable:$true] %s165_s15 }
  0x99   :  { %s133_s25 = sshll.u32 %s4153_s26, 4  ;;  %s3927_s21 = sshra.s32 %s4393_s12, 4  ;;  %s134_s25 = int_to_ptr.vmem [resolvable:$true] %s133_s25  ;;  %s3928_s21 = int_to_ptr.hbm [resolvable:$true] %s3927_s21 }
  0x9a   :  { %s3929_s0 = scalar_lea.hbm %s3928_s21, 128  ;;  %s3931_s27 = scalar_lea.hbm %s4215_s29, 128 }
  0x9b   :  { %p3930_p12 = scmp.ne.s32.totalorder %s3928_s21, %s3929_s0  ;;  %p3932_p13 = scmp.lt.s32.totalorder %s3928_s21, %s4215_s29 }
  0x9c   :  { %p3933_p0 = scmp.lt.s32.totalorder %s3931_s27, %s3929_s0 }
  0x9e   :  { %p3934_p1 = por %p3933_p0, %p3932_p13 }
  0xa0   :  { %p3935_p2 = pnand %p3934_p1, %p3930_p12 }
  0xa2   :  { %3938 = shalt.err (!%p3935_p2)
}
  0xa3   :  { %139 = dma.hbm_to_vmem [thread:$0]  %s4393_s12, 2048, %s134_s25, [#allocation9], %s4144_s28, %s4144_s28, %s4145_s1  }
  0xa4   :  { %s4154_s2 = smov [#allocation13]   ;;  %s199_s8 = sshll.u32 %s4275_s24, 4  ;;  %s4413_s8 = int_to_ptr.hbm [resolvable:$true] %s199_s8 }
  0xa5   :  { %s167_s7 = sshll.u32 %s4154_s2, 4  ;;  %s3951_s29 = sshra.s32 %s4403_s15, 4  ;;  %s168_s7 = int_to_ptr.vmem [resolvable:$true] %s167_s7  ;;  %s3952_s29 = int_to_ptr.hbm [resolvable:$true] %s3951_s29 }
  0xa6   :  { %s3953_s17 = scalar_lea.hbm %s3952_s29, 128  ;;  %s3955_s11 = scalar_lea.hbm %s4245_s30, 128 }
  0xa7   :  { %p3954_p3 = scmp.ne.s32.totalorder %s3952_s29, %s3953_s17  ;;  %p3956_p4 = scmp.lt.s32.totalorder %s3952_s29, %s4245_s30 }
  0xa8   :  { %p3957_p5 = scmp.lt.s32.totalorder %s3955_s11, %s3953_s17 }
  0xaa   :  { %p3958_p6 = por %p3957_p5, %p3956_p4 }
  0xac   :  { %p3959_p7 = pnand %p3958_p6, %p3954_p3 }
  0xae   :  { %3962 = shalt.err (!%p3959_p7)
}
  0xaf   :  { %173 = dma.hbm_to_vmem [thread:$0]  %s4403_s15, 2048, %s168_s7, [#allocation12], %s4144_s28, %s4144_s28, %s4145_s1  }
  0xb0   :  { %s231_s14 = sshll.u32 %s4300_s20, 4  ;;  %s4155_s16 = smov [#allocation16]   ;;  %s4423_s14 = int_to_ptr.hbm [resolvable:$true] %s231_s14 }
  0xb1   :  { %s201_s10 = sshll.u32 %s4155_s16, 4  ;;  %s3975_s30 = sshra.s32 %s4413_s8, 4  ;;  %s202_s10 = int_to_ptr.vmem [resolvable:$true] %s201_s10  ;;  %s3976_s30 = int_to_ptr.hbm [resolvable:$true] %s3975_s30 }
  0xb2   :  { %s3977_s18 = scalar_lea.hbm %s3976_s30, 128  ;;  %s3979_s12 = scalar_lea.hbm %s4275_s24, 128 }
  0xb3   :  { %p3978_p8 = scmp.ne.s32.totalorder %s3976_s30, %s3977_s18  ;;  %p3980_p9 = scmp.lt.s32.totalorder %s3976_s30, %s4275_s24 }
  0xb4   :  { %p3981_p10 = scmp.lt.s32.totalorder %s3979_s12, %s3977_s18 }
  0xb6   :  { %p3982_p11 = por %p3981_p10, %p3980_p9 }
  0xb8   :  { %p3983_p12 = pnand %p3982_p11, %p3978_p8 }
  0xba   :  { %3986 = shalt.err (!%p3983_p12)
}
  0xbb   :  { %207 = dma.hbm_to_vmem [thread:$0]  %s4413_s8, 2048, %s202_s10, [#allocation15], %s4144_s28, %s4144_s28, %s4145_s1  }
  0xbc   :  { %s4156_s22 = smov [#allocation19]   ;;  %s3999_s13 = sshra.s32 %s4423_s14, 4  ;;  %s4000_s13 = int_to_ptr.hbm [resolvable:$true] %s3999_s13 }
  0xbd   :  { %s233_s23 = sshll.u32 %s4156_s22, 4  ;;  %s4001_s15 = scalar_lea.hbm %s4000_s13, 2  ;;  %s234_s23 = int_to_ptr.vmem [resolvable:$true] %s233_s23 }
  0xbe   :  { %p4002_p13 = scmp.ne.s32.totalorder %s4000_s13, %s4001_s15  ;;  %s4003_s24 = scalar_lea.hbm %s4300_s20, 2 }
  0xbf   :  { %p4004_p0 = scmp.lt.s32.totalorder %s4000_s13, %s4300_s20  ;;  %p4005_p1 = scmp.lt.s32.totalorder %s4003_s24, %s4001_s15 }
  0xc1   :  { %p4006_p2 = por %p4005_p1, %p4004_p0 }
  0xc3   :  { %p4007_p3 = pnand %p4006_p2, %p4002_p13 }
  0xc5   :  { %4010 = shalt.err (!%p4007_p3)
}
  0xc6   :  { %s4157_s26 = smov 16   ;;  %s4158_s25 = smov 1  }
  0xc7   :  { %239 = dma.hbm_to_vmem [thread:$0]  %s4423_s14, 32, %s234_s23, [#allocation18], %s4157_s26, %s4157_s26, %s4158_s25  }
  0xc8   :  { %s259_s21 = sshll.u32 %s4315_s19, 4  ;;  %s4159_s0 = smov [#allocation22]   ;;  %s260_s21 = int_to_ptr.hbm [resolvable:$true] %s259_s21 }
  0xc9   :  { %s261_s27 = sshll.u32 %s4159_s0, 4  ;;  %s274_s20 = sshll.u32 %s4325_s9, 4  ;;  %s262_s27 = int_to_ptr.vmem [resolvable:$true] %s261_s27  ;;  %s275_s20 = int_to_ptr.hbm [resolvable:$true] %s274_s20 }
  0xca   :  { %s4023_s2 = sshra.s32 %s260_s21, 4  ;;  %s4027_s8 = scalar_lea.hbm %s4315_s19, 64  ;;  %s4024_s2 = int_to_ptr.hbm [resolvable:$true] %s4023_s2 }
  0xcb   :  { %s4025_s7 = scalar_lea.hbm %s4024_s2, 64  ;;  %p4028_p5 = scmp.lt.s32.totalorder %s4024_s2, %s4315_s19 }
  0xcc   :  { %p4026_p4 = scmp.ne.s32.totalorder %s4024_s2, %s4025_s7  ;;  %p4029_p6 = scmp.lt.s32.totalorder %s4027_s8, %s4025_s7 }
  0xce   :  { %p4030_p7 = por %p4029_p6, %p4028_p5 }
  0xd0   :  { %p4031_p8 = pnand %p4030_p7, %p4026_p4 }
  0xd2   :  { %4034 = shalt.err (!%p4031_p8)
}
  0xd3   :  { %267 = dma.hbm_to_vmem [thread:$0]  %s260_s21, 1024, %s262_s27, [#allocation21], %s4144_s28, %s4144_s28, %s4145_s1  }
  0xd4   :  { %s4160_s29 = smov [#allocation23]   ;;  %s4047_s11 = sshra.s32 %s275_s20, 4  ;;  %s4048_s11 = int_to_ptr.hbm [resolvable:$true] %s4047_s11 }
  0xd5   :  { %s276_s17 = sshll.u32 %s4160_s29, 4  ;;  %s4049_s14 = scalar_lea.hbm %s4048_s11, 64  ;;  %s277_s17 = int_to_ptr.vmem [resolvable:$true] %s276_s17 }
  0xd6   :  { %p4050_p9 = scmp.ne.s32.totalorder %s4048_s11, %s4049_s14  ;;  %s4051_s16 = scalar_lea.hbm %s4325_s9, 64 }
  0xd7   :  { %p4052_p10 = scmp.lt.s32.totalorder %s4048_s11, %s4325_s9  ;;  %p4053_p11 = scmp.lt.s32.totalorder %s4051_s16, %s4049_s14 }
  0xd9   :  { %p4054_p12 = por %p4053_p11, %p4052_p10 }
  0xdb   :  { %p4055_p13 = pnand %p4054_p12, %p4050_p9 }
  0xdd   :  { %4058 = shalt.err (!%p4055_p13)
}
  0xde   :  { %282 = dma.hbm_to_vmem [thread:$0]  %s275_s20, 1024, %s277_s17, [#allocation24], %s4144_s28, %s4144_s28, %s4145_s1  }
  0xdf   :  { %4095 = dma.done.wait [#allocation3], 16  }
  0xe0   :  { %4096 = vsyncadd [#allocation3], 4294967280 }
  0xe1   :  { %4097 = dma.done.wait [#allocation6], 1152  }
  0xe2   :  { %4098 = vsyncadd [#allocation6], 4294966144 }
  0xe3   :  { %4099 = dma.done.wait [#allocation9], 2064  }
  0xe4   :  { %4100 = vsyncadd [#allocation9], 4294965232 }
  0xe5   :  { %4101 = dma.done.wait [#allocation12], 4096  }
  0xe6   :  { %4102 = vsyncadd [#allocation12], 4294963200 }
  0xe7   :  { %4103 = dma.done.wait [#allocation15], 4096  }
  0xe8   :  { %4104 = vsyncadd [#allocation15], 4294963200 }
  0xe9   :  { %4105 = dma.done.wait [#allocation18], 2080  }
  0xea   :  { %4106 = vsyncadd [#allocation18], 4294965216 }
  0xeb   :  { %4107 = dma.done.wait [#allocation21], 2048  }
  0xec   :  { %4108 = vsyncadd [#allocation21], 4294965248 }
  0xed   :  { %4109 = dma.done.wait [#allocation24], 1024  }
  0xee   :  { %4110 = vsyncadd [#allocation24], 4294966272  ;;  %v3421_v0 = vld [vmem:[#allocation7 + $0x38] sm:$0xff]  ;;  %v3420_v1 = vld [vmem:[#allocation7 + $0x30] sm:$0xff]  ;;  %vm471_vm0 = vcmask 130048   ;;  %v358_v34 = vlaneseq  ;;  %v4161_v41 = vmov 0.0  }
  0xef   :  { %451 = vmatpush.bf16.msra.mxu0 %v3421_v0  ;;  %v3445_v2 = vld [vmem:[#allocation13 + $0x38] sm:$0xff]  ;;  %v3419_v3 = vld [vmem:[#allocation7 + $0x28] sm:$0xff]  ;;  %v3444_v4 = vld [vmem:[#allocation13 + $0x30] sm:$0xff]  ;;  %s4162_s9 = smov 72   ;;  %s4163_s19 = smov 80   ;;  %vm800_vm13 = vcmask 64512  }
  0xf0   :  { %782 = vmatpush.bf16.msra.mxu1 %v3445_v2  ;;  %v3443_v5 = vld [vmem:[#allocation13 + $0x28] sm:$0xff]  ;;  %v3418_v6 = vld [vmem:[#allocation7 + $0x20] sm:$0xff]  ;;  %v3417_v8 = vld [vmem:[#allocation7 + $0x18] sm:$0xff]  ;;  %v359_v35 = vand.u32 127, %v358_v34  ;;  %s4164_s28 = smov 96   ;;  %s4165_s1 = smov 112  }
  0xf1   :  { %v3442_v7 = vld [vmem:[#allocation13 + $0x20] sm:$0xff]  ;;  %v3441_v9 = vld [vmem:[#allocation13 + $0x18] sm:$0xff]  ;;  %v3416_v10 = vld [vmem:[#allocation7 + $0x10] sm:$0xff]  ;;  %s4166_s10 = smov 120   ;;  %s4167_s30 = smov 88  }
  0xf2   :  { %v3415_v11 = vld [vmem:[#allocation7 + $0x8] sm:$0xff]  ;;  %v3414_v12 = vld [vmem:[#allocation7] sm:$0xff]  ;;  %v380_v13 = vld [vmem:[%s4185_s5] sm:$0xff]  ;;  %vm375_vm1 = vcmp.ge.s32.totalorder %v359_v35, 88  ;;  %vm376_vm2 = vcmp.lt.s32.totalorder %v359_v35, 96  ;;  %vm370_vm4 = vcmp.ge.s32.totalorder %v359_v35, 80 }
  0xf3   :  { %452 = vmatpush.bf16.msra.mxu0 %v3420_v1  ;;  %v381_v14 = vld [vmem:[%s4185_s5 + $0x8] sm:$0xff]  ;;  %v3440_v16 = vld [vmem:[#allocation13 + $0x10] sm:$0xff]  ;;  %v3439_v17 = vld [vmem:[#allocation13 + $0x8] sm:$0xff]  ;;  %s4894_s5 = sld [smem:[#allocation40_spill]]  ;;  %vm371_vm5 = vcmp.lt.s32.totalorder %v359_v35, 88  ;;  %vm365_vm7 = vcmp.ge.s32.totalorder %v359_v35, 72 }
  0xf4   :  { %783 = vmatpush.bf16.msra.mxu1 %v3444_v4  ;;  %v398_v15 = vpack.c.bf16 %v381_v14, %v380_v13  ;;  %v3438_v18 = vld [vmem:[#allocation13] sm:$0xff]  ;;  %v3429_v19 = vld [vmem:[#allocation10 + $0x38] sm:$0xff]  ;;  %v3428_v20 = vld [vmem:[#allocation10 + $0x30] sm:$0xff]  ;;  %vm366_vm8 = vcmp.lt.s32.totalorder %v359_v35, 80  ;;  %vm360_vm10 = vcmp.ge.s32.totalorder %v359_v35, 64  ;;  %vm361_vm11 = vcmp.lt.s32.totalorder %v359_v35, 72 }
  0xf5   :  { %560 = vmatpush.bf16.msra.mxu2 %v3429_v19  ;;  %v3427_v21 = vld [vmem:[#allocation10 + $0x28] sm:$0xff]  ;;  %v3639_v23 = vld [vmem:[#allocation8] ss:$0 sm:$0xff]  ;;  %v3413_v28 = vld [vmem:[#allocation5] sm:$0xff]  ;;  %s4168_s18 = smov 104   ;;  %s4895_s12 = sld [smem:[#allocation35_spill]] }
  0xf6   :  { %v3426_v29 = vld [vmem:[#allocation10 + $0x20] sm:$0xff]  ;;  %v3425_v30 = vld [vmem:[#allocation10 + $0x18] sm:$0xff]  ;;  %v3424_v31 = vld [vmem:[#allocation10 + $0x10] sm:$0xff]  ;;  %s4896_s22 = sld [smem:[#allocation36_spill]]  ;;  %s4172_s24 = smov 48  }
  0xf7   :  { %453 = vmatpush.bf16.msra.mxu0 %v3419_v3  ;;  %v3423_v32 = vld [vmem:[#allocation10 + $0x8] sm:$0xff]  ;;  %v3422_v33 = vld [vmem:[#allocation10] sm:$0xff]  ;;  %v3437_v36 = vld [vmem:[#allocation11 + $0x38] sm:$0xff]  ;;  %s4897_s23 = sld [smem:[#allocation37_spill]]  ;;  %s4173_s25 = smov 32  }
  0xf8   :  { %784 = vmatpush.bf16.msra.mxu1 %v3443_v5  ;;  %vm377_vm3 = vmand %vm375_vm1, %vm376_vm2  ;;  %v3436_v1 = vld [vmem:[#allocation11 + $0x30] sm:$0xff]  ;;  %v3435_v2 = vld [vmem:[#allocation11 + $0x28] sm:$0xff]  ;;  %s4898_s13 = sld [smem:[#allocation38_spill]]  ;;  %s4174_s8 = smov [#allocation25]  }
  0xf9   :  { %561 = vmatpush.bf16.msra.mxu2 %v3428_v20  ;;  %v3640_v38 = vld [vmem:[%s4894_s5] ss:$0 sm:$0xff]  ;;  %v4460_v42 = vsel %vm377_vm3, 1.0, %v4161_v41  ;;  %vm372_vm6 = vmand %vm370_vm4, %vm371_vm5  ;;  %v3434_v3 = vld [vmem:[#allocation11 + $0x20] sm:$0xff]  ;;  %s4899_s15 = sld [smem:[#allocation39_spill]]  ;;  %s2818_s29 = sshll.u32 %s4174_s8, 4  ;;  %s2819_s29 = int_to_ptr.vmem [resolvable:$true] %s2818_s29 }
  0xfa   :  { %v4466_v48 = vsel %vm372_vm6, 1.0, %v4161_v41  ;;  %vm367_vm9 = vmand %vm365_vm7, %vm366_vm8  ;;  %v3433_v4 = vld [vmem:[#allocation11 + $0x18] sm:$0xff]  ;;  %v3432_v5 = vld [vmem:[#allocation11 + $0x10] sm:$0xff]  ;;  %s4906_s21 = sld [smem:[#allocation41_spill]]  ;;  %s2820_s17 = sshll.u32 %s4335_s6, 4  ;;  %s2821_s17 = int_to_ptr.hbm [resolvable:$true] %s2820_s17 }
  0xfb   :  { %454 = vmatpush.bf16.msra.mxu0 %v3418_v6  ;;  %v4476_v52 = vsel %vm367_vm9, 1.0, %v4161_v41  ;;  %vm362_vm12 = vmand %vm360_vm10, %vm361_vm11  ;;  %v3431_v6 = vld [vmem:[#allocation11 + $0x8] sm:$0xff]  ;;  %v343_v20 = vld [vmem:[%s4895_s12 + $0x8] sm:$0xff]  ;;  %s4907_s0 = sld [smem:[#allocation42_spill]]  ;;  %s4087_s14 = scalar_lea.hbm %s4335_s6, 16 }
  0xfc   :  { %785 = vmatpush.bf16.msra.mxu1 %v3442_v7  ;;  %v4482_v60 = vsel %vm362_vm12, 1.0, %v4161_v41  ;;  %v3430_v7 = vld [vmem:[#allocation11] sm:$0xff]  ;;  %v3642_v34 = vld [vmem:[#allocation2] ss:$0 sm:$0xff]  ;;  %s4908_s27 = sld [smem:[#allocation43_spill]] }
  0xfd   :  { %562 = vmatpush.bf16.msra.mxu2 %v3427_v21  ;;  %s4909_s20 = sld [smem:[#allocation44_spill]] }
  0xfe   :  { %s4910_s2 = sld [smem:[#allocation45_spill]] }
  0xff   :  { %455 = vmatpush.bf16.msra.mxu0 %v3417_v8  ;;  %s4911_s7 = sld [smem:[#allocation46_spill]] }
 0x100   :  { %786 = vmatpush.bf16.msra.mxu1 %v3441_v9 }
 0x101   :  { %563 = vmatpush.bf16.msra.mxu2 %v3426_v29 }
 0x103   :  { %456 = vmatpush.bf16.msra.mxu0 %v3416_v10  ;;  %v4169_v10 = vmov 0  }
 0x104   :  { %787 = vmatpush.bf16.msra.mxu1 %v3440_v16  ;;  %3606 = vset.pattern.permute.xlu1 %v4169_v10 }
 0x105   :  { %564 = vmatpush.bf16.msra.mxu2 %v3425_v30  ;;  %3607 = vset.pattern.permute.xlu2 %v4169_v10 }
 0x106   :  { %3638 = vset.pattern.permute.xlu0 %v4169_v10 }
 0x107   :  { %457 = vmatpush.bf16.msra.mxu0 %v3415_v11  ;;  %v342_v11 = vld [vmem:[%s4895_s12] sm:$0xff] }
 0x108   :  { %788 = vmatpush.bf16.msra.mxu1 %v3439_v17 }
 0x109   :  { %565 = vmatpush.bf16.msra.mxu2 %v3424_v31 }
 0x10b   :  { %458 = vmatpush.bf16.msra.mxu0 %v3414_v12 }
 0x10c   :  { %789 = vmatpush.bf16.msra.mxu1 %v3438_v18 }
 0x10d   :  { %566 = vmatpush.bf16.msra.mxu2 %v3423_v32 }
 0x10e   :  { %459 = vmatmul.bf16.vlgmr.msra.gmra.mxu0 %v398_v15 }
 0x111   :  { %567 = vmatpush.bf16.msra.mxu2 %v3422_v33 }
 0x18b   :  { %v460_v22 = vpop.f32.mrf.mxu0 }
 0x18c   :  { %v4452_v25 = vadd.f32 %v3639_v23, %v460_v22  ;;  %v3641_v22 = vld [vmem:[%s4896_s22] ss:$0 sm:$0xff] }
 0x193   :  { %v462_v24 = vpop.f32.mrf.mxu0 }
 0x194   :  { %v4454_v26 = vadd.f32 %v3639_v23, %v462_v24 }
 0x196   :  { %v465_v27 = vpack.c.bf16 %v4454_v26, %v4452_v25 }
 0x198   :  { %482 = vmatpush.bf16.msra.mxu3 %v465_v27  ;;  %790 = vmatmul.bf16.vlgmr.msra.gmra.mxu1 %v465_v27 }
 0x19b   :  { %2910 = vmatmul.msk.bf16.vlgmr.msra.gmra.mxu3 %vm471_vm0, %v3413_v28 }
 0x19c   :  { %645 = vmatpush.bf16.msrb.mxu3 %v3437_v36 }
 0x1a0   :  { %646 = vmatpush.bf16.msrb.mxu3 %v3436_v1 }
 0x1a4   :  { %647 = vmatpush.bf16.msrb.mxu3 %v3435_v2 }
 0x1a8   :  { %648 = vmatpush.bf16.msrb.mxu3 %v3434_v3 }
 0x1ac   :  { %649 = vmatpush.bf16.msrb.mxu3 %v3433_v4 }
 0x1b0   :  { %650 = vmatpush.bf16.msrb.mxu3 %v3432_v5 }
 0x1b4   :  { %651 = vmatpush.bf16.msrb.mxu3 %v3431_v6 }
 0x1b8   :  { %652 = vmatpush.bf16.msrb.mxu3 %v3430_v7 }
 0x215   :  { %v791_v37 = vpop.f32.mrf.mxu1 }
 0x216   :  { %v792_v39 = vadd.f32 %v3640_v38, %v791_v37 }
 0x218   :  { %v1139_v46 = vmul.f32 %v4460_v42, %v792_v39  ;;  %v1137_v51 = vmul.f32 %v4466_v48, %v792_v39  ;;  %v1135_v58 = vmul.f32 %v4476_v52, %v792_v39  ;;  %v1133_v63 = vmul.f32 %v4482_v60, %v792_v39 }
 0x21d   :  { %v793_v40 = vpop.f32.mrf.mxu1 }
 0x21e   :  { %v794_v43 = vadd.f32 %v3640_v38, %v793_v40  ;;  %v484_v44 = vpop.f32.mrf.mxu3 }
 0x21f   :  { %v489_v56 = vadd.f32 %v484_v44, %v4452_v25 }
 0x220   :  { %v4462_v45 = vpack.c.bf16 %v794_v43, %v792_v39  ;;  %v1140_v47 = vmul.f32 %v4460_v42, %v794_v43  ;;  %v1138_v50 = vmul.f32 %v4466_v48, %v794_v43  ;;  %v1136_v55 = vmul.f32 %v4476_v52, %v794_v43 }
 0x221   :  { %v1134_v62 = vmul.f32 %v4482_v60, %v794_v43  ;;  %v4170_v39 = vmov -1e+30  }
 0x222   :  { %1027 = vrot.lane.b32.xlu2 %v4462_v45, %s4162_s9  ;;  %951 = vrot.lane.b32.xlu1 %v4462_v45, %s4163_s19  ;;  %v1145_v49 = vpack.c.bf16 %v1140_v47, %v1139_v46  ;;  %v1144_v54 = vpack.c.bf16 %v1138_v50, %v1137_v51  ;;  %v1143_v61 = vpack.c.bf16 %v1136_v55, %v1135_v58  ;;  %v4171_v58 = vmov 16.0  }
 0x223   :  { %798 = vrot.lane.b32.xlu0 %v4462_v45, %s4164_s28  ;;  %v1142_v0 = vpack.c.bf16 %v1134_v62, %v1133_v63  ;;  %3656 = vrcp.f32 %v4171_v58 }
 0x224   :  { %1154 = vmatpush.bf16.msrb.mxu0 %v1145_v49 }
 0x226   :  { %v486_v53 = vpop.f32.mrf.mxu3 }
 0x227   :  { %v490_v57 = vadd.f32 %v486_v53, %v4454_v26 }
 0x228   :  { %1155 = vmatpush.bf16.msrb.mxu0 %v1144_v54 }
 0x229   :  { %v507_v59 = vpack.c.bf16 %v490_v57, %v489_v56 }
 0x22a   :  { %949 = vrot.lane.b32.xlu2 %v4462_v45, %s4165_s1  ;;  %873 = vrot.lane.b32.xlu1 %v4462_v45, %s4166_s10 }
 0x22b   :  { %875 = vrot.lane.b32.xlu0 %v4462_v45, %s4167_s30  ;;  %568 = vmatmul.bf16.vlgmr.msra.gmra.mxu2 %v507_v59 }
 0x22c   :  { %1156 = vmatpush.bf16.msrb.mxu0 %v1143_v61  ;;  %v3643_v61 = vld [vmem:[%s4897_s23] ss:$0 sm:$0xff] }
 0x230   :  { %1157 = vmatpush.bf16.msrb.mxu0 %v1142_v0  ;;  %v3657_v0 = vpop.eup %3656 }
 0x231   :  { %v671_v5 = vmul.f32 16.0, %v3657_v0  ;;  %vm675_vm1 = vweird.f32 %v3657_v0 }
 0x232   :  { %346 = vperm.xlu1 %3606, %v342_v11   ;;  %349 = vperm.xlu2 %3607, %v343_v20  }
 0x233   :  { %1025 = vrot.lane.b32.xlu0 %v4462_v45, %s4168_s18 }
 0x27c   :  { %v1028_v8 = vpop.permute.xlu2 %1027 }
 0x27d   :  { %v1033_v9 = vsel %vm800_vm13, %v1028_v8, 0 }
 0x27e   :  { %1042 = vmatpush.bf16.xpose.msrb.mxu1 %v1033_v9  ;;  %v672_v9 = vsub.f32 1.0, %v671_v5 }
 0x284   :  { %v950_v31 = vpop.permute.xlu2 %949 }
 0x28c   :  { %v350_v43 = vpop.permute.xlu2 %349 }
 0x28d   :  { %vm353_vm15 = vcmp.eq.s32.totalorder %v350_v43, %v3642_v34 }
 0x28e   :  { %v4518_v50 = vsel %vm353_vm15, 0.0, %v4170_v39 }
 0x294   :  { %v952_v12 = vpop.permute.xlu1 %951 }
 0x295   :  { %v957_v13 = vsel %vm800_vm13, %v952_v12, 0  ;;  %v799_v14 = vpop.permute.xlu0 %798 }
 0x296   :  { %v805_v15 = vsel %vm800_vm13, %v799_v14, 0  ;;  %966 = vmatpush.bf16.xpose.msra.mxu3 %v957_v13 }
 0x297   :  { %814 = vmatpush.bf16.xpose.msrb.mxu2 %v805_v15  ;;  %v673_v15 = vmul.f32 %v3657_v0, %v672_v9 }
 0x29c   :  { %v874_v19 = vpop.permute.xlu1 %873 }
 0x29d   :  { %v876_v16 = vpop.permute.xlu0 %875 }
 0x29e   :  { %v881_v17 = vsel %vm800_vm13, %v876_v16, 0  ;;  %3007 = vmatmul.msk.bf16.vlgmr.msrb.gmra.mxu2 %vm800_vm13, %v4462_v45 }
 0x29f   :  { %890 = vmatpush.bf16.xpose.msra.mxu2 %v881_v17 }
 0x2a4   :  { %v347_v35 = vpop.permute.xlu1 %346 }
 0x2a5   :  { %v1026_v18 = vpop.permute.xlu0 %1025  ;;  %vm352_vm14 = vcmp.eq.s32.totalorder %v347_v35, %v3642_v34 }
 0x2a6   :  { %3010 = vmatmul.msk.bf16.vlgmr.msrb.gmra.mxu1 %vm800_vm13, %v1026_v18  ;;  %v4508_v40 = vsel %vm352_vm14, 0.0, %v4170_v39 }
 0x2ae   :  { %3008 = vmatmul.msk.bf16.vlgmr.msra.gmra.mxu2 %vm800_vm13, %v874_v19  ;;  %v569_v21 = vpop.f32.mrf.mxu2 }
 0x2af   :  { %v570_v23 = vadd.f32 %v3641_v22, %v569_v21 }
 0x2b1   :  { %v574_v28 = vmax.f32 %v570_v23, 0.0  ;;  %v674_v23 = vadd.f32 %v3657_v0, %v673_v15 }
 0x2b6   :  { %v571_v24 = vpop.f32.mrf.mxu2 }
 0x2b7   :  { %v572_v27 = vadd.f32 %v3641_v22, %v571_v24 }
 0x2b9   :  { %v575_v29 = vmax.f32 %v572_v27, 0.0 }
 0x2bb   :  { %v592_v30 = vpack.c.bf16 %v575_v29, %v574_v28 }
 0x2bd   :  { %653 = vmatmul.bf16.vlgmr.msrb.gmra.mxu3 %v592_v30 }
 0x2cd   :  { %3009 = vmatmul.msk.bf16.vlgmr.msra.gmra.mxu3 %vm800_vm13, %v950_v31  ;;  %v4545_v31 = vsel %vm675_vm1, %v3657_v0, %v674_v23 }
 0x321   :  { %v4506_v32 = vpop.f32.mrf.mxu2 }
 0x322   :  { %v821_v43 = vmul.f32 0.35355338, %v4506_v32 }
 0x323   :  { %v1044_v36 = vpop.f32.mrf.mxu1 }
 0x324   :  { %v1049_v44 = vmul.f32 0.35355338, %v1044_v36 }
 0x326   :  { %v4516_v49 = vadd.f32 %v1049_v44, %v4508_v40 }
 0x328   :  { %v1053_v57 = vsel %vm471_vm0, %v4516_v49, -inf }
 0x329   :  { %v818_v33 = vpop.f32.mrf.mxu2 }
 0x32a   :  { %v822_v54 = vmul.f32 0.35355338, %v818_v33 }
 0x32b   :  { %v1046_v51 = vpop.f32.mrf.mxu1 }
 0x32c   :  { %v1050_v55 = vmul.f32 0.35355338, %v1046_v51  ;;  %v4532_v63 = vadd.f32 %v822_v54, %v4518_v50  ;;  %v4556_v54 = vadd.f32 %v821_v43, %v4508_v40 }
 0x32e   :  { %v4529_v62 = vadd.f32 %v1050_v55, %v4518_v50  ;;  %v828_v3 = vsel %vm471_vm0, %v4532_v63, -inf  ;;  %v825_v55 = vsel %vm471_vm0, %v4556_v54, -inf }
 0x330   :  { %v1056_v2 = vsel %vm471_vm0, %v4529_v62, -inf }
 0x331   :  { %v892_v37 = vpop.f32.mrf.mxu2 }
 0x332   :  { %v897_v38 = vmul.f32 0.35355338, %v892_v37 }
 0x334   :  { %v4511_v41 = vadd.f32 %v897_v38, %v4508_v40 }
 0x336   :  { %v901_v45 = vsel %vm471_vm0, %v4511_v41, -inf }
 0x337   :  { %902 = vmax.xlane.f32.xlu0 %v901_v45 }
 0x339   :  { %v894_v46 = vpop.f32.mrf.mxu2 }
 0x33a   :  { %v898_v47 = vmul.f32 0.35355338, %v894_v46 }
 0x33c   :  { %v4521_v53 = vadd.f32 %v898_v47, %v4518_v50 }
 0x33e   :  { %v904_v56 = vsel %vm471_vm0, %v4521_v53, -inf }
 0x33f   :  { %905 = vmax.xlane.f32.xlu1 %v904_v56  ;;  %1054 = vmax.xlane.f32.xlu0 %v1053_v57 }
 0x340   :  { %v654_v59 = vpop.f32.mrf.mxu3 }
 0x341   :  { %v655_v1 = vadd.f32 %v3643_v61, %v654_v59 }
 0x343   :  { %v659_v6 = vadd.f32 %v655_v1, %v4452_v25 }
 0x345   :  { %v678_v10 = vmul.f32 %v659_v6, %v659_v6 }
 0x347   :  { %1057 = vmax.xlane.f32.xlu1 %v1056_v2  ;;  %829 = vmax.xlane.f32.xlu0 %v828_v3  ;;  %v662_v3 = vld [vmem:[%s4899_s15] sm:$0x1] }
 0x348   :  { %v656_v4 = vpop.f32.mrf.mxu3 }
 0x349   :  { %v657_v7 = vadd.f32 %v3643_v61, %v656_v4  ;;  %v661_v61 = vld [vmem:[%s4898_s13] sm:$0x1] }
 0x34b   :  { %v660_v8 = vadd.f32 %v657_v7, %v4454_v26 }
 0x34d   :  { %v663_v11 = vadd.f32 %v660_v8, %v659_v6  ;;  %v679_v12 = vmul.f32 %v660_v8, %v660_v8 }
 0x34f   :  { %v664_v13 = vrot.slane %v663_v11, 4  ;;  %v680_v14 = vadd.f32 %v679_v12, %v678_v10 }
 0x350   :  { %v968_v16 = vpop.f32.mrf.mxu3 }
 0x351   :  { %v665_v17 = vadd.f32 %v664_v13, %v663_v11  ;;  %v681_v18 = vrot.slane %v680_v14, 4  ;;  %v973_v19 = vmul.f32 0.35355338, %v968_v16 }
 0x353   :  { %v666_v20 = vrot.slane %v665_v17, 2  ;;  %v682_v21 = vadd.f32 %v681_v18, %v680_v14  ;;  %v4541_v22 = vadd.f32 %v973_v19, %v4508_v40 }
 0x355   :  { %v667_v24 = vadd.f32 %v666_v20, %v665_v17  ;;  %v683_v27 = vrot.slane %v682_v21, 2  ;;  %v977_v28 = vsel %vm471_vm0, %v4541_v22, -inf }
 0x356   :  { %978 = vmax.xlane.f32.xlu2 %v977_v28 }
 0x357   :  { %v668_v29 = vrot.slane %v667_v24, 1  ;;  %v684_v30 = vadd.f32 %v683_v27, %v682_v21 }
 0x358   :  { %v970_v33 = vpop.f32.mrf.mxu3 }
 0x359   :  { %v669_v34 = vadd.f32 %v668_v29, %v667_v24  ;;  %v685_v35 = vrot.slane %v684_v30, 1  ;;  %v974_v36 = vmul.f32 0.35355338, %v970_v33 }
 0x35b   :  { %v677_v37 = vmul.f32 %v4545_v31, %v669_v34  ;;  %v686_v38 = vadd.f32 %v685_v35, %v684_v30  ;;  %v4549_v39 = vadd.f32 %v974_v36, %v4518_v50 }
 0x35d   :  { %v687_v44 = vmul.f32 %v686_v38, %v4545_v31  ;;  %v688_v45 = vmul.f32 %v677_v37, %v677_v37  ;;  %v980_v46 = vsel %vm471_vm0, %v4549_v39, -inf }
 0x35e   :  { %981 = vmax.xlane.f32.xlu2 %v980_v46 }
 0x35f   :  { %v689_v47 = vsub.f32 %v687_v44, %v688_v45 }
 0x361   :  { %v690_v51 = vadd.f32 1e-05, %v689_v47 }
 0x363   :  { %3658 = vrsqrt.f32 %v690_v51  ;;  %vm697_vm3 = vweird.f32 %v690_v51 }
 0x366   :  { %826 = vmax.xlane.f32.xlu2 %v825_v55 }
 0x369   :  { %v3659_v32 = vpop.eup %3658 }
 0x36a   :  { %v692_v56 = vmul.f32 %v3659_v32, %v690_v51  ;;  %vm698_vm2 = vweird.f32 %v3659_v32 }
 0x36b   :  { %vm699_vm4 = vmor %vm697_vm3, %vm698_vm2 }
 0x36c   :  { %v693_v57 = vmul.f32 %v3659_v32, %v692_v56 }
 0x36e   :  { %v694_v58 = vmul.f32 0.5, %v693_v57 }
 0x370   :  { %v695_v59 = vsub.f32 1.5, %v694_v58 }
 0x372   :  { %v696_v0 = vmul.f32 %v3659_v32, %v695_v59 }
 0x374   :  { %v700_v1 = vsel %vm699_vm4, %v3659_v32, %v696_v0 }
 0x375   :  { %v701_v2 = vmul.f32 %v700_v1, %v661_v61 }
 0x377   :  { %v702_v4 = vmul.f32 %v701_v2, %v677_v37  ;;  %v705_v5 = vperm.slane %v701_v2, 0 }
 0x379   :  { %v703_v7 = vsub.f32 %v662_v3, %v702_v4  ;;  %v707_v9 = vmul.f32 %v705_v5, %v659_v6  ;;  %v708_v10 = vmul.f32 %v705_v5, %v660_v8 }
 0x37b   :  { %v710_v11 = vperm.slane %v703_v7, 0 }
 0x37d   :  { %v4562_v12 = vadd.f32 %v710_v11, %v708_v10  ;;  %v4564_v13 = vadd.f32 %v710_v11, %v707_v9 }
 0x3aa   :  { %v903_v14 = vpop.xlane.xlu0 %902 }
 0x3ab   :  { %v907_v15 = vsub.f32 %v4511_v41, %v903_v14 }
 0x3ad   :  { %v909_v16 = vmul.f32 1.442695, %v907_v15 }
 0x3af   :  { %3660 = vpow2.f32 %v909_v16 }
 0x3b2   :  { %v1055_v17 = vpop.xlane.xlu0 %1054  ;;  %v906_v18 = vpop.xlane.xlu1 %905 }
 0x3b3   :  { %v908_v19 = vsub.f32 %v4521_v53, %v906_v18  ;;  %v1059_v6 = vsub.f32 %v4516_v49, %v1055_v17 }
 0x3b5   :  { %v4568_v20 = vpop.eup %3660  ;;  %v911_v21 = vmul.f32 1.442695, %v908_v19  ;;  %v1061_v23 = vmul.f32 1.442695, %v1059_v6 }
 0x3b6   :  { %v913_v8 = vsel %vm471_vm0, %v4568_v20, 0.0 }
 0x3b7   :  { %914 = vadd.xlane.f32.xlu1 %v913_v8  ;;  %3662 = vpow2.f32 %v911_v21 }
 0x3b8   :  { %3664 = vpow2.f32 %v1061_v23 }
 0x3ba   :  { %v830_v24 = vpop.xlane.xlu0 %829  ;;  %v1058_v30 = vpop.xlane.xlu1 %1057 }
 0x3bb   :  { %v832_v41 = vsub.f32 %v4532_v63, %v830_v24  ;;  %v1060_v63 = vsub.f32 %v4529_v62, %v1058_v30 }
 0x3bd   :  { %v4573_v27 = vpop.eup %3662  ;;  %v835_v28 = vmul.f32 1.442695, %v832_v41  ;;  %v1063_v38 = vmul.f32 1.442695, %v1060_v63 }
 0x3be   :  { %v916_v53 = vsel %vm471_vm0, %v4573_v27, 0.0  ;;  %v4578_v29 = vpop.eup %3664 }
 0x3bf   :  { %917 = vadd.xlane.f32.xlu2 %v916_v53  ;;  %3666 = vpow2.f32 %v835_v28  ;;  %v1065_v49 = vsel %vm471_vm0, %v4578_v29, 0.0 }
 0x3c5   :  { %v4583_v35 = vpop.eup %3666 }
 0x3c6   :  { %v840_v37 = vsel %vm471_vm0, %v4583_v35, 0.0 }
 0x3c7   :  { %1066 = vadd.xlane.f32.xlu2 %v1065_v49 }
 0x3c9   :  { %v979_v33 = vpop.xlane.xlu2 %978 }
 0x3ca   :  { %v983_v34 = vsub.f32 %v4541_v22, %v979_v33 }
 0x3cc   :  { %v985_v36 = vmul.f32 1.442695, %v983_v34 }
 0x3ce   :  { %3668 = vpow2.f32 %v985_v36 }
 0x3cf   :  { %841 = vadd.xlane.f32.xlu2 %v840_v37  ;;  %3670 = vpow2.f32 %v1063_v38 }
 0x3d1   :  { %v982_v43 = vpop.xlane.xlu2 %981 }
 0x3d2   :  { %v984_v44 = vsub.f32 %v4549_v39, %v982_v43 }
 0x3d4   :  { %v4589_v45 = vpop.eup %3668  ;;  %v987_v46 = vmul.f32 1.442695, %v984_v44 }
 0x3d5   :  { %v989_v22 = vsel %vm471_vm0, %v4589_v45, 0.0  ;;  %v4593_v47 = vpop.eup %3670 }
 0x3d6   :  { %3672 = vpow2.f32 %v987_v46  ;;  %990 = vadd.xlane.f32.xlu0 %v989_v22  ;;  %v1068_v56 = vsel %vm471_vm0, %v4593_v47, 0.0 }
 0x3d9   :  { %v827_v62 = vpop.xlane.xlu2 %826 }
 0x3da   :  { %v831_v51 = vsub.f32 %v4556_v54, %v827_v62 }
 0x3dc   :  { %v4596_v55 = vpop.eup %3672  ;;  %v833_v32 = vmul.f32 1.442695, %v831_v51 }
 0x3dd   :  { %v992_v39 = vsel %vm471_vm0, %v4596_v55, 0.0 }
 0x3de   :  { %3674 = vpow2.f32 %v833_v32  ;;  %993 = vadd.xlane.f32.xlu1 %v992_v39  ;;  %1069 = vadd.xlane.f32.xlu0 %v1068_v56 }
 0x3e4   :  { %v4602_v57 = vpop.eup %3674 }
 0x3e5   :  { %v837_v58 = vsel %vm471_vm0, %v4602_v57, 0.0 }
 0x3e6   :  { %838 = vadd.xlane.f32.xlu1 %v837_v58 }
 0x42a   :  { %v915_v59 = vpop.xlane.xlu1 %914 }
 0x42b   :  { %3676 = vrcp.f32 %v915_v59  ;;  %v930_v7 = vand.u32 2147483648, %v915_v59  ;;  %vm924_vm6 = vweird.f32 %v915_v59  ;;  %v928_v10 = vand.u32 2147483647, %v915_v59 }
 0x42d   :  { %v931_v18 = vor.u32 1.1754944e-38, %v930_v7  ;;  %vm929_vm10 = vcmp.eq.f32.partialorder %v928_v10, 8.507059e+37 }
 0x431   :  { %v3677_v54 = vpop.eup %3676 }
 0x432   :  { %v920_v61 = vmul.f32 %v3677_v54, %v915_v59  ;;  %v918_v0 = vpop.xlane.xlu2 %917  ;;  %vm925_vm5 = vweird.f32 %v3677_v54 }
 0x433   :  { %3678 = vrcp.f32 %v918_v0  ;;  %v945_v14 = vand.u32 2147483648, %v918_v0  ;;  %vm926_vm7 = vmor %vm924_vm6, %vm925_vm5  ;;  %v943_v17 = vand.u32 2147483647, %v918_v0  ;;  %vm939_vm9 = vweird.f32 %v918_v0 }
 0x434   :  { %v921_v1 = vsub.f32 1.0, %v920_v61 }
 0x435   :  { %v946_v8 = vor.u32 1.1754944e-38, %v945_v14  ;;  %vm944_vm12 = vcmp.eq.f32.partialorder %v943_v17, 8.507059e+37 }
 0x436   :  { %v922_v2 = vmul.f32 %v3677_v54, %v921_v1 }
 0x438   :  { %v923_v5 = vadd.f32 %v3677_v54, %v922_v2 }
 0x439   :  { %v3679_v3 = vpop.eup %3678 }
 0x43a   :  { %v935_v4 = vmul.f32 %v3679_v3, %v918_v0  ;;  %vm940_vm8 = vweird.f32 %v3679_v3  ;;  %v1067_v15 = vpop.xlane.xlu2 %1066  ;;  %v927_v16 = vsel %vm926_vm7, %v3677_v54, %v923_v5 }
 0x43b   :  { %vm941_vm11 = vmor %vm939_vm9, %vm940_vm8  ;;  %3680 = vrcp.f32 %v1067_v15  ;;  %v932_v21 = vsel %vm929_vm10, %v931_v18, %v927_v16  ;;  %v1080_v44 = vand.u32 2147483647, %v1067_v15  ;;  %v1082_v46 = vand.u32 2147483648, %v1067_v15 }
 0x43c   :  { %v936_v9 = vsub.f32 1.0, %v935_v4  ;;  %v933_v24 = vmul.f32 %v4568_v20, %v932_v21  ;;  %vm1076_vm15 = vweird.f32 %v1067_v15 }
 0x43d   :  { %vm4609_vm1 = vcmp.eq.f32.partialorder %v1080_v44, 8.507059e+37  ;;  %v1083_v59 = vor.u32 1.1754944e-38, %v1082_v46  ;;  %v3450_v46 = vld [vmem:[#allocation14 + $0x20] sm:$0xff] }
 0x43e   :  { %v937_v11 = vmul.f32 %v3679_v3, %v936_v9 }
 0x440   :  { %v938_v19 = vadd.f32 %v3679_v3, %v937_v11 }
 0x441   :  { %v3681_v28 = vpop.eup %3680 }
 0x442   :  { %v942_v6 = vsel %vm941_vm11, %v3679_v3, %v938_v19  ;;  %v1072_v30 = vmul.f32 %v3681_v28, %v1067_v15  ;;  %vm1077_vm14 = vweird.f32 %v3681_v28 }
 0x443   :  { %v947_v23 = vsel %vm944_vm12, %v946_v8, %v942_v6  ;;  %vm4613_vm3 = vmor %vm1076_vm15, %vm1077_vm14 }
 0x444   :  { %v948_v41 = vmul.f32 %v4573_v27, %v947_v23  ;;  %v1073_v34 = vsub.f32 1.0, %v1072_v30 }
 0x446   :  { %v3608_v53 = vpack.i.bf16 %v948_v41, %v933_v24  ;;  %v1074_v43 = vmul.f32 %v3681_v28, %v1073_v34 }
 0x448   :  { %3609 = vrot.lane.b32.xlu0 %v3608_v53, %s4157_s26  ;;  %v1075_v22 = vadd.f32 %v3681_v28, %v1074_v43 }
 0x449   :  { %v991_v49 = vpop.xlane.xlu0 %990 }
 0x44a   :  { %3682 = vrcp.f32 %v991_v49  ;;  %v1004_v54 = vand.u32 2147483647, %v991_v49  ;;  %v1006_v61 = vand.u32 2147483648, %v991_v49  ;;  %vm1000_vm4 = vweird.f32 %v991_v49 }
 0x44b   :  { %v1079_v3 = vsel %vm4613_vm3, %v3681_v28, %v1075_v22 }
 0x44c   :  { %vm1005_vm8 = vcmp.eq.f32.partialorder %v1004_v54, 8.507059e+37  ;;  %v1007_v15 = vor.u32 1.1754944e-38, %v1006_v61  ;;  %v1084_v19 = vsel %vm4609_vm1, %v1083_v59, %v1079_v3 }
 0x44d   :  { %v1085_v41 = vmul.f32 %v4578_v29, %v1084_v19 }
 0x450   :  { %v3683_v33 = vpop.eup %3682 }
 0x451   :  { %v996_v63 = vmul.f32 %v3683_v33, %v991_v49  ;;  %v1070_v36 = vpop.xlane.xlu0 %1069  ;;  %v994_v37 = vpop.xlane.xlu1 %993  ;;  %vm1001_vm2 = vweird.f32 %v3683_v33 }
 0x452   :  { %3684 = vrcp.f32 %v1070_v36  ;;  %v1097_v1 = vand.u32 2147483648, %v1070_v36  ;;  %vm4619_vm5 = vmor %vm1000_vm4, %vm1001_vm2  ;;  %v1095_v7 = vand.u32 2147483647, %v1070_v36  ;;  %v1021_v9 = vand.u32 2147483648, %v994_v37 }
 0x453   :  { %v997_v38 = vsub.f32 1.0, %v996_v63  ;;  %3686 = vrcp.f32 %v994_v37  ;;  %v1019_v11 = vand.u32 2147483647, %v994_v37  ;;  %vm1091_vm9 = vweird.f32 %v1070_v36  ;;  %v842_v63 = vpop.xlane.xlu2 %841 }
 0x454   :  { %v1098_v17 = vor.u32 1.1754944e-38, %v1097_v1  ;;  %vm1015_vm11 = vweird.f32 %v994_v37  ;;  %vm1096_vm12 = vcmp.eq.f32.partialorder %v1095_v7, 8.507059e+37  ;;  %v1022_v21 = vor.u32 1.1754944e-38, %v1021_v9 }
 0x455   :  { %v998_v20 = vmul.f32 %v3683_v33, %v997_v38  ;;  %vm1020_vm15 = vcmp.eq.f32.partialorder %v1019_v11, 8.507059e+37  ;;  %3688 = vrcp.f32 %v842_v63  ;;  %v3452_v38 = vld [vmem:[#allocation14 + $0x30] sm:$0xff]  ;;  %vm863_vm3 = vweird.f32 %v842_v63 }
 0x456   :  { %v867_v58 = vand.u32 2147483647, %v842_v63 }
 0x457   :  { %v999_v39 = vadd.f32 %v3683_v33, %v998_v20 }
 0x458   :  { %v3685_v27 = vpop.eup %3684 }
 0x459   :  { %v3687_v62 = vpop.eup %3686  ;;  %v1087_v51 = vmul.f32 %v3685_v27, %v1070_v36  ;;  %vm1092_vm6 = vweird.f32 %v3685_v27  ;;  %v1003_v14 = vsel %vm4619_vm5, %v3683_v33, %v999_v39  ;;  %v839_v36 = vpop.xlane.xlu1 %838  ;;  %v869_v39 = vand.u32 2147483648, %v842_v63 }
 0x45a   :  { %v1011_v56 = vmul.f32 %v3687_v62, %v994_v37  ;;  %vm1016_vm7 = vweird.f32 %v3687_v62  ;;  %vm1093_vm10 = vmor %vm1091_vm9, %vm1092_vm6  ;;  %v1008_v8 = vsel %vm1005_vm8, %v1007_v15, %v1003_v14  ;;  %3690 = vrcp.f32 %v839_v36 }
 0x45b   :  { %v1088_v0 = vsub.f32 1.0, %v1087_v51  ;;  %vm1017_vm14 = vmor %vm1015_vm11, %vm1016_vm7  ;;  %v1009_v49 = vmul.f32 %v4589_v45, %v1008_v8  ;;  %v3689_v29 = vpop.eup %3688  ;;  %vm848_vm5 = vweird.f32 %v839_v36  ;;  %v852_v59 = vand.u32 2147483647, %v839_v36 }
 0x45c   :  { %v1012_v2 = vsub.f32 1.0, %v1011_v56  ;;  %v859_v45 = vmul.f32 %v3689_v29, %v842_v63  ;;  %vm864_vm1 = vweird.f32 %v3689_v29  ;;  %v854_v56 = vand.u32 2147483648, %v839_v36  ;;  %v3461_v63 = vld [vmem:[#allocation16 + $0x38] sm:$0xff] }
 0x45d   :  { %v1089_v5 = vmul.f32 %v3685_v27, %v1088_v0  ;;  %vm865_vm4 = vmor %vm863_vm3, %vm864_vm1  ;;  %v870_v0 = vor.u32 1.1754944e-38, %v869_v39  ;;  %vm868_vm7 = vcmp.eq.f32.partialorder %v867_v58, 8.507059e+37  ;;  %vm853_vm8 = vcmp.eq.f32.partialorder %v852_v59, 8.507059e+37  ;;  %1366 = vmatpush.bf16.msrb.mxu3 %v3461_v63 }
 0x45e   :  { %v1013_v10 = vmul.f32 %v3687_v62, %v1012_v2  ;;  %v860_v44 = vsub.f32 1.0, %v859_v45  ;;  %v855_v1 = vor.u32 1.1754944e-38, %v854_v56  ;;  %vm1127_vm9 = vcmask 261120   ;;  %v3457_v56 = vld [vmem:[#allocation16 + $0x18] sm:$0xff] }
 0x45f   :  { %v1090_v16 = vadd.f32 %v3685_v27, %v1089_v5  ;;  %vm1146_vm11 = vcmask 523264  }
 0x460   :  { %v1014_v18 = vadd.f32 %v3687_v62, %v1013_v10  ;;  %v3691_v37 = vpop.eup %3690 }
 0x461   :  { %v1094_v6 = vsel %vm1093_vm10, %v3685_v27, %v1090_v16  ;;  %v844_v43 = vmul.f32 %v3691_v37, %v839_v36  ;;  %v861_v27 = vmul.f32 %v3689_v29, %v860_v44  ;;  %vm849_vm2 = vweird.f32 %v3691_v37 }
 0x462   :  { %v1099_v23 = vsel %vm1096_vm12, %v1098_v17, %v1094_v6  ;;  %v1018_v24 = vsel %vm1017_vm14, %v3687_v62, %v1014_v18  ;;  %v3449_v62 = vld [vmem:[#allocation14 + $0x18] sm:$0xff]  ;;  %vm850_vm6 = vmor %vm848_vm5, %vm849_vm2  ;;  %vm1130_vm10 = vcmask 392192  }
 0x463   :  { %v1100_v53 = vmul.f32 %v4593_v47, %v1099_v23  ;;  %v1023_v28 = vsel %vm1020_vm15, %v1022_v21, %v1018_v24  ;;  %v3453_v47 = vld [vmem:[#allocation14 + $0x38] sm:$0xff]  ;;  %v845_v20 = vsub.f32 1.0, %v844_v43  ;;  %v862_v51 = vadd.f32 %v3689_v29, %v861_v27  ;;  %v3448_v24 = vld [vmem:[#allocation14 + $0x10] sm:$0xff]  ;;  %v3459_v43 = vld [vmem:[#allocation16 + $0x28] sm:$0xff] }
 0x464   :  { %v1024_v30 = vmul.f32 %v4596_v55, %v1023_v28  ;;  %1233 = vmatpush.bf16.msrb.mxu2 %v3453_v47  ;;  %v3451_v55 = vld [vmem:[#allocation14 + $0x28] sm:$0xff] }
 0x465   :  { %v3618_v33 = vpack.i.bf16 %v1100_v53, %v1085_v41  ;;  %v846_v22 = vmul.f32 %v3691_v37, %v845_v20  ;;  %v866_v54 = vsel %vm865_vm4, %v3689_v29, %v862_v51  ;;  %v3447_v41 = vld [vmem:[#allocation14 + $0x8] sm:$0xff]  ;;  %v3446_v53 = vld [vmem:[#allocation14] sm:$0xff] }
 0x466   :  { %v3613_v34 = vpack.i.bf16 %v1024_v30, %v1009_v49  ;;  %v871_v3 = vsel %vm868_vm7, %v870_v0, %v866_v54 }
 0x467   :  { %3619 = vrot.lane.b32.xlu2 %v3618_v33, %s4172_s24  ;;  %v847_v32 = vadd.f32 %v3691_v37, %v846_v22  ;;  %v872_v10 = vmul.f32 %v4583_v35, %v871_v3  ;;  %v3458_v22 = vld [vmem:[#allocation16 + $0x20] sm:$0xff]  ;;  %v3455_v3 = vld [vmem:[#allocation16 + $0x8] sm:$0xff] }
 0x468   :  { %3614 = vrot.lane.b32.xlu1 %v3613_v34, %s4173_s25  ;;  %1234 = vmatpush.bf16.msrb.mxu2 %v3452_v38  ;;  %v3644_v34 = vld [vmem:[%s4906_s21] ss:$0 sm:$0xff] }
 0x469   :  { %v851_v61 = vsel %vm850_vm6, %v3691_v37, %v847_v32  ;;  %v3460_v37 = vld [vmem:[#allocation16 + $0x30] sm:$0xff] }
 0x46a   :  { %v856_v4 = vsel %vm853_vm8, %v855_v1, %v851_v61  ;;  %1367 = vmatpush.bf16.msrb.mxu3 %v3460_v37 }
 0x46b   :  { %v857_v11 = vmul.f32 %v4602_v57, %v856_v4 }
 0x46c   :  { %1235 = vmatpush.bf16.msrb.mxu2 %v3451_v55 }
 0x46e   :  { %1368 = vmatpush.bf16.msrb.mxu3 %v3459_v43  ;;  %v3464_v43 = vld [vmem:[#allocation17 + $0x10] sm:$0xff] }
 0x470   :  { %1236 = vmatpush.bf16.msrb.mxu2 %v3450_v46 }
 0x472   :  { %1369 = vmatpush.bf16.msrb.mxu3 %v3458_v22 }
 0x474   :  { %1237 = vmatpush.bf16.msrb.mxu2 %v3449_v62 }
 0x476   :  { %1370 = vmatpush.bf16.msrb.mxu3 %v3457_v56  ;;  %v3492_v56 = vld [vmem:[#allocation13 + $0x70] sm:$0xff] }
 0x478   :  { %1238 = vmatpush.bf16.msrb.mxu2 %v3448_v24  ;;  %v1250_v24 = vld [vmem:[%s4908_s27] sm:$0x1] }
 0x47c   :  { %1239 = vmatpush.bf16.msrb.mxu2 %v3447_v41 }
 0x480   :  { %1240 = vmatpush.bf16.msrb.mxu2 %v3446_v53 }
 0x4ba   :  { %v3610_v2 = vpop.permute.xlu0 %3609 }
 0x4bb   :  { %v3612_v5 = vunpack.i.h.bf16 %v3610_v2  ;;  %v3611_v7 = vunpack.i.l.bf16 %v3610_v2 }
 0x4bd   :  { %v1126_v17 = vsel %vm471_vm0, %v872_v10, %v3612_v5  ;;  %v1125_v18 = vsel %vm471_vm0, %v857_v11, %v3611_v7  ;;  %v3454_v7 = vld [vmem:[#allocation16] sm:$0xff]  ;;  %v3469_v11 = vld [vmem:[#allocation17 + $0x38] sm:$0xff] }
 0x4be   :  { %1451 = vmatpush.bf16.msra.mxu1 %v3469_v11 }
 0x4c1   :  { %v3620_v9 = vpop.permute.xlu2 %3619 }
 0x4c2   :  { %v3622_v19 = vunpack.i.h.bf16 %v3620_v9  ;;  %v3621_v21 = vunpack.i.l.bf16 %v3620_v9 }
 0x4da   :  { %v3615_v14 = vpop.permute.xlu1 %3614 }
 0x4db   :  { %v3617_v15 = vunpack.i.h.bf16 %v3615_v14  ;;  %v3616_v16 = vunpack.i.l.bf16 %v3615_v14  ;;  %v3468_v14 = vld [vmem:[#allocation17 + $0x30] sm:$0xff] }
 0x4dc   :  { %1452 = vmatpush.bf16.msra.mxu1 %v3468_v14 }
 0x4dd   :  { %v1129_v6 = vsel %vm1127_vm9, %v1126_v17, %v3617_v15  ;;  %v1128_v8 = vsel %vm1127_vm9, %v1125_v18, %v3616_v16  ;;  %v3467_v16 = vld [vmem:[#allocation17 + $0x28] sm:$0xff] }
 0x4de   :  { %v1131_v23 = vsel %vm1130_vm10, %v1128_v8, %v3621_v21  ;;  %v1132_v35 = vsel %vm1130_vm10, %v1129_v6, %v3622_v19  ;;  %v3466_v19 = vld [vmem:[#allocation17 + $0x20] sm:$0xff]  ;;  %v1249_v8 = vld [vmem:[%s4907_s0] sm:$0x1] }
 0x4df   :  { %v1141_v57 = vpack.c.bf16 %v1132_v35, %v1131_v23 }
 0x4e0   :  { %1453 = vmatpush.bf16.msra.mxu1 %v3467_v16  ;;  %v3488_v16 = vld [vmem:[#allocation13 + $0x50] sm:$0xff] }
 0x4e1   :  { %3011 = vmatmul.msk.bf16.vlgmr.msrb.gmra.mxu0 %vm1146_vm11, %v1141_v57 }
 0x4e4   :  { %1454 = vmatpush.bf16.msra.mxu1 %v3466_v19 }
 0x55e   :  { %v1159_v28 = vpop.f32.mrf.mxu0 }
 0x566   :  { %v1161_v49 = vpop.f32.mrf.mxu0 }
 0x567   :  { %v1180_v30 = vpack.c.bf16 %v1161_v49, %v1159_v28 }
 0x569   :  { %1241 = vmatmul.bf16.vlgmr.msrb.gmra.mxu2 %v1180_v30 }
 0x5ec   :  { %v1242_v33 = vpop.f32.mrf.mxu2 }
 0x5ed   :  { %v1243_v36 = vadd.f32 %v3644_v34, %v1242_v33 }
 0x5ef   :  { %v1247_v47 = vadd.f32 %v1243_v36, %v4452_v25 }
 0x5f1   :  { %v1259_v55 = vmul.f32 %v1247_v47, %v1247_v47 }
 0x5f4   :  { %v1244_v29 = vpop.f32.mrf.mxu2 }
 0x5f5   :  { %v1245_v38 = vadd.f32 %v3644_v34, %v1244_v29 }
 0x5f7   :  { %v1248_v45 = vadd.f32 %v1245_v38, %v4454_v26  ;;  %v3456_v26 = vld [vmem:[#allocation16 + $0x10] sm:$0xff]  ;;  %v3465_v38 = vld [vmem:[#allocation17 + $0x18] sm:$0xff] }
 0x5f8   :  { %1371 = vmatpush.bf16.msrb.mxu3 %v3456_v26  ;;  %1455 = vmatpush.bf16.msra.mxu1 %v3465_v38  ;;  %v1468_v38 = vld [vmem:[#allocation19] sm:$0x1] }
 0x5f9   :  { %v1251_v44 = vadd.f32 %v1248_v45, %v1247_v47  ;;  %v1260_v20 = vmul.f32 %v1248_v45, %v1248_v45 }
 0x5fb   :  { %v1252_v46 = vrot.slane %v1251_v44, 4  ;;  %v1261_v27 = vadd.f32 %v1260_v20, %v1259_v55  ;;  %v3463_v55 = vld [vmem:[#allocation17 + $0x8] sm:$0xff] }
 0x5fc   :  { %1372 = vmatpush.bf16.msrb.mxu3 %v3455_v3  ;;  %1456 = vmatpush.bf16.msra.mxu1 %v3464_v43 }
 0x5fd   :  { %v1253_v62 = vadd.f32 %v1252_v46, %v1251_v44  ;;  %v1262_v51 = vrot.slane %v1261_v27, 4  ;;  %v3462_v44 = vld [vmem:[#allocation17] sm:$0xff] }
 0x5ff   :  { %v1254_v32 = vrot.slane %v1253_v62, 2  ;;  %v1263_v39 = vadd.f32 %v1262_v51, %v1261_v27  ;;  %v3646_v51 = vld [vmem:[%s4910_s2] ss:$0 sm:$0xff] }
 0x600   :  { %1373 = vmatpush.bf16.msrb.mxu3 %v3454_v7  ;;  %1457 = vmatpush.bf16.msra.mxu1 %v3463_v55 }
 0x601   :  { %v1255_v58 = vadd.f32 %v1254_v32, %v1253_v62  ;;  %v1264_v25 = vrot.slane %v1263_v39, 2  ;;  %v3493_v32 = vld [vmem:[#allocation13 + $0x78] sm:$0xff] }
 0x603   :  { %v1256_v59 = vrot.slane %v1255_v58, 1  ;;  %v1265_v54 = vadd.f32 %v1264_v25, %v1263_v39 }
 0x604   :  { %1458 = vmatpush.bf16.msra.mxu1 %v3462_v44  ;;  %1822 = vmatpush.bf16.msra.mxu3 %v3493_v32  ;;  %v3474_v32 = vld [vmem:[#allocation10 + $0x60] sm:$0xff] }
 0x605   :  { %v1257_v61 = vadd.f32 %v1256_v59, %v1255_v58  ;;  %v1266_v0 = vrot.slane %v1265_v54, 1 }
 0x607   :  { %v1258_v1 = vmul.f32 %v1257_v61, %v4545_v31  ;;  %v1267_v2 = vadd.f32 %v1266_v0, %v1265_v54  ;;  %v3491_v54 = vld [vmem:[#allocation13 + $0x68] sm:$0xff] }
 0x608   :  { %1823 = vmatpush.bf16.msra.mxu3 %v3492_v56  ;;  %v3472_v56 = vld [vmem:[#allocation10 + $0x50] sm:$0xff] }
 0x609   :  { %v1268_v4 = vmul.f32 %v1267_v2, %v4545_v31  ;;  %v1269_v5 = vmul.f32 %v1258_v1, %v1258_v1  ;;  %v3490_v2 = vld [vmem:[#allocation13 + $0x60] sm:$0xff] }
 0x60b   :  { %v1270_v9 = vsub.f32 %v1268_v4, %v1269_v5 }
 0x60c   :  { %1824 = vmatpush.bf16.msra.mxu3 %v3491_v54  ;;  %v3485_v54 = vld [vmem:[#allocation11 + $0x78] sm:$0xff] }
 0x60d   :  { %v1271_v10 = vadd.f32 1e-05, %v1270_v9  ;;  %v3489_v9 = vld [vmem:[#allocation13 + $0x58] sm:$0xff]  ;;  %1688 = vmatpush.bf16.msra.mxu2 %v3485_v54 }
 0x60f   :  { %3692 = vrsqrt.f32 %v1271_v10  ;;  %vm1278_vm14 = vweird.f32 %v1271_v10 }
 0x610   :  { %1825 = vmatpush.bf16.msra.mxu3 %v3490_v2 }
 0x614   :  { %1826 = vmatpush.bf16.msra.mxu3 %v3489_v9 }
 0x615   :  { %v3693_v15 = vpop.eup %3692 }
 0x616   :  { %v1273_v17 = vmul.f32 %v3693_v15, %v1271_v10  ;;  %vm1279_vm12 = vweird.f32 %v3693_v15 }
 0x617   :  { %vm1280_vm15 = vmor %vm1278_vm14, %vm1279_vm12 }
 0x618   :  { %v1274_v18 = vmul.f32 %v3693_v15, %v1273_v17  ;;  %1827 = vmatpush.bf16.msra.mxu3 %v3488_v16 }
 0x61a   :  { %v1275_v21 = vmul.f32 0.5, %v1274_v18 }
 0x61c   :  { %v1276_v6 = vsub.f32 1.5, %v1275_v21 }
 0x61e   :  { %v1277_v23 = vmul.f32 %v3693_v15, %v1276_v6  ;;  %v3487_v6 = vld [vmem:[#allocation13 + $0x48] sm:$0xff] }
 0x61f   :  { %1828 = vmatpush.bf16.msra.mxu3 %v3487_v6 }
 0x620   :  { %v1281_v35 = vsel %vm1280_vm15, %v3693_v15, %v1277_v23 }
 0x621   :  { %v1282_v57 = vmul.f32 %v1281_v35, %v1249_v8 }
 0x623   :  { %v1283_v41 = vmul.f32 %v1282_v57, %v1258_v1  ;;  %v1286_v53 = vperm.slane %v1282_v57, 0 }
 0x625   :  { %v1284_v28 = vsub.f32 %v1250_v24, %v1283_v41  ;;  %v1288_v49 = vmul.f32 %v1286_v53, %v1247_v47  ;;  %v1289_v30 = vmul.f32 %v1286_v53, %v1248_v45  ;;  %v3645_v45 = vld [vmem:[%s4909_s20] ss:$0 sm:$0xff]  ;;  %v3486_v24 = vld [vmem:[#allocation13 + $0x40] sm:$0xff] }
 0x626   :  { %1829 = vmatpush.bf16.msra.mxu3 %v3486_v24  ;;  %v3479_v24 = vld [vmem:[#allocation11 + $0x48] sm:$0xff] }
 0x627   :  { %v1291_v33 = vperm.slane %v1284_v28, 0 }
 0x629   :  { %v1294_v34 = vadd.f32 %v1291_v33, %v1289_v30  ;;  %v1293_v63 = vadd.f32 %v1291_v33, %v1288_v49 }
 0x62b   :  { %v1295_v36 = vadd.f32 %v1293_v63, %v4564_v13  ;;  %v1296_v29 = vadd.f32 %v1294_v34, %v4562_v12  ;;  %v1467_v63 = vld [vmem:[%s4911_s7] sm:$0x1] }
 0x62d   :  { %v1313_v37 = vpack.c.bf16 %v1296_v29, %v1295_v36 }
 0x62f   :  { %1374 = vmatmul.bf16.vlgmr.msrb.gmra.mxu3 %v1313_v37 }
 0x6b2   :  { %v1375_v47 = vpop.f32.mrf.mxu3 }
 0x6b3   :  { %v1376_v20 = vadd.f32 %v3645_v45, %v1375_v47 }
 0x6b5   :  { %v1380_v22 = vmax.f32 %v1376_v20, 0.0 }
 0x6ba   :  { %v1377_v46 = vpop.f32.mrf.mxu3 }
 0x6bb   :  { %v1378_v27 = vadd.f32 %v3645_v45, %v1377_v46 }
 0x6bd   :  { %v1381_v13 = vmax.f32 %v1378_v27, 0.0 }
 0x6bf   :  { %v1398_v62 = vpack.c.bf16 %v1381_v13, %v1380_v22  ;;  %v3477_v22 = vld [vmem:[#allocation10 + $0x78] sm:$0xff] }
 0x6c1   :  { %1459 = vmatmul.bf16.vlgmr.msra.gmra.mxu1 %v1398_v62  ;;  %v3476_v62 = vld [vmem:[#allocation10 + $0x70] sm:$0xff] }
 0x73e   :  { %v1460_v12 = vpop.f32.mrf.mxu1 }
 0x73f   :  { %v1461_v39 = vadd.f32 %v3646_v51, %v1460_v12  ;;  %v3734_v12 = vld [vmem:[#allocation5] sm:$0xff] }
 0x741   :  { %v1465_v25 = vadd.f32 %v1461_v39, %v1295_v36  ;;  %v3473_v39 = vld [vmem:[#allocation10 + $0x58] sm:$0xff] }
 0x743   :  { %v1477_v61 = vmul.f32 %v1465_v25, %v1465_v25 }
 0x746   :  { %v1462_v58 = vpop.f32.mrf.mxu1 }
 0x747   :  { %v1463_v59 = vadd.f32 %v3646_v51, %v1462_v58  ;;  %v3475_v51 = vld [vmem:[#allocation10 + $0x68] sm:$0xff] }
 0x748   :  { %v3471_v58 = vld [vmem:[#allocation10 + $0x48] sm:$0xff] }
 0x749   :  { %v1466_v26 = vadd.f32 %v1463_v59, %v1296_v29 }
 0x74b   :  { %v1469_v0 = vadd.f32 %v1466_v26, %v1465_v25  ;;  %v1478_v1 = vmul.f32 %v1466_v26, %v1466_v26 }
 0x74d   :  { %v1470_v3 = vrot.slane %v1469_v0, 4  ;;  %v1479_v4 = vadd.f32 %v1478_v1, %v1477_v61  ;;  %v3647_v61 = vld [vmem:[%s4894_s5 + $0x1] ss:$0 sm:$0xff] }
 0x74f   :  { %v1471_v5 = vadd.f32 %v1470_v3, %v1469_v0  ;;  %v1480_v7 = vrot.slane %v1479_v4, 4 }
 0x751   :  { %v1472_v10 = vrot.slane %v1471_v5, 2  ;;  %v1481_v11 = vadd.f32 %v1480_v7, %v1479_v4 }
 0x753   :  { %v1473_v14 = vadd.f32 %v1472_v10, %v1471_v5  ;;  %v1482_v15 = vrot.slane %v1481_v11, 2 }
 0x755   :  { %v1474_v17 = vrot.slane %v1473_v14, 1  ;;  %v1483_v18 = vadd.f32 %v1482_v15, %v1481_v11 }
 0x757   :  { %v1475_v19 = vadd.f32 %v1474_v17, %v1473_v14  ;;  %v1484_v21 = vrot.slane %v1483_v18, 1 }
 0x759   :  { %v1476_v8 = vmul.f32 %v1475_v19, %v4545_v31  ;;  %v1485_v23 = vadd.f32 %v1484_v21, %v1483_v18 }
 0x75b   :  { %v1486_v35 = vmul.f32 %v1485_v23, %v4545_v31  ;;  %v1487_v57 = vmul.f32 %v1476_v8, %v1476_v8  ;;  %v3483_v23 = vld [vmem:[#allocation11 + $0x68] sm:$0xff] }
 0x75d   :  { %v1488_v41 = vsub.f32 %v1486_v35, %v1487_v57  ;;  %v3481_v35 = vld [vmem:[#allocation11 + $0x58] sm:$0xff]  ;;  %v3480_v57 = vld [vmem:[#allocation11 + $0x50] sm:$0xff] }
 0x75f   :  { %v1489_v53 = vadd.f32 1e-05, %v1488_v41  ;;  %v3478_v41 = vld [vmem:[#allocation11 + $0x40] sm:$0xff] }
 0x761   :  { %3694 = vrsqrt.f32 %v1489_v53  ;;  %vm1496_vm2 = vweird.f32 %v1489_v53 }
 0x767   :  { %v3695_v28 = vpop.eup %3694 }
 0x768   :  { %v1491_v49 = vmul.f32 %v3695_v28, %v1489_v53  ;;  %vm1497_vm1 = vweird.f32 %v3695_v28 }
 0x769   :  { %vm1498_vm3 = vmor %vm1496_vm2, %vm1497_vm1 }
 0x76a   :  { %v1492_v30 = vmul.f32 %v3695_v28, %v1491_v49 }
 0x76c   :  { %v1493_v33 = vmul.f32 0.5, %v1492_v30 }
 0x76e   :  { %v1494_v34 = vsub.f32 1.5, %v1493_v33 }
 0x770   :  { %v1495_v36 = vmul.f32 %v3695_v28, %v1494_v34 }
 0x772   :  { %v1499_v29 = vsel %vm1498_vm3, %v3695_v28, %v1495_v36 }
 0x773   :  { %v1500_v37 = vmul.f32 %v1499_v29, %v1467_v63 }
 0x775   :  { %v1501_v43 = vmul.f32 %v1500_v37, %v1476_v8  ;;  %v1504_v55 = vperm.slane %v1500_v37, 0  ;;  %v3648_v37 = vld [vmem:[%s4896_s22 + $0x1] ss:$0 sm:$0xff] }
 0x777   :  { %v1502_v44 = vsub.f32 %v1468_v38, %v1501_v43  ;;  %v1506_v47 = vmul.f32 %v1504_v55, %v1465_v25  ;;  %v1507_v45 = vmul.f32 %v1504_v55, %v1466_v26  ;;  %v3470_v25 = vld [vmem:[#allocation10 + $0x40] sm:$0xff] }
 0x779   :  { %v1509_v20 = vperm.slane %v1502_v44, 0 }
 0x77b   :  { %v4656_v46 = vadd.f32 %v1509_v20, %v1506_v47  ;;  %v4658_v27 = vadd.f32 %v1509_v20, %v1507_v45 }
 0x77d   :  { %v1513_v13 = vpack.c.bf16 %v4658_v27, %v4656_v46 }
 0x77f   :  { %1521 = vmatpush.bf16.msra.mxu0 %v1513_v13  ;;  %1830 = vmatmul.bf16.vlgmr.msra.gmra.mxu3 %v1513_v13 }
 0x782   :  { %3108 = vmatmul.msk.bf16.vlgmr.msra.gmra.mxu0 %vm471_vm0, %v3734_v12 }
 0x783   :  { %1601 = vmatpush.bf16.msrb.mxu0 %v3477_v22 }
 0x787   :  { %1602 = vmatpush.bf16.msrb.mxu0 %v3476_v62 }
 0x78b   :  { %1603 = vmatpush.bf16.msrb.mxu0 %v3475_v51 }
 0x78f   :  { %1604 = vmatpush.bf16.msrb.mxu0 %v3474_v32 }
 0x793   :  { %1605 = vmatpush.bf16.msrb.mxu0 %v3473_v39 }
 0x797   :  { %1606 = vmatpush.bf16.msrb.mxu0 %v3472_v56 }
 0x79b   :  { %1607 = vmatpush.bf16.msrb.mxu0 %v3471_v58 }
 0x79f   :  { %1608 = vmatpush.bf16.msrb.mxu0 %v3470_v25 }
 0x7ff   :  { %v1523_v59 = vpop.f32.mrf.mxu0 }
 0x800   :  { %v1528_v1 = vadd.f32 %v1523_v59, %v4656_v46 }
 0x802   :  { %v1831_v26 = vpop.f32.mrf.mxu3 }
 0x803   :  { %v1832_v3 = vadd.f32 %v3647_v61, %v1831_v26  ;;  %v3649_v26 = vld [vmem:[%s4897_s23 + $0x1] ss:$0 sm:$0xff] }
 0x805   :  { %v2176_v10 = vmul.f32 %v4460_v42, %v1832_v3  ;;  %v2174_v16 = vmul.f32 %v4466_v48, %v1832_v3  ;;  %v2172_v19 = vmul.f32 %v4476_v52, %v1832_v3  ;;  %v2170_v6 = vmul.f32 %v4482_v60, %v1832_v3 }
 0x807   :  { %v1525_v0 = vpop.f32.mrf.mxu0 }
 0x808   :  { %v1529_v2 = vadd.f32 %v1525_v0, %v4658_v27 }
 0x80a   :  { %v1547_v4 = vpack.c.bf16 %v1529_v2, %v1528_v1  ;;  %v1833_v5 = vpop.f32.mrf.mxu3 }
 0x80b   :  { %v1834_v7 = vadd.f32 %v3647_v61, %v1833_v5 }
 0x80c   :  { %1609 = vmatmul.bf16.vlgmr.msrb.gmra.mxu0 %v1547_v4 }
 0x80d   :  { %v1836_v9 = vpack.c.bf16 %v1834_v7, %v1832_v3  ;;  %v2177_v11 = vmul.f32 %v4460_v42, %v1834_v7  ;;  %v2175_v15 = vmul.f32 %v4466_v48, %v1834_v7  ;;  %v2173_v18 = vmul.f32 %v4476_v52, %v1834_v7  ;;  %v3484_v48 = vld [vmem:[#allocation11 + $0x70] sm:$0xff]  ;;  %v3482_v52 = vld [vmem:[#allocation11 + $0x60] sm:$0xff] }
 0x80e   :  { %v2171_v21 = vmul.f32 %v4482_v60, %v1834_v7  ;;  %1689 = vmatpush.bf16.msra.mxu2 %v3484_v48 }
 0x80f   :  { %1990 = vrot.lane.b32.xlu2 %v1836_v9, %s4163_s19  ;;  %2066 = vrot.lane.b32.xlu1 %v1836_v9, %s4162_s9  ;;  %v2182_v14 = vpack.c.bf16 %v2177_v11, %v2176_v10  ;;  %v2181_v17 = vpack.c.bf16 %v2175_v15, %v2174_v16  ;;  %v2180_v42 = vpack.c.bf16 %v2173_v18, %v2172_v19 }
 0x810   :  { %1838 = vrot.lane.b32.xlu0 %v1836_v9, %s4164_s28  ;;  %v2179_v8 = vpack.c.bf16 %v2171_v21, %v2170_v6 }
 0x811   :  { %2190 = vmatpush.bf16.msrb.mxu3 %v2182_v14 }
 0x812   :  { %1690 = vmatpush.bf16.msra.mxu2 %v3483_v23 }
 0x815   :  { %2191 = vmatpush.bf16.msrb.mxu3 %v2181_v17 }
 0x816   :  { %1691 = vmatpush.bf16.msra.mxu2 %v3482_v52 }
 0x817   :  { %1988 = vrot.lane.b32.xlu2 %v1836_v9, %s4165_s1  ;;  %2064 = vrot.lane.b32.xlu1 %v1836_v9, %s4168_s18 }
 0x818   :  { %1914 = vrot.lane.b32.xlu0 %v1836_v9, %s4167_s30 }
 0x819   :  { %2192 = vmatpush.bf16.msrb.mxu3 %v2180_v42 }
 0x81a   :  { %1692 = vmatpush.bf16.msra.mxu2 %v3481_v35 }
 0x81d   :  { %2193 = vmatpush.bf16.msrb.mxu3 %v2179_v8 }
 0x81e   :  { %1693 = vmatpush.bf16.msra.mxu2 %v3480_v57 }
 0x820   :  { %1912 = vrot.lane.b32.xlu0 %v1836_v9, %s4166_s10 }
 0x822   :  { %1694 = vmatpush.bf16.msra.mxu2 %v3479_v24 }
 0x826   :  { %1695 = vmatpush.bf16.msra.mxu2 %v3478_v41 }
 0x869   :  { %v1991_v60 = vpop.permute.xlu2 %1990 }
 0x86a   :  { %v1996_v53 = vsel %vm800_vm13, %v1991_v60, 0 }
 0x86b   :  { %2005 = vmatpush.bf16.xpose.msra.mxu0 %v1996_v53 }
 0x871   :  { %v1989_v28 = vpop.permute.xlu2 %1988 }
 0x872   :  { %3212 = vmatmul.msk.bf16.vlgmr.msra.gmra.mxu0 %vm800_vm13, %v1989_v28 }
 0x881   :  { %v2067_v49 = vpop.permute.xlu1 %2066 }
 0x882   :  { %v2072_v30 = vsel %vm800_vm13, %v2067_v49, 0  ;;  %v1839_v33 = vpop.permute.xlu0 %1838 }
 0x883   :  { %v1844_v34 = vsel %vm800_vm13, %v1839_v33, 0  ;;  %2081 = vmatpush.bf16.xpose.msrb.mxu2 %v2072_v30 }
 0x884   :  { %1853 = vmatpush.bf16.xpose.msrb.mxu1 %v1844_v34 }
 0x889   :  { %v1610_v63 = vpop.f32.mrf.mxu0  ;;  %v2065_v22 = vpop.permute.xlu1 %2064 }
 0x88a   :  { %v1915_v36 = vpop.permute.xlu0 %1914  ;;  %v1611_v38 = vadd.f32 %v3648_v37, %v1610_v63 }
 0x88b   :  { %v1920_v29 = vsel %vm800_vm13, %v1915_v36, 0  ;;  %3210 = vmatmul.msk.bf16.vlgmr.msrb.gmra.mxu1 %vm800_vm13, %v1836_v9 }
 0x88c   :  { %1929 = vmatpush.bf16.xpose.msra.mxu1 %v1920_v29  ;;  %v1615_v44 = vmax.f32 %v1611_v38, 0.0 }
 0x891   :  { %v1612_v43 = vpop.f32.mrf.mxu0 }
 0x892   :  { %v1613_v55 = vadd.f32 %v3648_v37, %v1612_v43  ;;  %v1913_v20 = vpop.permute.xlu0 %1912 }
 0x894   :  { %v1616_v47 = vmax.f32 %v1613_v55, 0.0 }
 0x896   :  { %v1634_v45 = vpack.c.bf16 %v1616_v47, %v1615_v44 }
 0x898   :  { %1696 = vmatmul.bf16.vlgmr.msra.gmra.mxu2 %v1634_v45 }
 0x89b   :  { %3211 = vmatmul.msk.bf16.vlgmr.msra.gmra.mxu1 %vm800_vm13, %v1913_v20 }
 0x8a8   :  { %3213 = vmatmul.msk.bf16.vlgmr.msrb.gmra.mxu2 %vm800_vm13, %v2065_v22 }
 0x8ef   :  { %v2007_v13 = vpop.f32.mrf.mxu0 }
 0x8f0   :  { %v2012_v62 = vmul.f32 0.35355338, %v2007_v13 }
 0x8f2   :  { %v4691_v12 = vadd.f32 %v2012_v62, %v4508_v40 }
 0x8f4   :  { %v2016_v51 = vsel %vm471_vm0, %v4691_v12, -inf }
 0x8f5   :  { %2017 = vmax.xlane.f32.xlu2 %v2016_v51 }
 0x8f7   :  { %v2009_v25 = vpop.f32.mrf.mxu0 }
 0x8f8   :  { %v2013_v61 = vmul.f32 0.35355338, %v2009_v25 }
 0x8fa   :  { %v4702_v4 = vadd.f32 %v2013_v61, %v4518_v50 }
 0x8fc   :  { %v2019_v15 = vsel %vm471_vm0, %v4702_v4, -inf }
 0x908   :  { %v1855_v32 = vpop.f32.mrf.mxu1 }
 0x909   :  { %v1860_v11 = vmul.f32 0.35355338, %v1855_v32 }
 0x90b   :  { %v4719_v42 = vadd.f32 %v1860_v11, %v4508_v40 }
 0x90d   :  { %v1864_v35 = vsel %vm471_vm0, %v4719_v42, -inf }
 0x910   :  { %v1857_v39 = vpop.f32.mrf.mxu1 }
 0x911   :  { %v1861_v60 = vmul.f32 0.35355338, %v1857_v39  ;;  %v3175_v39 = vld [vmem:[%s4898_s13 + $0x1] sm:$0x1] }
 0x913   :  { %v4729_v37 = vadd.f32 %v1861_v60, %v4518_v50 }
 0x915   :  { %v1867_v47 = vsel %vm471_vm0, %v4729_v37, -inf }
 0x918   :  { %v1931_v56 = vpop.f32.mrf.mxu1 }
 0x919   :  { %v1936_v58 = vmul.f32 0.35355338, %v1931_v56 }
 0x91b   :  { %v1697_v59 = vpop.f32.mrf.mxu2  ;;  %v4696_v54 = vadd.f32 %v1936_v58, %v4508_v40 }
 0x91c   :  { %v1698_v1 = vadd.f32 %v3649_v26, %v1697_v59  ;;  %v3176_v59 = vld [vmem:[%s4899_s15 + $0x1] sm:$0x1] }
 0x91d   :  { %v1940_v0 = vsel %vm471_vm0, %v4696_v54, -inf }
 0x91e   :  { %1941 = vmax.xlane.f32.xlu1 %v1940_v0  ;;  %v4708_v9 = vadd.f32 %v1698_v1, %v4656_v46 }
 0x920   :  { %v1933_v2 = vpop.f32.mrf.mxu1  ;;  %v1716_v17 = vmul.f32 %v4708_v9, %v4708_v9 }
 0x921   :  { %v1937_v3 = vmul.f32 0.35355338, %v1933_v2 }
 0x923   :  { %v1699_v5 = vpop.f32.mrf.mxu2  ;;  %v4705_v7 = vadd.f32 %v1937_v3, %v4518_v50 }
 0x924   :  { %v1700_v10 = vadd.f32 %v3649_v26, %v1699_v5 }
 0x925   :  { %v1943_v14 = vsel %vm471_vm0, %v4705_v7, -inf }
 0x926   :  { %v1703_v16 = vadd.f32 %v1700_v10, %v4658_v27  ;;  %1944 = vmax.xlane.f32.xlu0 %v1943_v14  ;;  %2020 = vmax.xlane.f32.xlu1 %v2019_v15 }
 0x928   :  { %v1708_v18 = vadd.f32 %v1703_v16, %v4708_v9  ;;  %v1717_v19 = vmul.f32 %v1703_v16, %v1703_v16 }
 0x92a   :  { %v1709_v21 = vrot.slane %v1708_v18, 4  ;;  %v1718_v6 = vadd.f32 %v1717_v19, %v1716_v17 }
 0x92b   :  { %v2083_v8 = vpop.f32.mrf.mxu2 }
 0x92c   :  { %v1710_v48 = vadd.f32 %v1709_v21, %v1708_v18  ;;  %v1719_v23 = vrot.slane %v1718_v6, 4  ;;  %v2088_v52 = vmul.f32 0.35355338, %v2083_v8 }
 0x92e   :  { %v1711_v57 = vrot.slane %v1710_v48, 2  ;;  %v1720_v24 = vadd.f32 %v1719_v23, %v1718_v6  ;;  %1865 = vmax.xlane.f32.xlu1 %v1864_v35  ;;  %v4724_v41 = vadd.f32 %v2088_v52, %v4508_v40 }
 0x930   :  { %v1712_v53 = vadd.f32 %v1711_v57, %v1710_v48  ;;  %v1721_v28 = vrot.slane %v1720_v24, 2  ;;  %v2092_v49 = vsel %vm471_vm0, %v4724_v41, -inf }
 0x931   :  { %2093 = vmax.xlane.f32.xlu0 %v2092_v49 }
 0x932   :  { %v1713_v30 = vrot.slane %v1712_v53, 1  ;;  %v1722_v33 = vadd.f32 %v1721_v28, %v1720_v24 }
 0x933   :  { %v2085_v34 = vpop.f32.mrf.mxu2 }
 0x934   :  { %v1714_v63 = vadd.f32 %v1713_v30, %v1712_v53  ;;  %v1723_v36 = vrot.slane %v1722_v33, 1  ;;  %v2089_v29 = vmul.f32 0.35355338, %v2085_v34 }
 0x936   :  { %v1715_v38 = vmul.f32 %v1714_v63, %v4545_v31  ;;  %v1724_v40 = vadd.f32 %v1723_v36, %v1722_v33  ;;  %v4733_v43 = vadd.f32 %v2089_v29, %v4518_v50 }
 0x938   :  { %v1725_v55 = vmul.f32 %v1724_v40, %v4545_v31  ;;  %v1726_v44 = vmul.f32 %v1715_v38, %v1715_v38  ;;  %v2095_v45 = vsel %vm471_vm0, %v4733_v43, -inf }
 0x939   :  { %1868 = vmax.xlane.f32.xlu0 %v1867_v47  ;;  %2096 = vmax.xlane.f32.xlu2 %v2095_v45 }
 0x93a   :  { %v1727_v20 = vsub.f32 %v1725_v55, %v1726_v44 }
 0x93c   :  { %v1728_v22 = vadd.f32 1e-05, %v1727_v20 }
 0x93e   :  { %3696 = vrsqrt.f32 %v1728_v22  ;;  %vm1735_vm4 = vweird.f32 %v1728_v22 }
 0x944   :  { %v3697_v13 = vpop.eup %3696 }
 0x945   :  { %v1730_v62 = vmul.f32 %v3697_v13, %v1728_v22  ;;  %vm1736_vm13 = vweird.f32 %v3697_v13 }
 0x946   :  { %vm1737_vm5 = vmor %vm1735_vm4, %vm1736_vm13 }
 0x947   :  { %v1731_v50 = vmul.f32 %v3697_v13, %v1730_v62 }
 0x949   :  { %v1732_v51 = vmul.f32 0.5, %v1731_v50 }
 0x94b   :  { %v1733_v32 = vsub.f32 1.5, %v1732_v51 }
 0x94d   :  { %v1734_v56 = vmul.f32 %v3697_v13, %v1733_v32 }
 0x94f   :  { %v1738_v58 = vsel %vm1737_vm5, %v3697_v13, %v1734_v56 }
 0x950   :  { %v1739_v25 = vmul.f32 %v3175_v39, %v1738_v58 }
 0x952   :  { %v1740_v26 = vmul.f32 %v1739_v25, %v1715_v38  ;;  %v1743_v61 = vperm.slane %v1739_v25, 0 }
 0x954   :  { %v1741_v0 = vsub.f32 %v3176_v59, %v1740_v26  ;;  %v1745_v1 = vmul.f32 %v1743_v61, %v4708_v9  ;;  %v1746_v2 = vmul.f32 %v1743_v61, %v1703_v16 }
 0x956   :  { %v1748_v3 = vperm.slane %v1741_v0, 0 }
 0x958   :  { %v4743_v5 = vadd.f32 %v1748_v3, %v1746_v2  ;;  %v4745_v10 = vadd.f32 %v1748_v3, %v1745_v1 }
 0x968   :  { %v2018_v11 = vpop.xlane.xlu2 %2017 }
 0x969   :  { %v2022_v14 = vsub.f32 %v4691_v12, %v2018_v11 }
 0x96b   :  { %v2024_v15 = vmul.f32 1.442695, %v2022_v14 }
 0x96d   :  { %3698 = vpow2.f32 %v2024_v15 }
 0x973   :  { %v4748_v17 = vpop.eup %3698 }
 0x974   :  { %v2028_v18 = vsel %vm471_vm0, %v4748_v17, 0.0 }
 0x975   :  { %2029 = vadd.xlane.f32.xlu0 %v2028_v18 }
 0x991   :  { %v1942_v19 = vpop.xlane.xlu1 %1941 }
 0x992   :  { %v1946_v9 = vsub.f32 %v4696_v54, %v1942_v19 }
 0x994   :  { %v1948_v16 = vmul.f32 1.442695, %v1946_v9 }
 0x996   :  { %3700 = vpow2.f32 %v1948_v16 }
 0x999   :  { %v1945_v21 = vpop.xlane.xlu0 %1944  ;;  %v2021_v6 = vpop.xlane.xlu1 %2020 }
 0x99a   :  { %v1947_v8 = vsub.f32 %v4705_v7, %v1945_v21  ;;  %v2023_v48 = vsub.f32 %v4702_v4, %v2021_v6 }
 0x99c   :  { %v4755_v12 = vpop.eup %3700  ;;  %v1950_v23 = vmul.f32 1.442695, %v1947_v8  ;;  %v2026_v52 = vmul.f32 1.442695, %v2023_v48 }
 0x99d   :  { %v1952_v35 = vsel %vm471_vm0, %v4755_v12, 0.0 }
 0x99e   :  { %3702 = vpow2.f32 %v1950_v23  ;;  %1953 = vadd.xlane.f32.xlu2 %v1952_v35 }
 0x99f   :  { %3704 = vpow2.f32 %v2026_v52 }
 0x9a1   :  { %v1866_v57 = vpop.xlane.xlu1 %1865 }
 0x9a2   :  { %v1870_v54 = vsub.f32 %v4719_v42, %v1866_v57 }
 0x9a4   :  { %v4760_v24 = vpop.eup %3702  ;;  %v1872_v60 = vmul.f32 1.442695, %v1870_v54  ;;  %v2094_v53 = vpop.xlane.xlu0 %2093  ;;  %v3498_v54 = vld [vmem:[#allocation14 + $0x60] sm:$0xff] }
 0x9a5   :  { %v4762_v7 = vpop.eup %3704  ;;  %v2098_v4 = vsub.f32 %v4724_v41, %v2094_v53  ;;  %v1955_v28 = vsel %vm471_vm0, %v4760_v24, 0.0 }
 0x9a6   :  { %3706 = vpow2.f32 %v1872_v60  ;;  %1956 = vadd.xlane.f32.xlu1 %v1955_v28  ;;  %v2031_v49 = vsel %vm471_vm0, %v4762_v7, 0.0 }
 0x9a7   :  { %v2100_v30 = vmul.f32 1.442695, %v2098_v4  ;;  %2032 = vadd.xlane.f32.xlu2 %v2031_v49 }
 0x9a9   :  { %3708 = vpow2.f32 %v2100_v30 }
 0x9ac   :  { %v4769_v42 = vpop.eup %3706  ;;  %v1869_v33 = vpop.xlane.xlu0 %1868 }
 0x9ad   :  { %v2097_v34 = vpop.xlane.xlu2 %2096  ;;  %v1871_v63 = vsub.f32 %v4729_v37, %v1869_v33  ;;  %v1876_v41 = vsel %vm471_vm0, %v4769_v42, 0.0 }
 0x9ae   :  { %v2099_v36 = vsub.f32 %v4733_v43, %v2097_v34 }
 0x9af   :  { %v4775_v29 = vpop.eup %3708  ;;  %v1874_v38 = vmul.f32 1.442695, %v1871_v63  ;;  %1877 = vadd.xlane.f32.xlu2 %v1876_v41 }
 0x9b0   :  { %v2102_v40 = vmul.f32 1.442695, %v2099_v36  ;;  %v2104_v55 = vsel %vm471_vm0, %v4775_v29, 0.0 }
 0x9b1   :  { %3710 = vpow2.f32 %v1874_v38  ;;  %2105 = vadd.xlane.f32.xlu1 %v2104_v55 }
 0x9b2   :  { %3712 = vpow2.f32 %v2102_v40 }
 0x9b7   :  { %v4779_v44 = vpop.eup %3710 }
 0x9b8   :  { %v4781_v47 = vpop.eup %3712  ;;  %v1879_v37 = vsel %vm471_vm0, %v4779_v44, 0.0 }
 0x9b9   :  { %1880 = vadd.xlane.f32.xlu1 %v1879_v37  ;;  %v2107_v43 = vsel %vm471_vm0, %v4781_v47, 0.0 }
 0x9ba   :  { %2108 = vadd.xlane.f32.xlu0 %v2107_v43 }
 0x9e8   :  { %v2030_v45 = vpop.xlane.xlu0 %2029 }
 0x9e9   :  { %3714 = vrcp.f32 %v2030_v45  ;;  %v2043_v25 = vand.u32 2147483647, %v2030_v45  ;;  %vm2039_vm6 = vweird.f32 %v2030_v45  ;;  %v2045_v0 = vand.u32 2147483648, %v2030_v45 }
 0x9eb   :  { %vm4793_vm8 = vcmp.eq.f32.partialorder %v2043_v25, 8.507059e+37  ;;  %v2046_v57 = vor.u32 1.1754944e-38, %v2045_v0 }
 0x9ef   :  { %v4787_v22 = vpop.eup %3714 }
 0x9f0   :  { %v2035_v13 = vmul.f32 %v4787_v22, %v2030_v45  ;;  %vm2040_vm7 = vweird.f32 %v4787_v22 }
 0x9f1   :  { %vm4803_vm1 = vmor %vm2039_vm6, %vm2040_vm7 }
 0x9f2   :  { %v2036_v32 = vsub.f32 1.0, %v2035_v13 }
 0x9f4   :  { %v2037_v58 = vmul.f32 %v4787_v22, %v2036_v32 }
 0x9f6   :  { %v2038_v2 = vadd.f32 %v4787_v22, %v2037_v58 }
 0x9f8   :  { %v2042_v53 = vsel %vm4803_vm1, %v4787_v22, %v2038_v2 }
 0x9f9   :  { %v2047_v40 = vsel %vm4793_vm8, %v2046_v57, %v2042_v53 }
 0xa11   :  { %v1954_v20 = vpop.xlane.xlu2 %1953 }
 0xa12   :  { %3716 = vrcp.f32 %v1954_v20  ;;  %vm1963_vm12 = vweird.f32 %v1954_v20  ;;  %v1969_v14 = vand.u32 2147483648, %v1954_v20  ;;  %v1967_v35 = vand.u32 2147483647, %v1954_v20 }
 0xa14   :  { %v1970_v33 = vor.u32 1.1754944e-38, %v1969_v14 }
 0xa18   :  { %v3717_v62 = vpop.eup %3716 }
 0xa19   :  { %v1959_v50 = vmul.f32 %v3717_v62, %v1954_v20  ;;  %v1957_v51 = vpop.xlane.xlu1 %1956  ;;  %vm1964_vm14 = vweird.f32 %v3717_v62 }
 0xa1a   :  { %3718 = vrcp.f32 %v1957_v51  ;;  %v2033_v39 = vpop.xlane.xlu2 %2032  ;;  %v1984_v18 = vand.u32 2147483648, %v1957_v51  ;;  %v1982_v21 = vand.u32 2147483647, %v1957_v51  ;;  %vm1978_vm3 = vweird.f32 %v1957_v51  ;;  %vm4809_vm13 = vmor %vm1963_vm12, %vm1964_vm14 }
 0xa1b   :  { %3720 = vrcp.f32 %v2033_v39  ;;  %v1960_v56 = vsub.f32 1.0, %v1959_v50  ;;  %v2060_v8 = vand.u32 2147483648, %v2033_v39  ;;  %v2058_v52 = vand.u32 2147483647, %v2033_v39 }
 0xa1c   :  { %vm2054_vm4 = vweird.f32 %v2033_v39  ;;  %v1985_v49 = vor.u32 1.1754944e-38, %v1984_v18  ;;  %vm1983_vm7 = vcmp.eq.f32.partialorder %v1982_v21, 8.507059e+37  ;;  %vm1968_vm14 = vcmp.eq.f32.partialorder %v1967_v35, 8.507059e+37 }
 0xa1d   :  { %v1961_v26 = vmul.f32 %v3717_v62, %v1960_v56  ;;  %v2061_v30 = vor.u32 1.1754944e-38, %v2060_v8  ;;  %vm2059_vm12 = vcmp.eq.f32.partialorder %v2058_v52, 8.507059e+37 }
 0xa1f   :  { %v1962_v16 = vadd.f32 %v3717_v62, %v1961_v26 }
 0xa20   :  { %v3719_v59 = vpop.eup %3718 }
 0xa21   :  { %v3721_v61 = vpop.eup %3720  ;;  %v1974_v1 = vmul.f32 %v3719_v59, %v1957_v51  ;;  %vm1979_vm15 = vweird.f32 %v3719_v59  ;;  %v1966_v28 = vsel %vm4809_vm13, %v3717_v62, %v1962_v16  ;;  %v2048_v62 = vmul.f32 %v4748_v17, %v2047_v40 }
 0xa22   :  { %v2050_v11 = vmul.f32 %v3721_v61, %v2033_v39  ;;  %vm2055_vm2 = vweird.f32 %v3721_v61  ;;  %vm1980_vm5 = vmor %vm1978_vm3, %vm1979_vm15  ;;  %v1971_v38 = vsel %vm1968_vm14, %v1970_v33, %v1966_v28 }
 0xa23   :  { %v1975_v15 = vsub.f32 1.0, %v1974_v1  ;;  %vm2056_vm6 = vmor %vm2054_vm4, %vm2055_vm2  ;;  %v1972_v13 = vmul.f32 %v4755_v12, %v1971_v38 }
 0xa24   :  { %v2051_v19 = vsub.f32 1.0, %v2050_v11  ;;  %v4797_v9 = vpop.xlane.xlu1 %2105 }
 0xa25   :  { %v1976_v6 = vmul.f32 %v3719_v59, %v1975_v15  ;;  %3722 = vrcp.f32 %v4797_v9  ;;  %vm2115_vm15 = vweird.f32 %v4797_v9  ;;  %v2119_v58 = vand.u32 2147483647, %v4797_v9 }
 0xa26   :  { %v2052_v23 = vmul.f32 %v3721_v61, %v2051_v19  ;;  %v1878_v19 = vpop.xlane.xlu2 %1877 }
 0xa27   :  { %v1977_v60 = vadd.f32 %v3719_v59, %v1976_v6  ;;  %vm2120_vm3 = vcmp.eq.f32.partialorder %v2119_v58, 8.507059e+37  ;;  %v3501_v6 = vld [vmem:[#allocation14 + $0x78] sm:$0xff] }
 0xa28   :  { %v2053_v4 = vadd.f32 %v3721_v61, %v2052_v23  ;;  %2271 = vmatpush.bf16.msrb.mxu1 %v3501_v6  ;;  %v3500_v23 = vld [vmem:[#allocation14 + $0x70] sm:$0xff]  ;;  %v3507_v6 = vld [vmem:[#allocation16 + $0x68] sm:$0xff] }
 0xa29   :  { %v1981_v34 = vsel %vm1980_vm5, %v3719_v59, %v1977_v60 }
 0xa2a   :  { %v1986_v63 = vsel %vm1983_vm7, %v1985_v49, %v1981_v34  ;;  %v2057_v36 = vsel %vm2056_vm6, %v3721_v61, %v2053_v4  ;;  %v1893_v4 = vand.u32 2147483648, %v1878_v19  ;;  %v3497_v49 = vld [vmem:[#allocation14 + $0x58] sm:$0xff] }
 0xa2b   :  { %v3723_v41 = vpop.eup %3722  ;;  %v2062_v55 = vsel %vm2059_vm12, %v2061_v30, %v2057_v36  ;;  %v1987_v43 = vmul.f32 %v4760_v24, %v1986_v63  ;;  %vm1887_vm12 = vweird.f32 %v1878_v19  ;;  %v1891_v30 = vand.u32 2147483647, %v1878_v19 }
 0xa2c   :  { %v2111_v37 = vmul.f32 %v3723_v41, %v4797_v9  ;;  %v2063_v45 = vmul.f32 %v4762_v7, %v2062_v55  ;;  %vm2116_vm8 = vweird.f32 %v3723_v41  ;;  %v2121_v7 = vand.u32 2147483648, %v4797_v9  ;;  %v1881_v9 = vpop.xlane.xlu1 %1880  ;;  %2272 = vmatpush.bf16.msrb.mxu1 %v3500_v23 }
 0xa2d   :  { %v2109_v20 = vpop.xlane.xlu0 %2108  ;;  %v3623_v50 = vpack.i.bf16 %v1987_v43, %v1972_v13  ;;  %vm2117_vm1 = vmor %vm2115_vm15, %vm2116_vm8  ;;  %v1908_v28 = vand.u32 2147483648, %v1881_v9  ;;  %vm1902_vm8 = vweird.f32 %v1881_v9  ;;  %v1906_v33 = vand.u32 2147483647, %v1881_v9 }
 0xa2e   :  { %v2112_v22 = vsub.f32 1.0, %v2111_v37  ;;  %3724 = vrcp.f32 %v2109_v20  ;;  %v3628_v51 = vpack.i.bf16 %v2063_v45, %v2048_v62  ;;  %v2136_v17 = vand.u32 2147483648, %v2109_v20 }
 0xa2f   :  { %3624 = vrot.lane.b32.xlu0 %v3623_v50, %s4157_s26  ;;  %v2134_v59 = vand.u32 2147483647, %v2109_v20  ;;  %v2122_v61 = vor.u32 1.1754944e-38, %v2121_v7  ;;  %vm2130_vm13 = vweird.f32 %v2109_v20  ;;  %3726 = vrcp.f32 %v1878_v19  ;;  %s4918_s26 = sld [smem:[#allocation47_spill]] }
 0xa30   :  { %v2113_v32 = vmul.f32 %v3723_v41, %v2112_v22  ;;  %3629 = vrot.lane.b32.xlu2 %v3628_v51, %s4173_s25  ;;  %v2137_v1 = vor.u32 1.1754944e-38, %v2136_v17  ;;  %3728 = vrcp.f32 %v1881_v9  ;;  %v1894_v36 = vor.u32 1.1754944e-38, %v1893_v4  ;;  %v3495_v17 = vld [vmem:[#allocation14 + $0x48] sm:$0xff] }
 0xa31   :  { %vm2135_vm5 = vcmp.eq.f32.partialorder %v2134_v59, 8.507059e+37 }
 0xa32   :  { %v2114_v56 = vadd.f32 %v3723_v41, %v2113_v32 }
 0xa34   :  { %v3725_v39 = vpop.eup %3724  ;;  %v2118_v26 = vsel %vm2117_vm1, %v3723_v41, %v2114_v56  ;;  %v1909_v41 = vor.u32 1.1754944e-38, %v1908_v28  ;;  %vm1892_vm1 = vcmp.eq.f32.partialorder %v1891_v30, 8.507059e+37  ;;  %v3504_v28 = vld [vmem:[#allocation16 + $0x50] sm:$0xff] }
 0xa35   :  { %v2126_v24 = vmul.f32 %v3725_v39, %v2109_v20  ;;  %vm2131_vm2 = vweird.f32 %v3725_v39  ;;  %v2123_v2 = vsel %vm2120_vm3, %v2122_v61, %v2118_v26  ;;  %v3727_v16 = vpop.eup %3726 }
 0xa36   :  { %vm2132_vm4 = vmor %vm2130_vm13, %vm2131_vm2  ;;  %v2124_v14 = vmul.f32 %v4775_v29, %v2123_v2  ;;  %v3729_v21 = vpop.eup %3728  ;;  %v1883_v8 = vmul.f32 %v3727_v16, %v1878_v19  ;;  %v3499_v29 = vld [vmem:[#allocation14 + $0x68] sm:$0xff]  ;;  %vm1888_vm6 = vweird.f32 %v3727_v16  ;;  %vm1907_vm2 = vcmp.eq.f32.partialorder %v1906_v33, 8.507059e+37 }
 0xa37   :  { %v2127_v12 = vsub.f32 1.0, %v2126_v24  ;;  %v1898_v48 = vmul.f32 %v3729_v21, %v1881_v9  ;;  %2273 = vmatpush.bf16.msrb.mxu1 %v3499_v29  ;;  %vm1903_vm7 = vweird.f32 %v3729_v21  ;;  %vm1889_vm14 = vmor %vm1887_vm12, %vm1888_vm6 }
 0xa38   :  { %v1884_v52 = vsub.f32 1.0, %v1883_v8  ;;  %vm1904_vm15 = vmor %vm1902_vm8, %vm1903_vm7 }
 0xa39   :  { %v2128_v25 = vmul.f32 %v3725_v39, %v2127_v12  ;;  %v1899_v35 = vsub.f32 1.0, %v1898_v48 }
 0xa3a   :  { %v1885_v57 = vmul.f32 %v3727_v16, %v1884_v52 }
 0xa3b   :  { %v2129_v0 = vadd.f32 %v3725_v39, %v2128_v25  ;;  %2274 = vmatpush.bf16.msrb.mxu1 %v3498_v54  ;;  %v3494_v25 = vld [vmem:[#allocation14 + $0x40] sm:$0xff] }
 0xa3c   :  { %v1886_v60 = vadd.f32 %v3727_v16, %v1885_v57 }
 0xa3d   :  { %v2133_v3 = vsel %vm2132_vm4, %v3725_v39, %v2129_v0 }
 0xa3e   :  { %v2138_v11 = vsel %vm2135_vm5, %v2137_v1, %v2133_v3  ;;  %v1890_v34 = vsel %vm1889_vm14, %v3727_v16, %v1886_v60  ;;  %v3650_v1 = vld [vmem:[%s4906_s21 + $0x1] ss:$0 sm:$0xff]  ;;  %v3509_v3 = vld [vmem:[#allocation16 + $0x78] sm:$0xff] }
 0xa3f   :  { %v2139_v15 = vmul.f32 %v4781_v47, %v2138_v11  ;;  %v1900_v47 = vmul.f32 %v3729_v21, %v1899_v35  ;;  %2275 = vmatpush.bf16.msrb.mxu1 %v3497_v49  ;;  %v1895_v55 = vsel %vm1892_vm1, %v1894_v36, %v1890_v34  ;;  %2408 = vmatpush.bf16.msrb.mxu0 %v3509_v3  ;;  %v3506_v35 = vld [vmem:[#allocation16 + $0x60] sm:$0xff] }
 0xa40   :  { %v1896_v22 = vmul.f32 %v4769_v42, %v1895_v55  ;;  %v3496_v42 = vld [vmem:[#allocation14 + $0x50] sm:$0xff]  ;;  %v3510_v3 = vld [vmem:[#allocation17 + $0x40] sm:$0xff] }
 0xa41   :  { %v3633_v18 = vpack.i.bf16 %v2139_v15, %v2124_v14  ;;  %v1901_v53 = vadd.f32 %v3729_v21, %v1900_v47  ;;  %v3516_v55 = vld [vmem:[#allocation17 + $0x70] sm:$0xff] }
 0xa43   :  { %3634 = vrot.lane.b32.xlu1 %v3633_v18, %s4172_s24  ;;  %v1905_v63 = vsel %vm1904_vm15, %v3729_v21, %v1901_v53  ;;  %2276 = vmatpush.bf16.msrb.mxu1 %v3496_v42  ;;  %v3508_v18 = vld [vmem:[#allocation16 + $0x70] sm:$0xff] }
 0xa44   :  { %v1910_v40 = vsel %vm1907_vm2, %v1909_v41, %v1905_v63  ;;  %2409 = vmatpush.bf16.msrb.mxu0 %v3508_v18  ;;  %v3503_v63 = vld [vmem:[#allocation16 + $0x48] sm:$0xff]  ;;  %v3502_v41 = vld [vmem:[#allocation16 + $0x40] sm:$0xff] }
 0xa45   :  { %v1911_v20 = vmul.f32 %v4779_v44, %v1910_v40  ;;  %v3517_v40 = vld [vmem:[#allocation17 + $0x78] sm:$0xff] }
 0xa46   :  { %2495 = vmatpush.bf16.msra.mxu2 %v3517_v40 }
 0xa47   :  { %2277 = vmatpush.bf16.msrb.mxu1 %v3495_v17 }
 0xa48   :  { %2410 = vmatpush.bf16.msrb.mxu0 %v3507_v6  ;;  %v3525_v6 = vld [vmem:[#allocation20 + $0x38] sm:$0xff] }
 0xa49   :  { %2628 = vmatpush.bf16.msra.mxu3 %v3525_v6  ;;  %v3538_v6 = vld [vmem:[#allocation23 + $0x20] sm:$0xff] }
 0xa4a   :  { %2496 = vmatpush.bf16.msra.mxu2 %v3516_v55 }
 0xa4b   :  { %2278 = vmatpush.bf16.msrb.mxu1 %v3494_v25 }
 0xa4c   :  { %2411 = vmatpush.bf16.msrb.mxu0 %v3506_v35 }
 0xa8a   :  { %v3630_v45 = vpop.permute.xlu2 %3629 }
 0xa8b   :  { %v3632_v50 = vunpack.i.h.bf16 %v3630_v45  ;;  %v3631_v51 = vunpack.i.l.bf16 %v3630_v45 }
 0xaa1   :  { %v3625_v38 = vpop.permute.xlu0 %3624 }
 0xaa2   :  { %v3627_v37 = vunpack.i.h.bf16 %v3625_v38  ;;  %v3626_v43 = vunpack.i.l.bf16 %v3625_v38 }
 0xaa4   :  { %v2165_v13 = vsel %vm471_vm0, %v1911_v20, %v3627_v37  ;;  %v2164_v62 = vsel %vm471_vm0, %v1896_v22, %v3626_v43  ;;  %v3515_v43 = vld [vmem:[#allocation17 + $0x68] sm:$0xff]  ;;  %v3514_v22 = vld [vmem:[#allocation17 + $0x60] sm:$0xff] }
 0xaa5   :  { %v2166_v24 = vsel %vm1127_vm9, %v2164_v62, %v3631_v51  ;;  %v2167_v7 = vsel %vm1127_vm9, %v2165_v13, %v3632_v50  ;;  %2497 = vmatpush.bf16.msra.mxu2 %v3515_v43  ;;  %v3248_v50 = vld [vmem:[%s4907_s0 + $0x1] sm:$0x1] }
 0xaa9   :  { %2498 = vmatpush.bf16.msra.mxu2 %v3514_v22 }
 0xab5   :  { %v3635_v32 = vpop.permute.xlu1 %3634 }
 0xab6   :  { %v3637_v39 = vunpack.i.h.bf16 %v3635_v32  ;;  %v3636_v56 = vunpack.i.l.bf16 %v3635_v32 }
 0xab8   :  { %v2168_v58 = vsel %vm1130_vm10, %v2166_v24, %v3636_v56  ;;  %v2169_v44 = vsel %vm1130_vm10, %v2167_v7, %v3637_v39  ;;  %v3249_v56 = vld [vmem:[%s4908_s27 + $0x1] sm:$0x1] }
 0xab9   :  { %v2178_v12 = vpack.c.bf16 %v2169_v44, %v2168_v58 }
 0xabb   :  { %3214 = vmatmul.msk.bf16.vlgmr.msrb.gmra.mxu3 %vm1146_vm11, %v2178_v12 }
 0xb3e   :  { %v2195_v59 = vpop.f32.mrf.mxu3 }
 0xb46   :  { %v2197_v26 = vpop.f32.mrf.mxu3 }
 0xb47   :  { %v2217_v61 = vpack.c.bf16 %v2197_v26, %v2195_v59 }
 0xb49   :  { %2279 = vmatmul.bf16.vlgmr.msrb.gmra.mxu1 %v2217_v61 }
 0xbc6   :  { %v2280_v0 = vpop.f32.mrf.mxu1 }
 0xbc7   :  { %v2281_v2 = vadd.f32 %v3650_v1, %v2280_v0  ;;  %v3513_v0 = vld [vmem:[#allocation17 + $0x58] sm:$0xff] }
 0xbc8   :  { %2499 = vmatpush.bf16.msra.mxu2 %v3513_v0 }
 0xbc9   :  { %v4844_v14 = vadd.f32 %v2281_v2, %v4656_v46  ;;  %v3511_v2 = vld [vmem:[#allocation17 + $0x48] sm:$0xff] }
 0xbcb   :  { %v2299_v9 = vmul.f32 %v4844_v14, %v4844_v14 }
 0xbce   :  { %v2282_v11 = vpop.f32.mrf.mxu1 }
 0xbcf   :  { %v2283_v15 = vadd.f32 %v3650_v1, %v2282_v11  ;;  %v3512_v1 = vld [vmem:[#allocation17 + $0x50] sm:$0xff] }
 0xbd0   :  { %2500 = vmatpush.bf16.msra.mxu2 %v3512_v1 }
 0xbd1   :  { %v2286_v19 = vadd.f32 %v2283_v15, %v4658_v27  ;;  %v3505_v27 = vld [vmem:[#allocation16 + $0x58] sm:$0xff] }
 0xbd2   :  { %2412 = vmatpush.bf16.msrb.mxu0 %v3505_v27 }
 0xbd3   :  { %v2291_v16 = vadd.f32 %v2286_v19, %v4844_v14  ;;  %v2300_v21 = vmul.f32 %v2286_v19, %v2286_v19 }
 0xbd4   :  { %2501 = vmatpush.bf16.msra.mxu2 %v3511_v2 }
 0xbd5   :  { %v2292_v8 = vrot.slane %v2291_v16, 4  ;;  %v2301_v48 = vadd.f32 %v2300_v21, %v2299_v9  ;;  %v3652_v21 = vld [vmem:[%s4910_s2 + $0x1] ss:$0 sm:$0xff] }
 0xbd6   :  { %2413 = vmatpush.bf16.msrb.mxu0 %v3504_v28 }
 0xbd7   :  { %v2293_v23 = vadd.f32 %v2292_v8, %v2291_v16  ;;  %v2302_v52 = vrot.slane %v2301_v48, 4 }
 0xbd8   :  { %2502 = vmatpush.bf16.msra.mxu2 %v3510_v3 }
 0xbd9   :  { %v2294_v46 = vrot.slane %v2293_v23, 2  ;;  %v2303_v29 = vadd.f32 %v2302_v52, %v2301_v48  ;;  %v3524_v48 = vld [vmem:[#allocation20 + $0x30] sm:$0xff] }
 0xbda   :  { %2414 = vmatpush.bf16.msrb.mxu0 %v3503_v63  ;;  %2629 = vmatpush.bf16.msra.mxu3 %v3524_v48  ;;  %v3653_v48 = vld [vmem:[%s4918_s26] ss:$0 sm:$0xff] }
 0xbdb   :  { %v2295_v57 = vadd.f32 %v2294_v46, %v2293_v23  ;;  %v2304_v47 = vrot.slane %v2303_v29, 2 }
 0xbdd   :  { %v2296_v54 = vrot.slane %v2295_v57, 1  ;;  %v2305_v60 = vadd.f32 %v2304_v47, %v2303_v29  ;;  %v3523_v29 = vld [vmem:[#allocation20 + $0x28] sm:$0xff] }
 0xbde   :  { %2415 = vmatpush.bf16.msrb.mxu0 %v3502_v41  ;;  %2630 = vmatpush.bf16.msra.mxu3 %v3523_v29 }
 0xbdf   :  { %v2297_v53 = vadd.f32 %v2296_v54, %v2295_v57  ;;  %v2306_v4 = vrot.slane %v2305_v60, 1 }
 0xbe1   :  { %v2298_v49 = vmul.f32 %v2297_v53, %v4545_v31  ;;  %v2307_v30 = vadd.f32 %v2306_v4, %v2305_v60  ;;  %v3522_v53 = vld [vmem:[#allocation20 + $0x20] sm:$0xff] }
 0xbe2   :  { %2631 = vmatpush.bf16.msra.mxu3 %v3522_v53 }
 0xbe3   :  { %v2308_v33 = vmul.f32 %v2307_v30, %v4545_v31  ;;  %v2309_v34 = vmul.f32 %v2298_v49, %v2298_v49 }
 0xbe5   :  { %v2310_v36 = vsub.f32 %v2308_v33, %v2309_v34  ;;  %v3521_v33 = vld [vmem:[#allocation20 + $0x18] sm:$0xff] }
 0xbe6   :  { %2632 = vmatpush.bf16.msra.mxu3 %v3521_v33 }
 0xbe7   :  { %v2311_v38 = vadd.f32 1e-05, %v2310_v36 }
 0xbe9   :  { %3730 = vrsqrt.f32 %v2311_v38  ;;  %vm2318_vm9 = vweird.f32 %v2311_v38 }
 0xbef   :  { %v3731_v37 = vpop.eup %3730 }
 0xbf0   :  { %v2313_v45 = vmul.f32 %v3731_v37, %v2311_v38  ;;  %vm2319_vm0 = vweird.f32 %v3731_v37  ;;  %v3520_v38 = vld [vmem:[#allocation20 + $0x10] sm:$0xff] }
 0xbf1   :  { %vm2320_vm10 = vmor %vm2318_vm9, %vm2319_vm0  ;;  %2633 = vmatpush.bf16.msra.mxu3 %v3520_v38 }
 0xbf2   :  { %v2314_v20 = vmul.f32 %v3731_v37, %v2313_v45  ;;  %v3519_v45 = vld [vmem:[#allocation20 + $0x8] sm:$0xff] }
 0xbf4   :  { %v2315_v13 = vmul.f32 0.5, %v2314_v20 }
 0xbf5   :  { %2634 = vmatpush.bf16.msra.mxu3 %v3519_v45 }
 0xbf6   :  { %v2316_v62 = vsub.f32 1.5, %v2315_v13  ;;  %v3518_v13 = vld [vmem:[#allocation20] sm:$0xff] }
 0xbf8   :  { %v2317_v51 = vmul.f32 %v3731_v37, %v2316_v62 }
 0xbf9   :  { %2635 = vmatpush.bf16.msra.mxu3 %v3518_v13 }
 0xbfa   :  { %v2321_v32 = vsel %vm2320_vm10, %v3731_v37, %v2317_v51  ;;  %v3533_v51 = vld [vmem:[#allocation22 + $0x38] sm:$0xff] }
 0xbfb   :  { %v2322_v39 = vmul.f32 %v3248_v50, %v2321_v32  ;;  %2713 = vmatpush.bf16.msra.mxu1 %v3533_v51  ;;  %v3532_v32 = vld [vmem:[#allocation22 + $0x30] sm:$0xff] }
 0xbfd   :  { %v2323_v24 = vmul.f32 %v2322_v39, %v2298_v49  ;;  %v2326_v7 = vperm.slane %v2322_v39, 0  ;;  %v3531_v39 = vld [vmem:[#allocation22 + $0x28] sm:$0xff] }
 0xbff   :  { %v2324_v58 = vsub.f32 %v3249_v56, %v2323_v24  ;;  %v2328_v44 = vmul.f32 %v2326_v7, %v4844_v14  ;;  %v2329_v12 = vmul.f32 %v2326_v7, %v2286_v19  ;;  %v3651_v14 = vld [vmem:[%s4909_s20 + $0x1] ss:$0 sm:$0xff]  ;;  %2714 = vmatpush.bf16.msra.mxu1 %v3532_v32  ;;  %v3530_v7 = vld [vmem:[#allocation22 + $0x20] sm:$0xff] }
 0xc01   :  { %v2331_v42 = vperm.slane %v2324_v58, 0 }
 0xc03   :  { %v2334_v17 = vadd.f32 %v2331_v42, %v2329_v12  ;;  %v2333_v25 = vadd.f32 %v2331_v42, %v2328_v44  ;;  %2715 = vmatpush.bf16.msra.mxu1 %v3531_v39  ;;  %v3316_v12 = vld [vmem:[%s4911_s7 + $0x1] sm:$0x1] }
 0xc05   :  { %v2335_v59 = vadd.f32 %v2333_v25, %v4745_v10  ;;  %v2336_v26 = vadd.f32 %v2334_v17, %v4743_v5 }
 0xc07   :  { %v2354_v61 = vpack.c.bf16 %v2336_v26, %v2335_v59  ;;  %2716 = vmatpush.bf16.msra.mxu1 %v3530_v7 }
 0xc09   :  { %2416 = vmatmul.bf16.vlgmr.msrb.gmra.mxu0 %v2354_v61 }
 0xc86   :  { %v2417_v11 = vpop.f32.mrf.mxu0 }
 0xc87   :  { %v2418_v15 = vadd.f32 %v3651_v14, %v2417_v11 }
 0xc89   :  { %v2422_v9 = vmax.f32 %v2418_v15, 0.0 }
 0xc8e   :  { %v2419_v18 = vpop.f32.mrf.mxu0 }
 0xc8f   :  { %v2420_v19 = vadd.f32 %v3651_v14, %v2419_v18  ;;  %v3529_v18 = vld [vmem:[#allocation22 + $0x18] sm:$0xff] }
 0xc90   :  { %2717 = vmatpush.bf16.msra.mxu1 %v3529_v18 }
 0xc91   :  { %v2423_v10 = vmax.f32 %v2420_v19, 0.0  ;;  %v3528_v19 = vld [vmem:[#allocation22 + $0x10] sm:$0xff] }
 0xc93   :  { %v2441_v16 = vpack.c.bf16 %v2423_v10, %v2422_v9  ;;  %v3527_v9 = vld [vmem:[#allocation22 + $0x8] sm:$0xff]  ;;  %v3526_v10 = vld [vmem:[#allocation22] sm:$0xff] }
 0xc94   :  { %2718 = vmatpush.bf16.msra.mxu1 %v3528_v19 }
 0xc95   :  { %2503 = vmatmul.bf16.vlgmr.msra.gmra.mxu2 %v2441_v16  ;;  %v3541_v16 = vld [vmem:[#allocation23 + $0x38] sm:$0xff] }
 0xc96   :  { %2798 = vmatpush.bf16.msra.mxu0 %v3541_v16 }
 0xc98   :  { %2719 = vmatpush.bf16.msra.mxu1 %v3527_v9 }
 0xc9c   :  { %2720 = vmatpush.bf16.msra.mxu1 %v3526_v10 }
 0xd18   :  { %v2504_v5 = vpop.f32.mrf.mxu2 }
 0xd19   :  { %v2505_v8 = vadd.f32 %v3652_v21, %v2504_v5  ;;  %v3540_v5 = vld [vmem:[#allocation23 + $0x30] sm:$0xff] }
 0xd1a   :  { %2799 = vmatpush.bf16.msra.mxu0 %v3540_v5 }
 0xd1b   :  { %v2509_v52 = vadd.f32 %v2505_v8, %v2335_v59  ;;  %v2514_v59 = vld [vmem:[#allocation19 + $0x1] sm:$0x1] }
 0xd1d   :  { %v2523_v57 = vmul.f32 %v2509_v52, %v2509_v52 }
 0xd20   :  { %v2506_v23 = vpop.f32.mrf.mxu2 }
 0xd21   :  { %v2507_v35 = vadd.f32 %v3652_v21, %v2506_v23  ;;  %v3539_v21 = vld [vmem:[#allocation23 + $0x28] sm:$0xff] }
 0xd22   :  { %2800 = vmatpush.bf16.msra.mxu0 %v3539_v21 }
 0xd23   :  { %v2510_v46 = vadd.f32 %v2507_v35, %v2336_v26 }
 0xd25   :  { %v2515_v47 = vadd.f32 %v2510_v46, %v2509_v52  ;;  %v2524_v27 = vmul.f32 %v2510_v46, %v2510_v46 }
 0xd26   :  { %2801 = vmatpush.bf16.msra.mxu0 %v3538_v6 }
 0xd27   :  { %v2516_v54 = vrot.slane %v2515_v47, 4  ;;  %v2525_v60 = vadd.f32 %v2524_v27, %v2523_v57  ;;  %v3536_v27 = vld [vmem:[#allocation23 + $0x10] sm:$0xff] }
 0xd29   :  { %v2517_v4 = vadd.f32 %v2516_v54, %v2515_v47  ;;  %v2526_v28 = vrot.slane %v2525_v60, 4  ;;  %v3537_v47 = vld [vmem:[#allocation23 + $0x18] sm:$0xff]  ;;  %v3535_v54 = vld [vmem:[#allocation23 + $0x8] sm:$0xff] }
 0xd2a   :  { %2802 = vmatpush.bf16.msra.mxu0 %v3537_v47 }
 0xd2b   :  { %v2518_v49 = vrot.slane %v2517_v4, 2  ;;  %v2527_v30 = vadd.f32 %v2526_v28, %v2525_v60  ;;  %v3534_v60 = vld [vmem:[#allocation23] sm:$0xff] }
 0xd2d   :  { %v2519_v34 = vadd.f32 %v2518_v49, %v2517_v4  ;;  %v2528_v63 = vrot.slane %v2527_v30, 2  ;;  %v3654_v4 = vld [vmem:[%s4320_s3] ss:$0 sm:$0xff]  ;;  %s4083_s3 = sshra.s32 %s2821_s17, 4  ;;  %s4084_s3 = int_to_ptr.hbm [resolvable:$true] %s4083_s3 }
 0xd2e   :  { %2803 = vmatpush.bf16.msra.mxu0 %v3536_v27  ;;  %s4085_s11 = scalar_lea.hbm %s4084_s3, 16  ;;  %p4088_p1 = scmp.lt.s32.totalorder %s4084_s3, %s4335_s6 }
 0xd2f   :  { %v2520_v36 = vrot.slane %v2519_v34, 1  ;;  %v2529_v41 = vadd.f32 %v2528_v63, %v2527_v30  ;;  %p4086_p0 = scmp.ne.s32.totalorder %s4084_s3, %s4085_s11  ;;  %p4089_p2 = scmp.lt.s32.totalorder %s4087_s14, %s4085_s11 }
 0xd31   :  { %v2521_v40 = vadd.f32 %v2520_v36, %v2519_v34  ;;  %v2530_v55 = vrot.slane %v2529_v41, 1  ;;  %v3655_v36 = vld [vmem:[%s4330_s4] ss:$0 sm:$0xff]  ;;  %p4090_p3 = por %p4089_p2, %p4088_p1 }
 0xd32   :  { %2804 = vmatpush.bf16.msra.mxu0 %v3535_v54 }
 0xd33   :  { %v2522_v37 = vmul.f32 %v2521_v40, %v4545_v31  ;;  %v2531_v43 = vadd.f32 %v2530_v55, %v2529_v41  ;;  %p4091_p4 = pnand %p4090_p3, %p4086_p0 }
 0xd35   :  { %v2532_v20 = vmul.f32 %v2531_v43, %v4545_v31  ;;  %v2533_v22 = vmul.f32 %v2522_v37, %v2522_v37 }
 0xd36   :  { %2805 = vmatpush.bf16.msra.mxu0 %v3534_v60 }
 0xd37   :  { %v2534_v62 = vsub.f32 %v2532_v20, %v2533_v22 }
 0xd39   :  { %v2535_v50 = vadd.f32 1e-05, %v2534_v62 }
 0xd3b   :  { %3732 = vrsqrt.f32 %v2535_v50  ;;  %vm2542_vm3 = vweird.f32 %v2535_v50 }
 0xd41   :  { %v3733_v56 = vpop.eup %3732 }
 0xd42   :  { %v2537_v24 = vmul.f32 %v3733_v56, %v2535_v50  ;;  %vm2543_vm11 = vweird.f32 %v3733_v56 }
 0xd43   :  { %vm2544_vm13 = vmor %vm2542_vm3, %vm2543_vm11 }
 0xd44   :  { %v2538_v58 = vmul.f32 %v3733_v56, %v2537_v24 }
 0xd46   :  { %v2539_v44 = vmul.f32 0.5, %v2538_v58 }
 0xd48   :  { %v2540_v31 = vsub.f32 1.5, %v2539_v44 }
 0xd4a   :  { %v2541_v42 = vmul.f32 %v3733_v56, %v2540_v31 }
 0xd4c   :  { %v2545_v17 = vsel %vm2544_vm13, %v3733_v56, %v2541_v42 }
 0xd4d   :  { %v2546_v25 = vmul.f32 %v3316_v12, %v2545_v17 }
 0xd4f   :  { %v2547_v26 = vmul.f32 %v2546_v25, %v2522_v37  ;;  %v2550_v61 = vperm.slane %v2546_v25, 0 }
 0xd51   :  { %v2548_v0 = vsub.f32 %v2514_v59, %v2547_v26  ;;  %v2552_v1 = vmul.f32 %v2550_v61, %v2509_v52  ;;  %v2553_v2 = vmul.f32 %v2550_v61, %v2510_v46 }
 0xd53   :  { %v2555_v3 = vperm.slane %v2548_v0, 0 }
 0xd55   :  { %v2558_v11 = vadd.f32 %v2555_v3, %v2553_v2  ;;  %v2557_v14 = vadd.f32 %v2555_v3, %v2552_v1 }
 0xd57   :  { %v2575_v15 = vpack.c.bf16 %v2558_v11, %v2557_v14 }
 0xd59   :  { %2636 = vmatmul.bf16.vlgmr.msra.gmra.mxu3 %v2575_v15 }
 0xddc   :  { %v2637_v8 = vpop.f32.mrf.mxu3 }
 0xddd   :  { %v2638_v23 = vadd.f32 %v3653_v48, %v2637_v8 }
 0xddf   :  { %v2642_v46 = vmax.f32 %v2638_v23, 0.0 }
 0xde4   :  { %v2639_v52 = vpop.f32.mrf.mxu3 }
 0xde5   :  { %v2640_v35 = vadd.f32 %v3653_v48, %v2639_v52 }
 0xde7   :  { %v2643_v29 = vmax.f32 %v2640_v35, 0.0 }
 0xde9   :  { %v2660_v57 = vpack.c.bf16 %v2643_v29, %v2642_v46 }
 0xdeb   :  { %2721 = vmatmul.bf16.vlgmr.msra.gmra.mxu1 %v2660_v57 }
 0xe68   :  { %v2722_v53 = vpop.f32.mrf.mxu1 }
 0xe69   :  { %v2723_v28 = vadd.f32 %v3654_v4, %v2722_v53 }
 0xe6b   :  { %v2727_v33 = vmax.f32 %v2723_v28, 0.0 }
 0xe70   :  { %v2724_v49 = vpop.f32.mrf.mxu1 }
 0xe71   :  { %v2725_v30 = vadd.f32 %v3654_v4, %v2724_v49 }
 0xe73   :  { %v2728_v34 = vmax.f32 %v2725_v30, 0.0 }
 0xe75   :  { %v2745_v63 = vpack.c.bf16 %v2728_v34, %v2727_v33 }
 0xe77   :  { %2806 = vmatmul.bf16.vlgmr.msra.gmra.mxu0 %v2745_v63 }
 0xef4   :  { %v2807_v41 = vpop.f32.mrf.mxu0 }
 0xef5   :  { %v2808_v38 = vadd.f32 %v3655_v36, %v2807_v41 }
 0xef7   :  { %2812 = vst [vmem:[#allocation25] sm:$0xff] %v2808_v38 }
 0xefc   :  { %v2809_v40 = vpop.f32.mrf.mxu0 }
 0xefd   :  { %v2810_v55 = vadd.f32 %v3655_v36, %v2809_v40 }
 0xeff   :  { %2813 = vst [vmem:[#allocation25 + $0x8] sm:$0xff] %v2810_v55 }
 0xf00   :  { %4094 = shalt.err (!%p4091_p4)
}
 0xf01   :  { %s4175_s4 = smov 128   ;;  %s4176_s16 = smov 8  }
 0xf02   :  { %2826 = dma.vmem_to_hbm [thread:$0]  %s2819_s29, 256, %s2821_s17, [#allocation4], %s4175_s4, %s4175_s4, %s4176_s16  }
 0xf03   :  { %4111 = dma.done.wait [#allocation4], 256  }
 0xf04   :  { %4112 = vsyncadd [#allocation4], 4294967040 }
 0xf05   :  { %2831 = vsyncpa [#allocation3], 1 }
 0xf06   :  { %2832 = vsyncpa [#allocation6], 1 }
 0xf07   :  { %2833 = vsyncpa [#allocation9], 1 }
 0xf08   :  { %2834 = vsyncpa [#allocation12], 1 }
 0xf09   :  { %2835 = vsyncpa [#allocation15], 1 }
 0xf0a   :  { %2836 = vsyncpa [#allocation18], 1 }
 0xf0b   :  { %2837 = vsyncpa [#allocation21], 1 }
 0xf0c   :  { %2838 = vsyncpa [#allocation24], 1 }
 0xf0d   :  { %2839 = vsyncpa [#allocation4], 1 }

</bundles_post_ra>
